<compile_context>
chip_gen: v6e
topology: v6e:2x2x1
jax: 0.10.0
libtpu: 0.0.40
codegen_flags: <defaults>
</compile_context>

<pallas_src>
import math

import jax
import jax.numpy as jnp
from jax.experimental import pallas as pl
from jax.experimental.pallas import tpu as pltpu

SIZES = [2048, 1024, 512, 256, 128, 32, 16, 2]
N_HIDDEN = len(SIZES) - 2  # 6 hidden (Linear+BN+GELU+Dropout) blocks
BN_EPS = 1e-5

N_SPLIT_L1 = 2                       # grid steps streaming W1 / W2 (sweep {1,2,4})
CHUNK_L1 = SIZES[1] // N_SPLIT_L1    # 512 columns of h1 per step


def _gelu_exact(x):
    # PyTorch nn.GELU() default: 0.5 * x * (1 + erf(x / sqrt(2)))
    return 0.5 * x * (1.0 + jax.lax.erf(x * (1.0 / math.sqrt(2.0))))


def geo_predictor_kernel(
        x_ref, w1_ref, s1_ref, b1_ref, w2_ref, s2_ref, b2_ref,
        w3_ref, s3_ref, b3_ref, w4_ref, b4_ref, w5_ref, b5_ref,
        w6_ref, b6_ref, wl_ref, bl_ref, out_ref, acc_ref):
    j = pl.program_id(0)

    @pl.when(j == 0)
    def _init():
        acc_ref[...] = jnp.zeros_like(acc_ref)

    # ---- Layer 0 (2048 -> 1024): one CHUNK_L1-wide column slab per grid step.
    #      int8 weights dequantized to bf16 on the VPU; fp32 MXU accumulation;
    #      per-column quant scale applied to the fp32 result.
    w1 = w1_ref[0].astype(jnp.bfloat16)                       # (2048, CHUNK)
    h = jnp.dot(x_ref[...], w1, preferred_element_type=jnp.float32)
    h = _gelu_exact(h * s1_ref[...] + b1_ref[...])

    # ---- Layer 1 (1024 -> 512): accumulate this chunk's row block of W2 so its
    #      DMA also overlaps compute.
    acc_ref[...] += jnp.dot(h.astype(jnp.bfloat16),
                            w2_ref[...].astype(jnp.bfloat16),
                            preferred_element_type=jnp.float32)

    @pl.when(j == pl.num_programs(0) - 1)
    def _tail():
        a = _gelu_exact(acc_ref[...] * s2_ref[...] + b2_ref[...])

        # Layer 2 (512 -> 256), int8 weights.
        a = jnp.dot(a.astype(jnp.bfloat16), w3_ref[...].astype(jnp.bfloat16),
                    preferred_element_type=jnp.float32)
        a = _gelu_exact(a * s3_ref[...] + b3_ref[...])

        # Layer 3 (256 -> 128), bf16 weights.
        a = jnp.dot(a.astype(jnp.bfloat16), w4_ref[...],
                    preferred_element_type=jnp.float32) + b4_ref[...]
        a = _gelu_exact(a)

        # Layers 4..5 (128->32->16) and final head (16->2), tiny, fp32.
        a = _gelu_exact(jnp.dot(a, w5_ref[...],
                                preferred_element_type=jnp.float32) + b5_ref[...])
        a = _gelu_exact(jnp.dot(a, w6_ref[...],
                                preferred_element_type=jnp.float32) + b6_ref[...])
        a = jnp.dot(a, wl_ref[...],
                    preferred_element_type=jnp.float32) + bl_ref[...]
        out_ref[...] = a.astype(out_ref.dtype)


def _quantize_cols_int8(w):
    """Symmetric per-output-column int8 quantization of a (fan_in, fan_out) matrix."""
    amax = jnp.max(jnp.abs(w), axis=0, keepdims=True)          # (1, fan_out)
    scale = jnp.maximum(amax, 1e-8) / 127.0
    q = jnp.clip(jnp.round(w / scale), -127, 127).astype(jnp.int8)
    return q, scale.astype(jnp.float32)


def init_params(key):
    """PyTorch-style init; eval-mode BN folded into the Linear; W1/W2/W3 stored
    int8 (per-column scales), W4 bf16, tail fp32; W1 pre-permuted chunk-contiguous."""
    folded = []
    for i in range(N_HIDDEN):
        fan_in, fan_out = SIZES[i], SIZES[i + 1]
        key, kw, kb, kg, kbe, km, kv = jax.random.split(key, 7)
        bound = 1.0 / math.sqrt(fan_in)
        w = jax.random.uniform(kw, (fan_in, fan_out), jnp.float32, -bound, bound)
        b = jax.random.uniform(kb, (1, fan_out), jnp.float32, -bound, bound)
        gamma = jax.random.uniform(kg, (1, fan_out), jnp.float32, 0.8, 1.2)
        beta = 0.1 * jax.random.normal(kbe, (1, fan_out), jnp.float32)
        running_mean = 0.1 * jax.random.normal(km, (1, fan_out), jnp.float32)
        running_var = jax.random.uniform(kv, (1, fan_out), jnp.float32, 0.5, 1.5)
        scale = gamma / jnp.sqrt(running_var + BN_EPS)
        shift = beta - running_mean * scale
        folded.append((w * scale, b * scale + shift))   # exact eval-mode BN fold

    # Final Linear(16, 2).
    fan_in, fan_out = SIZES[-2], SIZES[-1]
    key, kw, kb = jax.random.split(key, 3)
    bound = 1.0 / math.sqrt(fan_in)
    w_last = jax.random.uniform(kw, (fan_in, fan_out), jnp.float32, -bound, bound)
    b_last = jax.random.uniform(kb, (1, fan_out), jnp.float32, -bound, bound)

    p = {}
    # Layer 0: int8, pre-permuted to chunk-contiguous (N_SPLIT, 2048, CHUNK).
    q1, s1 = _quantize_cols_int8(folded[0][0])
    p["w1q"] = q1.reshape(SIZES[0], N_SPLIT_L1, CHUNK_L1).transpose(1, 0, 2)
    p["s1"], p["b1"] = s1, folded[0][1]
    # Layer 1: int8, row-chunked at DMA time (already contiguous per row block).
    p["w2q"], p["s2"] = _quantize_cols_int8(folded[1][0])
    p["b2"] = folded[1][1]
    # Layer 2: int8.
    p["w3q"], p["s3"] = _quantize_cols_int8(folded[2][0])
    p["b3"] = folded[2][1]
    # Layer 3: bf16.
    p["w4"], p["b4"] = folded[3][0].astype(jnp.bfloat16), folded[3][1]
    # Layers 4..5 + head: fp32 (tiny).
    p["w5"], p["b5"] = folded[4][0], folded[4][1]
    p["w6"], p["b6"] = folded[5][0], folded[5][1]
    p["wl"], p["bl"] = w_last, b_last
    return p


def geo_predictor_forward(x, p):
    B = x.shape[0]
    x_bf16 = x.astype(jnp.bfloat16)   # halve x's DMA, avoid per-step casts

    def const_spec(shape):
        return pl.BlockSpec(shape, lambda j: (0,) * len(shape))

    in_specs = [
        const_spec((B, SIZES[0])),                                   # x (resident)
        pl.BlockSpec((1, SIZES[0], CHUNK_L1), lambda j: (j, 0, 0)),  # W1q chunk (contiguous)
        pl.BlockSpec((1, CHUNK_L1), lambda j: (0, j)),               # s1 chunk
        pl.BlockSpec((1, CHUNK_L1), lambda j: (0, j)),               # b1 chunk
        pl.BlockSpec((CHUNK_L1, SIZES[2]), lambda j: (j, 0)),        # W2q row chunk
        const_spec((1, SIZES[2])),                                   # s2
        const_spec((1, SIZES[2])),                                   # b2
        const_spec((SIZES[2], SIZES[3])),                            # W3q
        const_spec((1, SIZES[3])),                                   # s3
        const_spec((1, SIZES[3])),                                   # b3
        const_spec((SIZES[3], SIZES[4])),                            # W4 (bf16)
        const_spec((1, SIZES[4])),                                   # b4
        const_spec((SIZES[4], SIZES[5])),                            # W5
        const_spec((1, SIZES[5])),                                   # b5
        const_spec((SIZES[5], SIZES[6])),                            # W6
        const_spec((1, SIZES[6])),                                   # b6
        const_spec((SIZES[6], SIZES[7])),                            # W_last
        const_spec((1, SIZES[7])),                                   # b_last
    ]

    grid_spec = pltpu.PrefetchScalarGridSpec(
        num_scalar_prefetch=0,
        grid=(N_SPLIT_L1,),
        in_specs=in_specs,
        out_specs=pl.BlockSpec((B, SIZES[-1]), lambda j: (0, 0)),
        scratch_shapes=[pltpu.VMEM((B, SIZES[2]), jnp.float32)],
    )

    return pl.pallas_call(
        geo_predictor_kernel,
        out_shape=jax.ShapeDtypeStruct((B, SIZES[-1]), jnp.float32),
        grid_spec=grid_spec,
        compiler_params=pltpu.CompilerParams(
            # Output/accumulator are revisited across the streaming axis.
            dimension_semantics=("arbitrary",),
        ),
    )(x_bf16, p["w1q"], p["s1"], p["b1"], p["w2q"], p["s2"], p["b2"],
      p["w3q"], p["s3"], p["b3"], p["w4"], p["b4"], p["w5"], p["b5"],
      p["w6"], p["b6"], p["wl"], p["bl"])


def geo_predictor_reference(x, p):
    """Pure-JAX reference using the same folded / quantized params as the kernel."""
    h = x.astype(jnp.bfloat16)
    # Layer 0 (reconstruct full W1 from the chunk-contiguous layout).
    w1 = p["w1q"].transpose(1, 0, 2).reshape(SIZES[0], SIZES[1])
    a = jnp.dot(h, w1.astype(jnp.bfloat16), preferred_element_type=jnp.float32)
    a = _gelu_exact(a * p["s1"] + p["b1"])
    # Layer 1.
    a = jnp.dot(a.astype(jnp.bfloat16), p["w2q"].astype(jnp.bfloat16),
                preferred_element_type=jnp.float32)
    a = _gelu_exact(a * p["s2"] + p["b2"])
    # Layer 2.
    a = jnp.dot(a.astype(jnp.bfloat16), p["w3q"].astype(jnp.bfloat16),
                preferred_element_type=jnp.float32)
    a = _gelu_exact(a * p["s3"] + p["b3"])
    # Layer 3 (bf16).
    a = jnp.dot(a.astype(jnp.bfloat16), p["w4"],
                preferred_element_type=jnp.float32) + p["b4"]
    a = _gelu_exact(a)
    # Layers 4..5 + head (fp32).
    a = _gelu_exact(jnp.dot(a, p["w5"], preferred_element_type=jnp.float32) + p["b5"])
    a = _gelu_exact(jnp.dot(a, p["w6"], preferred_element_type=jnp.float32) + p["b6"])
    return jnp.dot(a, p["wl"], preferred_element_type=jnp.float32) + p["bl"]


if __name__ == "__main__":
    key = jax.random.PRNGKey(0)
    key, kx, kp = jax.random.split(key, 3)

    B = 8  # small batch, sublane-aligned
    x = jax.random.normal(kx, (B, SIZES[0]), jnp.float32)
    params = init_params(kp)

    out = jax.block_until_ready(geo_predictor_forward(x, params))

    ref = geo_predictor_reference(x, params)
    assert out.shape == (B, SIZES[-1])
    assert jnp.allclose(out, ref, rtol=1e-2, atol=1e-2), "mismatch vs JAX reference"

    print("KERNEL_OK")
</pallas_src>

<mosaic_0001>
module attributes {stable_mosaic.version = 11 : i64} {
  func.func @geo_predictor_kernel(%arg0: i32, %arg1: memref<8x2048xbf16, #tpu.memory_space<vmem>>, %arg2: memref<1x2048x512xi8, #tpu.memory_space<vmem>>, %arg3: memref<1x512xf32, #tpu.memory_space<vmem>>, %arg4: memref<1x512xf32, #tpu.memory_space<vmem>>, %arg5: memref<512x512xi8, #tpu.memory_space<vmem>>, %arg6: memref<1x512xf32, #tpu.memory_space<vmem>>, %arg7: memref<1x512xf32, #tpu.memory_space<vmem>>, %arg8: memref<512x256xi8, #tpu.memory_space<vmem>>, %arg9: memref<1x256xf32, #tpu.memory_space<vmem>>, %arg10: memref<1x256xf32, #tpu.memory_space<vmem>>, %arg11: memref<256x128xbf16, #tpu.memory_space<vmem>>, %arg12: memref<1x128xf32, #tpu.memory_space<vmem>>, %arg13: memref<128x32xf32, #tpu.memory_space<vmem>>, %arg14: memref<1x32xf32, #tpu.memory_space<vmem>>, %arg15: memref<32x16xf32, #tpu.memory_space<vmem>>, %arg16: memref<1x16xf32, #tpu.memory_space<vmem>>, %arg17: memref<16x2xf32, #tpu.memory_space<vmem>>, %arg18: memref<1x2xf32, #tpu.memory_space<vmem>>, %arg19: memref<8x2xf32, #tpu.memory_space<vmem>>, %arg20: memref<8x512xf32, #tpu.memory_space<vmem>>) attributes {dimension_semantics = [#tpu.dimension_semantics<arbitrary>], iteration_bounds = array<i64: 2>, scalar_prefetch = 0 : i64, scratch_operands = 1 : i64, tpu.core_type = #tpu.core_type<tc>, window_params = [{pipeline_mode = #tpu.pipeline_mode<synchronous>, transform_indices = @transform_0, window_bounds = array<i64: 8, 2048>}, {transform_indices = @transform_1, window_bounds = array<i64: 1, 2048, 512>}, {transform_indices = @transform_2, window_bounds = array<i64: 1, 512>}, {transform_indices = @transform_3, window_bounds = array<i64: 1, 512>}, {transform_indices = @transform_4, window_bounds = array<i64: 512, 512>}, {pipeline_mode = #tpu.pipeline_mode<synchronous>, transform_indices = @transform_5, window_bounds = array<i64: 1, 512>}, {pipeline_mode = #tpu.pipeline_mode<synchronous>, transform_indices = @transform_6, window_bounds = array<i64: 1, 512>}, {pipeline_mode = #tpu.pipeline_mode<synchronous>, transform_indices = @transform_7, window_bounds = array<i64: 512, 256>}, {pipeline_mode = #tpu.pipeline_mode<synchronous>, transform_indices = @transform_8, window_bounds = array<i64: 1, 256>}, {pipeline_mode = #tpu.pipeline_mode<synchronous>, transform_indices = @transform_9, window_bounds = array<i64: 1, 256>}, {pipeline_mode = #tpu.pipeline_mode<synchronous>, transform_indices = @transform_10, window_bounds = array<i64: 256, 128>}, {pipeline_mode = #tpu.pipeline_mode<synchronous>, transform_indices = @transform_11, window_bounds = array<i64: 1, 128>}, {pipeline_mode = #tpu.pipeline_mode<synchronous>, transform_indices = @transform_12, window_bounds = array<i64: 128, 32>}, {pipeline_mode = #tpu.pipeline_mode<synchronous>, transform_indices = @transform_13, window_bounds = array<i64: 1, 32>}, {pipeline_mode = #tpu.pipeline_mode<synchronous>, transform_indices = @transform_14, window_bounds = array<i64: 32, 16>}, {pipeline_mode = #tpu.pipeline_mode<synchronous>, transform_indices = @transform_15, window_bounds = array<i64: 1, 16>}, {pipeline_mode = #tpu.pipeline_mode<synchronous>, transform_indices = @transform_16, window_bounds = array<i64: 16, 2>}, {pipeline_mode = #tpu.pipeline_mode<synchronous>, transform_indices = @transform_17, window_bounds = array<i64: 1, 2>}, {pipeline_mode = #tpu.pipeline_mode<synchronous>, transform_indices = @transform_18, window_bounds = array<i64: 8, 2>}]} {
    %c0_i32 = arith.constant 0 : i32
    %0 = arith.cmpi eq, %arg0, %c0_i32 : i32
    %1 = arith.extui %0 : i1 to i32
    %c0_i32_0 = arith.constant 0 : i32
    %2 = arith.cmpi ne, %1, %c0_i32_0 : i32
    scf.if %2 {
      %cst_20 = arith.constant 0.000000e+00 : f32
      %32 = vector.broadcast %cst_20 : f32 to vector<8x512xf32>
      %c0_21 = arith.constant 0 : index
      %c0_22 = arith.constant 0 : index
      %33 = vector.load %arg20[%c0_21, %c0_22] : memref<8x512xf32, #tpu.memory_space<vmem>>, vector<8x512xf32>
      tpu.vector_store %arg20[%c0_21, %c0_22], %32 {strides = array<i32>} : memref<8x512xf32, #tpu.memory_space<vmem>>, vector<8x512xf32>,
    } else {
    }
    %c0 = arith.constant 0 : index
    %c0_1 = arith.constant 0 : index
    %c0_2 = arith.constant 0 : index
    %3 = vector.load %arg2[%c0, %c0_1, %c0_2] : memref<1x2048x512xi8, #tpu.memory_space<vmem>>, vector<1x2048x512xi8>
    %4 = vector.shape_cast %3 : vector<1x2048x512xi8> to vector<2048x512xi8>
    %5 = arith.sitofp %4 : vector<2048x512xi8> to vector<2048x512xbf16>
    %c0_3 = arith.constant 0 : index
    %c0_4 = arith.constant 0 : index
    %6 = vector.load %arg1[%c0_3, %c0_4] : memref<8x2048xbf16, #tpu.memory_space<vmem>>, vector<8x2048xbf16>
    %cst = arith.constant dense<0.000000e+00> : vector<8x512xf32>
    %7 = tpu.matmul %6, %5, %cst {dimension_numbers = #tpu.dot_dimension_numbers<[1], [0], [0], [1], [0, 0, 1, 1], [], []>} : vector<8x2048xbf16>, vector<2048x512xbf16>, vector<8x512xf32> -> vector<8x512xf32>
    %c0_5 = arith.constant 0 : index
    %c0_6 = arith.constant 0 : index
    %8 = vector.load %arg3[%c0_5, %c0_6] : memref<1x512xf32, #tpu.memory_space<vmem>>, vector<1x512xf32>
    %9 = vector.broadcast %8 : vector<1x512xf32> to vector<8x512xf32>
    %10 = arith.mulf %7, %9 : vector<8x512xf32>
    %c0_7 = arith.constant 0 : index
    %c0_8 = arith.constant 0 : index
    %11 = vector.load %arg4[%c0_7, %c0_8] : memref<1x512xf32, #tpu.memory_space<vmem>>, vector<1x512xf32>
    %12 = vector.broadcast %11 : vector<1x512xf32> to vector<8x512xf32>
    %13 = arith.addf %10, %12 : vector<8x512xf32>
    %cst_9 = arith.constant 5.000000e-01 : f32
    %14 = vector.broadcast %cst_9 : f32 to vector<8x512xf32>
    %15 = arith.mulf %14, %13 : vector<8x512xf32>
    %cst_10 = arith.constant 0.707106769 : f32
    %16 = vector.broadcast %cst_10 : f32 to vector<8x512xf32>
    %17 = arith.mulf %13, %16 : vector<8x512xf32>
    %18 = math.erf %17 : vector<8x512xf32>
    %cst_11 = arith.constant 1.000000e+00 : f32
    %19 = vector.broadcast %cst_11 : f32 to vector<8x512xf32>
    %20 = arith.addf %19, %18 : vector<8x512xf32>
    %21 = arith.mulf %15, %20 : vector<8x512xf32>
    %c0_12 = arith.constant 0 : index
    %c0_13 = arith.constant 0 : index
    %22 = vector.load %arg20[%c0_12, %c0_13] : memref<8x512xf32, #tpu.memory_space<vmem>>, vector<8x512xf32>
    %23 = arith.truncf %21 : vector<8x512xf32> to vector<8x512xbf16>
    %c0_14 = arith.constant 0 : index
    %c0_15 = arith.constant 0 : index
    %24 = vector.load %arg5[%c0_14, %c0_15] : memref<512x512xi8, #tpu.memory_space<vmem>>, vector<512x512xi8>
    %25 = arith.sitofp %24 : vector<512x512xi8> to vector<512x512xbf16>
    %cst_16 = arith.constant dense<0.000000e+00> : vector<8x512xf32>
    %26 = tpu.matmul %23, %25, %cst_16 {dimension_numbers = #tpu.dot_dimension_numbers<[1], [0], [0], [1], [0, 0, 1, 1], [], []>} : vector<8x512xbf16>, vector<512x512xbf16>, vector<8x512xf32> -> vector<8x512xf32>
    %27 = arith.addf %22, %26 : vector<8x512xf32>
    %c0_17 = arith.constant 0 : index
    %c0_18 = arith.constant 0 : index
    %28 = vector.load %arg20[%c0_17, %c0_18] : memref<8x512xf32, #tpu.memory_space<vmem>>, vector<8x512xf32>
    tpu.vector_store %arg20[%c0_17, %c0_18], %27 {strides = array<i32>} : memref<8x512xf32, #tpu.memory_space<vmem>>, vector<8x512xf32>,
    %c1_i32 = arith.constant 1 : i32
    %29 = arith.cmpi eq, %arg0, %c1_i32 : i32
    %30 = arith.extui %29 : i1 to i32
    %c0_i32_19 = arith.constant 0 : i32
    %31 = arith.cmpi ne, %30, %c0_i32_19 : i32
    scf.if %31 {
      %c0_20 = arith.constant 0 : index
      %c0_21 = arith.constant 0 : index
      %32 = vector.load %arg20[%c0_20, %c0_21] : memref<8x512xf32, #tpu.memory_space<vmem>>, vector<8x512xf32>
      %c0_22 = arith.constant 0 : index
      %c0_23 = arith.constant 0 : index
      %33 = vector.load %arg6[%c0_22, %c0_23] : memref<1x512xf32, #tpu.memory_space<vmem>>, vector<1x512xf32>
      %34 = vector.broadcast %33 : vector<1x512xf32> to vector<8x512xf32>
      %35 = arith.mulf %32, %34 : vector<8x512xf32>
      %c0_24 = arith.constant 0 : index
      %c0_25 = arith.constant 0 : index
      %36 = vector.load %arg7[%c0_24, %c0_25] : memref<1x512xf32, #tpu.memory_space<vmem>>, vector<1x512xf32>
      %37 = vector.broadcast %36 : vector<1x512xf32> to vector<8x512xf32>
      %38 = arith.addf %35, %37 : vector<8x512xf32>
      %cst_26 = arith.constant 5.000000e-01 : f32
      %39 = vector.broadcast %cst_26 : f32 to vector<8x512xf32>
      %40 = arith.mulf %39, %38 : vector<8x512xf32>
      %cst_27 = arith.constant 0.707106769 : f32
      %41 = vector.broadcast %cst_27 : f32 to vector<8x512xf32>
      %42 = arith.mulf %38, %41 : vector<8x512xf32>
      %43 = math.erf %42 : vector<8x512xf32>
      %cst_28 = arith.constant 1.000000e+00 : f32
      %44 = vector.broadcast %cst_28 : f32 to vector<8x512xf32>
      %45 = arith.addf %44, %43 : vector<8x512xf32>
      %46 = arith.mulf %40, %45 : vector<8x512xf32>
      %47 = arith.truncf %46 : vector<8x512xf32> to vector<8x512xbf16>
      %c0_29 = arith.constant 0 : index
      %c0_30 = arith.constant 0 : index
      %48 = vector.load %arg8[%c0_29, %c0_30] : memref<512x256xi8, #tpu.memory_space<vmem>>, vector<512x256xi8>
      %49 = arith.sitofp %48 : vector<512x256xi8> to vector<512x256xbf16>
      %cst_31 = arith.constant dense<0.000000e+00> : vector<8x256xf32>
      %50 = tpu.matmul %47, %49, %cst_31 {dimension_numbers = #tpu.dot_dimension_numbers<[1], [0], [0], [1], [0, 0, 1, 1], [], []>} : vector<8x512xbf16>, vector<512x256xbf16>, vector<8x256xf32> -> vector<8x256xf32>
      %c0_32 = arith.constant 0 : index
      %c0_33 = arith.constant 0 : index
      %51 = vector.load %arg9[%c0_32, %c0_33] : memref<1x256xf32, #tpu.memory_space<vmem>>, vector<1x256xf32>
      %52 = vector.broadcast %51 : vector<1x256xf32> to vector<8x256xf32>
      %53 = arith.mulf %50, %52 : vector<8x256xf32>
      %c0_34 = arith.constant 0 : index
      %c0_35 = arith.constant 0 : index
      %54 = vector.load %arg10[%c0_34, %c0_35] : memref<1x256xf32, #tpu.memory_space<vmem>>, vector<1x256xf32>
      %55 = vector.broadcast %54 : vector<1x256xf32> to vector<8x256xf32>
      %56 = arith.addf %53, %55 : vector<8x256xf32>
      %cst_36 = arith.constant 5.000000e-01 : f32
      %57 = vector.broadcast %cst_36 : f32 to vector<8x256xf32>
      %58 = arith.mulf %57, %56 : vector<8x256xf32>
      %cst_37 = arith.constant 0.707106769 : f32
      %59 = vector.broadcast %cst_37 : f32 to vector<8x256xf32>
      %60 = arith.mulf %56, %59 : vector<8x256xf32>
      %61 = math.erf %60 : vector<8x256xf32>
      %cst_38 = arith.constant 1.000000e+00 : f32
      %62 = vector.broadcast %cst_38 : f32 to vector<8x256xf32>
      %63 = arith.addf %62, %61 : vector<8x256xf32>
      %64 = arith.mulf %58, %63 : vector<8x256xf32>
      %65 = arith.truncf %64 : vector<8x256xf32> to vector<8x256xbf16>
      %c0_39 = arith.constant 0 : index
      %c0_40 = arith.constant 0 : index
      %66 = vector.load %arg11[%c0_39, %c0_40] : memref<256x128xbf16, #tpu.memory_space<vmem>>, vector<256x128xbf16>
      %cst_41 = arith.constant dense<0.000000e+00> : vector<8x128xf32>
      %67 = tpu.matmul %65, %66, %cst_41 {dimension_numbers = #tpu.dot_dimension_numbers<[1], [0], [0], [1], [0, 0, 1, 1], [], []>} : vector<8x256xbf16>, vector<256x128xbf16>, vector<8x128xf32> -> vector<8x128xf32>
      %c0_42 = arith.constant 0 : index
      %c0_43 = arith.constant 0 : index
      %68 = vector.load %arg12[%c0_42, %c0_43] : memref<1x128xf32, #tpu.memory_space<vmem>>, vector<1x128xf32>
      %69 = vector.broadcast %68 : vector<1x128xf32> to vector<8x128xf32>
      %70 = arith.addf %67, %69 : vector<8x128xf32>
      %cst_44 = arith.constant 5.000000e-01 : f32
      %71 = vector.broadcast %cst_44 : f32 to vector<8x128xf32>
      %72 = arith.mulf %71, %70 : vector<8x128xf32>
      %cst_45 = arith.constant 0.707106769 : f32
      %73 = vector.broadcast %cst_45 : f32 to vector<8x128xf32>
      %74 = arith.mulf %70, %73 : vector<8x128xf32>
      %75 = math.erf %74 : vector<8x128xf32>
      %cst_46 = arith.constant 1.000000e+00 : f32
      %76 = vector.broadcast %cst_46 : f32 to vector<8x128xf32>
      %77 = arith.addf %76, %75 : vector<8x128xf32>
      %78 = arith.mulf %72, %77 : vector<8x128xf32>
      %c0_47 = arith.constant 0 : index
      %c0_48 = arith.constant 0 : index
      %79 = vector.load %arg13[%c0_47, %c0_48] : memref<128x32xf32, #tpu.memory_space<vmem>>, vector<128x32xf32>
      %cst_49 = arith.constant dense<0.000000e+00> : vector<8x32xf32>
      %80 = tpu.matmul %78, %79, %cst_49 {dimension_numbers = #tpu.dot_dimension_numbers<[1], [0], [0], [1], [0, 0, 1, 1], [], []>} : vector<8x128xf32>, vector<128x32xf32>, vector<8x32xf32> -> vector<8x32xf32>
      %c0_50 = arith.constant 0 : index
      %c0_51 = arith.constant 0 : index
      %81 = vector.load %arg14[%c0_50, %c0_51] : memref<1x32xf32, #tpu.memory_space<vmem>>, vector<1x32xf32>
      %82 = vector.broadcast %81 : vector<1x32xf32> to vector<8x32xf32>
      %83 = arith.addf %80, %82 : vector<8x32xf32>
      %cst_52 = arith.constant 5.000000e-01 : f32
      %84 = vector.broadcast %cst_52 : f32 to vector<8x32xf32>
      %85 = arith.mulf %84, %83 : vector<8x32xf32>
      %cst_53 = arith.constant 0.707106769 : f32
      %86 = vector.broadcast %cst_53 : f32 to vector<8x32xf32>
      %87 = arith.mulf %83, %86 : vector<8x32xf32>
      %88 = math.erf %87 : vector<8x32xf32>
      %cst_54 = arith.constant 1.000000e+00 : f32
      %89 = vector.broadcast %cst_54 : f32 to vector<8x32xf32>
      %90 = arith.addf %89, %88 : vector<8x32xf32>
      %91 = arith.mulf %85, %90 : vector<8x32xf32>
      %c0_55 = arith.constant 0 : index
      %c0_56 = arith.constant 0 : index
      %92 = vector.load %arg15[%c0_55, %c0_56] : memref<32x16xf32, #tpu.memory_space<vmem>>, vector<32x16xf32>
      %cst_57 = arith.constant dense<0.000000e+00> : vector<8x16xf32>
      %93 = tpu.matmul %91, %92, %cst_57 {dimension_numbers = #tpu.dot_dimension_numbers<[1], [0], [0], [1], [0, 0, 1, 1], [], []>} : vector<8x32xf32>, vector<32x16xf32>, vector<8x16xf32> -> vector<8x16xf32>
      %c0_58 = arith.constant 0 : index
      %c0_59 = arith.constant 0 : index
      %94 = vector.load %arg16[%c0_58, %c0_59] : memref<1x16xf32, #tpu.memory_space<vmem>>, vector<1x16xf32>
      %95 = vector.broadcast %94 : vector<1x16xf32> to vector<8x16xf32>
      %96 = arith.addf %93, %95 : vector<8x16xf32>
      %cst_60 = arith.constant 5.000000e-01 : f32
      %97 = vector.broadcast %cst_60 : f32 to vector<8x16xf32>
      %98 = arith.mulf %97, %96 : vector<8x16xf32>
      %cst_61 = arith.constant 0.707106769 : f32
      %99 = vector.broadcast %cst_61 : f32 to vector<8x16xf32>
      %100 = arith.mulf %96, %99 : vector<8x16xf32>
      %101 = math.erf %100 : vector<8x16xf32>
      %cst_62 = arith.constant 1.000000e+00 : f32
      %102 = vector.broadcast %cst_62 : f32 to vector<8x16xf32>
      %103 = arith.addf %102, %101 : vector<8x16xf32>
      %104 = arith.mulf %98, %103 : vector<8x16xf32>
      %c0_63 = arith.constant 0 : index
      %c0_64 = arith.constant 0 : index
      %105 = vector.load %arg17[%c0_63, %c0_64] : memref<16x2xf32, #tpu.memory_space<vmem>>, vector<16x2xf32>
      %cst_65 = arith.constant dense<0.000000e+00> : vector<8x2xf32>
      %106 = tpu.matmul %104, %105, %cst_65 {dimension_numbers = #tpu.dot_dimension_numbers<[1], [0], [0], [1], [0, 0, 1, 1], [], []>} : vector<8x16xf32>, vector<16x2xf32>, vector<8x2xf32> -> vector<8x2xf32>
      %c0_66 = arith.constant 0 : index
      %c0_67 = arith.constant 0 : index
      %107 = vector.load %arg18[%c0_66, %c0_67] : memref<1x2xf32, #tpu.memory_space<vmem>>, vector<1x2xf32>
      %108 = vector.broadcast %107 : vector<1x2xf32> to vector<8x2xf32>
      %109 = arith.addf %106, %108 : vector<8x2xf32>
      %c0_68 = arith.constant 0 : index
      %c0_69 = arith.constant 0 : index
      %110 = vector.load %arg19[%c0_68, %c0_69] : memref<8x2xf32, #tpu.memory_space<vmem>>, vector<8x2xf32>
      tpu.vector_store %arg19[%c0_68, %c0_69], %109 {strides = array<i32>} : memref<8x2xf32, #tpu.memory_space<vmem>>, vector<8x2xf32>,
    } else {
    }
    return
  }
  func.func @transform_0(%arg0: i32) -> (i32, i32) {
    %c0_i32 = arith.constant 0 : i32
    %c0_i32_0 = arith.constant 0 : i32
    %c0_i32_1 = arith.constant 0 : i32
    return %c0_i32, %c0_i32_0 : i32, i32
  }
  func.func @transform_1(%arg0: i32) -> (i32, i32, i32) {
    %c0_i32 = arith.constant 0 : i32
    %c0_i32_0 = arith.constant 0 : i32
    %c0_i32_1 = arith.constant 0 : i32
    return %arg0, %c0_i32, %c0_i32_0 : i32, i32, i32
  }
  func.func @transform_2(%arg0: i32) -> (i32, i32) {
    %c0_i32 = arith.constant 0 : i32
    %c0_i32_0 = arith.constant 0 : i32
    return %c0_i32, %arg0 : i32, i32
  }
  func.func @transform_3(%arg0: i32) -> (i32, i32) {
    %c0_i32 = arith.constant 0 : i32
    %c0_i32_0 = arith.constant 0 : i32
    return %c0_i32, %arg0 : i32, i32
  }
  func.func @transform_4(%arg0: i32) -> (i32, i32) {
    %c0_i32 = arith.constant 0 : i32
    %c0_i32_0 = arith.constant 0 : i32
    return %arg0, %c0_i32 : i32, i32
  }
  func.func @transform_5(%arg0: i32) -> (i32, i32) {
    %c0_i32 = arith.constant 0 : i32
    %c0_i32_0 = arith.constant 0 : i32
    %c0_i32_1 = arith.constant 0 : i32
    return %c0_i32, %c0_i32_0 : i32, i32
  }
  func.func @transform_6(%arg0: i32) -> (i32, i32) {
    %c0_i32 = arith.constant 0 : i32
    %c0_i32_0 = arith.constant 0 : i32
    %c0_i32_1 = arith.constant 0 : i32
    return %c0_i32, %c0_i32_0 : i32, i32
  }
  func.func @transform_7(%arg0: i32) -> (i32, i32) {
    %c0_i32 = arith.constant 0 : i32
    %c0_i32_0 = arith.constant 0 : i32
    %c0_i32_1 = arith.constant 0 : i32
    return %c0_i32, %c0_i32_0 : i32, i32
  }
  func.func @transform_8(%arg0: i32) -> (i32, i32) {
    %c0_i32 = arith.constant 0 : i32
    %c0_i32_0 = arith.constant 0 : i32
    %c0_i32_1 = arith.constant 0 : i32
    return %c0_i32, %c0_i32_0 : i32, i32
  }
  func.func @transform_9(%arg0: i32) -> (i32, i32) {
    %c0_i32 = arith.constant 0 : i32
    %c0_i32_0 = arith.constant 0 : i32
    %c0_i32_1 = arith.constant 0 : i32
    return %c0_i32, %c0_i32_0 : i32, i32
  }
  func.func @transform_10(%arg0: i32) -> (i32, i32) {
    %c0_i32 = arith.constant 0 : i32
    %c0_i32_0 = arith.constant 0 : i32
    %c0_i32_1 = arith.constant 0 : i32
    return %c0_i32, %c0_i32_0 : i32, i32
  }
  func.func @transform_11(%arg0: i32) -> (i32, i32) {
    %c0_i32 = arith.constant 0 : i32
    %c0_i32_0 = arith.constant 0 : i32
    %c0_i32_1 = arith.constant 0 : i32
    return %c0_i32, %c0_i32_0 : i32, i32
  }
  func.func @transform_12(%arg0: i32) -> (i32, i32) {
    %c0_i32 = arith.constant 0 : i32
    %c0_i32_0 = arith.constant 0 : i32
    %c0_i32_1 = arith.constant 0 : i32
    return %c0_i32, %c0_i32_0 : i32, i32
  }
  func.func @transform_13(%arg0: i32) -> (i32, i32) {
    %c0_i32 = arith.constant 0 : i32
    %c0_i32_0 = arith.constant 0 : i32
    %c0_i32_1 = arith.constant 0 : i32
    return %c0_i32, %c0_i32_0 : i32, i32
  }
  func.func @transform_14(%arg0: i32) -> (i32, i32) {
    %c0_i32 = arith.constant 0 : i32
    %c0_i32_0 = arith.constant 0 : i32
    %c0_i32_1 = arith.constant 0 : i32
    return %c0_i32, %c0_i32_0 : i32, i32
  }
  func.func @transform_15(%arg0: i32) -> (i32, i32) {
    %c0_i32 = arith.constant 0 : i32
    %c0_i32_0 = arith.constant 0 : i32
    %c0_i32_1 = arith.constant 0 : i32
    return %c0_i32, %c0_i32_0 : i32, i32
  }
  func.func @transform_16(%arg0: i32) -> (i32, i32) {
    %c0_i32 = arith.constant 0 : i32
    %c0_i32_0 = arith.constant 0 : i32
    %c0_i32_1 = arith.constant 0 : i32
    return %c0_i32, %c0_i32_0 : i32, i32
  }
  func.func @transform_17(%arg0: i32) -> (i32, i32) {
    %c0_i32 = arith.constant 0 : i32
    %c0_i32_0 = arith.constant 0 : i32
    %c0_i32_1 = arith.constant 0 : i32
    return %c0_i32, %c0_i32_0 : i32, i32
  }
  func.func @transform_18(%arg0: i32) -> (i32, i32) {
    %c0_i32 = arith.constant 0 : i32
    %c0_i32_0 = arith.constant 0 : i32
    %c0_i32_1 = arith.constant 0 : i32
    return %c0_i32, %c0_i32_0 : i32, i32
  }
}

</mosaic_0001>

<bundles_post_ra>
// kernel: tpu_custom_call.1
= control target key start
LH: loop header
LB: loop body
LE: loop exit
PB: predicated region body
PF: predicated region fallthrough
CT: control target
= control target key end

     0   :  { %s5741_s0 = inlined_call_operand.hbm [shape: bf16[8,2048], index: 0, kind: input, shape index: {}]   ;;  %s5742_s1 = inlined_call_operand.hbm [shape: s8[2,2048,512], index: 1, kind: input, shape index: {}]   ;;  %s5743_s2 = inlined_call_operand.hbm [shape: f32[1,1024], index: 2, kind: input, shape index: {}]   ;;  %s5744_s3 = inlined_call_operand.hbm [shape: f32[1,1024], index: 3, kind: input, shape index: {}]   ;;  %s5745_s4 = inlined_call_operand.hbm [shape: s8[1024,512], index: 4, kind: input, shape index: {}]   ;;  %s5746_s5 = inlined_call_operand.hbm [shape: f32[1,512], index: 5, kind: input, shape index: {}]   ;;  %s5747_s6 = inlined_call_operand.hbm [shape: f32[1,512], index: 6, kind: input, shape index: {}]   ;;  %s5748_s7 = inlined_call_operand.hbm [shape: s8[512,256], index: 7, kind: input, shape index: {}]   ;;  %s5749_s8 = inlined_call_operand.hbm [shape: f32[1,256], index: 8, kind: input, shape index: {}]   ;;  %s5750_s9 = inlined_call_operand.hbm [shape: f32[1,256], index: 9, kind: input, shape index: {}]   ;;  %s5751_s10 = inlined_call_operand.hbm [shape: bf16[256,128], index: 10, kind: input, shape index: {}]   ;;  %s5752_s11 = inlined_call_operand.hbm [shape: f32[1,128], index: 11, kind: input, shape index: {}]   ;;  %s5753_s12 = inlined_call_operand.vmem [shape: f32[128,32], index: 12, kind: input, shape index: {}]   ;;  %s5754_s13 = inlined_call_operand.hbm [shape: f32[1,32], index: 13, kind: input, shape index: {}]   ;;  %s5755_s14 = inlined_call_operand.vmem [shape: f32[32,16], index: 14, kind: input, shape index: {}]   ;;  %s5756_s15 = inlined_call_operand.hbm [shape: f32[1,16], index: 15, kind: input, shape index: {}]   ;;  %s5757_s16 = inlined_call_operand.vmem [shape: f32[16,2], index: 16, kind: input, shape index: {}]   ;;  %s5758_s17 = inlined_call_operand.hbm [shape: f32[1,2], index: 17, kind: input, shape index: {}]   ;;  %s5759_s18 = inlined_call_operand.vmem [shape: f32[8,2], index: 18, kind: output, shape index: {}]  }
   0x1   :  { %5787 = sst [smem:[#allocation39_spill]] %s5741_s0 }
   0x2   :  { %5788 = sst [smem:[#allocation40_spill]] %s5742_s1 }
   0x3   :  { %5789 = sst [smem:[#allocation41_spill]] %s5743_s2 }
   0x4   :  { %5790 = sst [smem:[#allocation42_spill]] %s5746_s5 }
   0x5   :  { %5791 = sst [smem:[#allocation43_spill]] %s5748_s7 }
   0x6   :  { %5792 = sst [smem:[#allocation44_spill]] %s5750_s9 }
   0x7   :  { %5793 = sst [smem:[#allocation45_spill]] %s5752_s11 }
   0x8   :  { %5794 = sst [smem:[#allocation46_spill]] %s5753_s12 }
   0x9   :  { %5795 = sst [smem:[#allocation47_spill]] %s5755_s14 }
   0xa   :  { %5796 = sst [smem:[#allocation48_spill]] %s5756_s15 }
   0xb   :  { %5797 = sst [smem:[#allocation49_spill]] %s5757_s16 }
   0xc   :  { %5798 = sst [smem:[#allocation50_spill]] %s5759_s18 }
   0xd   :  { %23 = vsyncpa [#allocation4], 0 }
   0xe   :  { %24 = vsyncpa [#allocation6], 0 }
   0xf   :  { %26 = vsyncpa [#allocation6 + $0x1], 0 }
  0x10   :  { %27 = vsyncpa [#allocation9], 0 }
  0x11   :  { %29 = vsyncpa [#allocation9 + $0x1], 0 }
  0x12   :  { %30 = vsyncpa [#allocation12], 0 }
  0x13   :  { %31 = vsyncpa [#allocation15], 0 }
  0x14   :  { %32 = vsyncpa [#allocation18], 0 }
  0x15   :  { %33 = vsyncpa [#allocation21], 0 }
  0x16   :  { %34 = vsyncpa [#allocation24], 0  ;;  %s4745_s27 = smov 0   ;;  %s4747_s28 = smov 0  }
  0x17   :  { %s4749_s29 = smov 0   ;;  %s4751_s30 = smov 0  }
  0x18 LB: > { %5799 = sst [smem:[#allocation34_spill]] %s4616_s28  ;;  %s4626_s0 = smov [#allocation11]   ;;  %s4624_s30 = sphi %s4751_s30, %s5848_s30   ;;  %s4620_s29 = sphi %s4749_s29, %s5851_s29   ;;  %s4616_s28 = sphi %s4747_s28, %s5850_s28   ;;  %s4612_s27 = sphi %s4745_s27, %s5849_s27  }
  0x19   : > { %5800 = sst [smem:[#allocation35_spill]] %s4620_s29  ;;  %s488_s19 = sshll.u32 %s4626_s0, 4  ;;  %s489_s19 = int_to_ptr.vmem [resolvable:$true] %s488_s19 }
  0x1a   : > { %s4766_s1 = sadd.s32 4294967295, %s4624_s30   ;;  %p3743_p0 = scmp.ge.s32.totalorder %s4624_s30, 1 }
  0x1b   : > { %p5762_p1 = scmp.eq.s32.totalorder %s4766_s1, 0  ;;  %p464_p2 = scmp.lt.s32.totalorder %s4624_s30, 3 }
  0x1c   : > { %s4627_s21 = smov [#allocation14]   ;;  %s4628_s23 = smov [#allocation17]  }
  0x1d   : > { %p4772_p4 = pnand %p3743_p0, %p464_p2  ;;  %s509_s22 = sshll.u32 %s4627_s21, 4  ;;  %s4778_s22 = int_to_ptr.vmem [resolvable:$true] %s509_s22 }
  0x1e   : > { %s534_s24 = sshll.u32 %s4628_s23, 4  ;;  %s4175_s26 = scalar_lea.vmem %s489_s19, 64  ;;  %s4786_s24 = int_to_ptr.vmem [resolvable:$true] %s534_s24 }
  0x1f   : > { %s5801_s20 = scalar_select %p4772_p4, 1, 0 }
  0x20   : > { %p3984_p5 = pneg %p4772_p4  ;;  %p4176_p8 = scmp.ne.s32.totalorder %s489_s19, %s4175_s26 }
  0x21   : > { %p4183_p11 = scmp.lt.s32.totalorder %s489_s19, %s489_s19  ;;  %p4184_p12 = scmp.lt.s32.totalorder %s4175_s26, %s4175_s26 }
  0x22   : > { %p4782_p6 = pnand %p3984_p5, %p5762_p1 }
  0x23   : > { %p4185_p13 = por %p4184_p12, %p4183_p11 }
  0x24   : > { %s5802_s2 = scalar_select %p4782_p6, 1, 0 }
  0x25   : > { %p4790_p7 = pneg %p4782_p6 }
  0x27   : > { %s5803_s25 = scalar_select %p4790_p7, 1, 0 }
  0x28   : > { %p4178_p9 = pnand %p4176_p8, %p4790_p7 }
  0x2a   : > { %p4179_p10 = pneg %p4178_p9 }
  0x2c   : > { %p4186_p0 = pnand %p4185_p13, %p4179_p10 }
  0x2e   : > { %4189 = shalt.err (!%p4186_p0)
}
  0x2f   : > { %s5804_s5 = sld [smem:[#allocation42_spill]]  ;;  %s4201_s23 = scalar_lea.vmem %s4778_s22, 4096 }
  0x30   : > { %p4202_p2 = scmp.ne.s32.totalorder %s4778_s22, %s4201_s23  ;;  %p4209_p9 = scmp.lt.s32.totalorder %s4778_s22, %s4778_s22 }
  0x31   : > { %p4210_p11 = scmp.lt.s32.totalorder %s4201_s23, %s4201_s23 }
  0x32   : > { %p4204_p5 = pnand %p4202_p2, %p4790_p7 }
  0x33   : > { %p4211_p10 = por %p4210_p11, %p4209_p9 }
  0x34   : > { %p4205_p8 = pneg %p4204_p5 }
  0x35   : > { %3990 = dma.hbm_to_vmem [thread:$0]  (!%p4782_p6), %s5804_s5, 64, %s489_s19, [#allocation12]  }
  0x36   : > { %p4212_p12 = pnand %p4211_p10, %p4205_p8 }
  0x38   : > { %4215 = shalt.err (!%p4212_p12)
}
  0x39   : > { %s4629_s26 = smov 256   ;;  %s4630_s0 = smov 16  }
  0x3a   : > { %s5805_s7 = sld [smem:[#allocation43_spill]]  ;;  %s4227_s5 = scalar_lea.vmem %s4786_s24, 32 }
  0x3b   : > { %p4228_p13 = scmp.ne.s32.totalorder %s4786_s24, %s4227_s5  ;;  %p4235_p5 = scmp.lt.s32.totalorder %s4786_s24, %s4786_s24 }
  0x3c   : > { %p4236_p8 = scmp.lt.s32.totalorder %s4227_s5, %s4227_s5 }
  0x3d   : > { %p4230_p0 = pnand %p4228_p13, %p4790_p7 }
  0x3e   : > { %p4237_p9 = por %p4236_p8, %p4235_p5 }
  0x3f   : > { %p4231_p2 = pneg %p4230_p0 }
  0x40   : > { %3996 = dma.hbm_to_vmem [thread:$0]  (!%p4782_p6), %s5805_s7, 4096, %s4778_s22, [#allocation15], %s4629_s26, %s4629_s26, %s4630_s0  }
  0x41   : > { %p4238_p11 = pnand %p4237_p9, %p4231_p2 }
  0x43   : > { %4241 = shalt.err (!%p4238_p11)
}
  0x44   : > { %s5806_s9 = sld [smem:[#allocation44_spill]]  ;;  %s4631_s22 = smov [#allocation20]  }
  0x45   : > { %s558_s26 = sshll.u32 %s4631_s22, 4  ;;  %s4632_s0 = smov [#allocation23]   ;;  %s559_s26 = int_to_ptr.vmem [resolvable:$true] %s558_s26 }
  0x46   : > { %s586_s19 = sshll.u32 %s4632_s0, 4  ;;  %s4253_s21 = scalar_lea.vmem %s559_s26, 16  ;;  %s587_s19 = int_to_ptr.vmem [resolvable:$true] %s586_s19 }
  0x47   : > { %p4254_p10 = scmp.ne.s32.totalorder %s559_s26, %s4253_s21  ;;  %s4260_s5 = scalar_lea.vmem %s559_s26, 32 }
  0x48   : > { %p4261_p0 = scmp.lt.s32.totalorder %s559_s26, %s559_s26  ;;  %p4262_p2 = scmp.lt.s32.totalorder %s4260_s5, %s4253_s21 }
  0x49   : > { %p4256_p12 = pnand %p4254_p10, %p4790_p7 }
  0x4a   : > { %4002 = dma.hbm_to_vmem [thread:$0]  (!%p4782_p6), %s5806_s9, 32, %s4786_s24, [#allocation18]  }
  0x4b   : > { %p4257_p13 = pneg %p4256_p12  ;;  %p4263_p5 = por %p4262_p2, %p4261_p0 }
  0x4d   : > { %p4264_p8 = pnand %p4263_p5, %p4257_p13 }
  0x4f   : > { %4267 = shalt.err (!%p4264_p8)
}
  0x50   : > { %s5807_s11 = sld [smem:[#allocation45_spill]]  ;;  %s4279_s23 = scalar_lea.vmem %s587_s19, 16 }
  0x51   : > { %p4280_p9 = scmp.ne.s32.totalorder %s587_s19, %s4279_s23  ;;  %s4286_s22 = scalar_lea.vmem %s587_s19, 32 }
  0x52   : > { %p4287_p12 = scmp.lt.s32.totalorder %s587_s19, %s587_s19  ;;  %p4288_p3 = scmp.lt.s32.totalorder %s4286_s22, %s4279_s23 }
  0x53   : > { %p4282_p11 = pnand %p4280_p9, %p4790_p7 }
  0x54   : > { %p4289_p1 = por %p4288_p3, %p4287_p12 }
  0x55   : > { %p4283_p10 = pneg %p4282_p11 }
  0x56   : > { %4008 = dma.hbm_to_vmem [thread:$0]  (!%p4782_p6), %s5807_s11, 16, %s559_s26, [#allocation21]  }
  0x57   : > { %p4290_p0 = pnand %p4289_p1, %p4283_p10 }
  0x59   : > { %4293 = shalt.err (!%p4290_p0)
}
  0x5a   : > { %s5808_s15 = sld [smem:[#allocation48_spill]]  ;;  %s4840_s26 = sadd.s32 1, %s4624_s30  }
  0x5b   : > { %5809 = sst [smem:[#allocation36_spill]] %s4840_s26  ;;  %s65_s5 = ssub.s32 %s4624_s30, %s4840_s26 }
  0x5c   : > { %s68_s18 = sadd.s32 1, %s4620_s29  ;;  %p66_p1 = scmp.eq.s32.totalorder %s65_s5, 0 }
  0x5d   : > { %p75_p3 = scmp.ne.s32.totalorder %s4620_s29, %s4616_s28  ;;  %p76_p13 = scmp.eq.s32.totalorder %s4624_s30, 0 }
  0x5e   : > { %p81_p2 = scmp.ne.s32.totalorder %s4616_s28, %s4612_s27  ;;  %p5811_p8 = scmp.eq.s32.totalorder %s4766_s1, 0 }
  0x5f   : > { %s4851_s24 = scalar_select %p66_p1, %s4620_s29, %s68_s18  }
  0x60   : > { %4014 = dma.hbm_to_vmem [thread:$0]  (!%p4782_p6), %s5808_s15, 16, %s587_s19, [#allocation24]  }
  0x61   : > { %5810 = sst [smem:[#allocation37_spill]] %s4851_s24  ;;  %p77_p5 = por %p76_p13, %p75_p3 }
  0x62   : > { %p4855_p9 = por %p5811_p8, %p81_p2  ;;  %p4042_p11 = scmp.lt.s32.totalorder %s4624_s30, 2 }
  0x63   : > { %s5766_s19 = sand.u32 1, %s4624_s30   ;;  %s4862_s22 = sand.u32 1, %s4620_s29  }
  0x64   : > { %s5812_s23 = scalar_select %p4855_p9, 1, 0 }
  0x65   : > { %s3756_s0 = sshll.u32 %s4862_s22, 11  ;;  %s3827_s21 = sshll.u32 %s4624_s30, 15 }
  0x66   : > { %5813 = sst [smem:[#allocation38_spill]] %s5812_s23  ;;  %s615_s27 = scalar_lea.vmem [#allocation5], %s3756_s0 }
  0x67   : > { %s5814_s9 = sld [smem:[#allocation40_spill]]  ;;  %s622_s18 = sshll.u32 %s615_s27, 4  ;;  %s4875_s18 = int_to_ptr.vmem [resolvable:$true] %s622_s18 }
  0x68   : > { %p4871_p10 = pnand %p4042_p11, %p77_p5  ;;  %s4879_s24 = scalar_lea.sflag [#allocation6], %s5766_s19 }
  0x6a   : > { %s5815_s15 = scalar_select %p4871_p10, 1, 0 }
  0x6b   : > { %p4885_p0 = pneg %p4871_p10 }
  0x6d   : > { %s4869_s11 = scalar_lea.hbm %s5814_s9, %s3827_s21  ;;  %s4299_s5 = scalar_lea.hbm %s5814_s9, 65536 }
  0x6e   : > { %s4294_s29 = scalar_lea.hbm %s4869_s11, 32768  ;;  %p4300_p13 = scmp.lt.s32.totalorder %s4869_s11, %s5814_s9 }
  0x6f   : > { %p4295_p12 = scmp.ne.s32.totalorder %s4869_s11, %s4294_s29  ;;  %p4301_p2 = scmp.lt.s32.totalorder %s4299_s5, %s4294_s29 }
  0x70   : > { %s5816_s7 = scalar_select %p4885_p0, 1, 0 }
  0x71   : > { %p4297_p1 = pnand %p4885_p0, %p4295_p12  ;;  %p4302_p5 = por %p4301_p2, %p4300_p13 }
  0x73   : > { %p4298_p3 = pneg %p4297_p1 }
  0x75   : > { %p4303_p8 = pnand %p4302_p5, %p4298_p3 }
  0x77   : > { %4306 = shalt.err (!%p4303_p8)
}
  0x78   : > { %s4307_s19 = scalar_lea.vmem %s4875_s18, 32768  ;;  %s4633_s16 = smov [#allocation5]  }
  0x79   : > { %p4308_p11 = scmp.ne.s32.totalorder %s4875_s18, %s4307_s19  ;;  %s4312_s0 = sshll.u32 %s4633_s16, 4  ;;  %s4313_s0 = int_to_ptr.vmem [resolvable:$false] %s4312_s0 }
  0x7a   : > { %s4314_s21 = scalar_lea.vmem %s4313_s0, 65536  ;;  %p4315_p9 = scmp.lt.s32.totalorder %s4875_s18, %s4313_s0 }
  0x7b   : > { %p4310_p12 = pnand %p4308_p11, %p4885_p0  ;;  %p4316_p4 = scmp.lt.s32.totalorder %s4314_s21, %s4307_s19 }
  0x7d   : > { %p4311_p1 = pneg %p4310_p12  ;;  %p4317_p6 = por %p4316_p4, %p4315_p9 }
  0x7f   : > { %p4318_p7 = pnand %p4317_p6, %p4311_p1 }
  0x81   : > { %4321 = shalt.err (!%p4318_p7)
}
  0x82   : > { %s5780_s29 = smov 512   ;;  %s5781_s26 = smov 32  }
  0x83   : > { %4021 = dma.hbm_to_vmem [thread:$0]  (!%p4871_p10), %s4869_s11, 32768, %s4875_s18, %s4879_s24, %s5780_s29, %s5780_s29, %s5781_s26  }
  0x84   : > { %s5782_s16 = sshll.u32 %s4862_s22, 2  ;;  %s3828_s19 = sshll.u32 %s4624_s30, 6 }
  0x85   : > { %s5817_s0 = sld [smem:[#allocation41_spill]]  ;;  %s4921_s12 = scalar_lea.hbm %s5744_s3, %s3828_s19 }
  0x86   : > { %s655_s23 = scalar_lea.vmem [#allocation8], %s5782_s16  ;;  %s5818_s11 = sand.u32 1, %s4624_s30  }
  0x87   : > { %s663_s28 = sshll.u32 %s655_s23, 4  ;;  %s4927_s18 = scalar_lea.sflag [#allocation9], %s5818_s11  ;;  %s664_s28 = int_to_ptr.vmem [resolvable:$true] %s663_s28 }
  0x88   : > { %s4322_s29 = scalar_lea.hbm %s4921_s12, 64  ;;  %s4327_s9 = scalar_lea.hbm %s5744_s3, 128 }
  0x89   : > { %p4323_p4 = scmp.ne.s32.totalorder %s4921_s12, %s4322_s29  ;;  %p4328_p9 = scmp.lt.s32.totalorder %s4921_s12, %s5744_s3 }
  0x8a   : > { %p4329_p3 = scmp.lt.s32.totalorder %s4327_s9, %s4322_s29 }
  0x8b   : > { %s4916_s21 = scalar_lea.hbm %s5817_s0, %s3828_s19  ;;  %p4325_p6 = pnand %p4323_p4, %p4885_p0 }
  0x8c   : > { %p4330_p13 = por %p4329_p3, %p4328_p9 }
  0x8d   : > { %p4326_p7 = pneg %p4325_p6 }
  0x8f   : > { %p4331_p2 = pnand %p4330_p13, %p4326_p7 }
  0x91   : > { %4334 = shalt.err (!%p4331_p2)
}
  0x92   : > { %s4335_s23 = scalar_lea.vmem %s664_s28, 64  ;;  %s4636_s11 = smov [#allocation8]  }
  0x93   : > { %p4336_p5 = scmp.ne.s32.totalorder %s664_s28, %s4335_s23  ;;  %s4340_s26 = sshll.u32 %s4636_s11, 4  ;;  %s4341_s26 = int_to_ptr.vmem [resolvable:$false] %s4340_s26 }
  0x94   : > { %s4342_s16 = scalar_lea.vmem %s4341_s26, 128  ;;  %p4343_p12 = scmp.lt.s32.totalorder %s664_s28, %s4341_s26 }
  0x95   : > { %p4338_p8 = pnand %p4336_p5, %p4885_p0  ;;  %p4344_p1 = scmp.lt.s32.totalorder %s4342_s16, %s4335_s23 }
  0x97   : > { %p4339_p11 = pneg %p4338_p8  ;;  %p4345_p4 = por %p4344_p1, %p4343_p12 }
  0x99   : > { %p4346_p6 = pnand %p4345_p4, %p4339_p11 }
  0x9b   : > { %4349 = shalt.err (!%p4346_p6)
}
  0x9c   : > { %4027 = dma.hbm_to_vmem [thread:$0]  (!%p4871_p10), %s4921_s12, 64, %s664_s28, %s4927_s18  }
  0x9d   : > { %s4637_s29 = smov [#allocation3]   ;;  %s4638_s27 = smov [#allocation13]  }
  0x9e   : > { %s477_s5 = sshll.u32 %s4637_s29, 4  ;;  %s499_s9 = sshll.u32 %s4638_s27, 4  ;;  %s478_s5 = int_to_ptr.vmem [resolvable:$true] %s477_s5  ;;  %s500_s9 = int_to_ptr.vmem [resolvable:$true] %s499_s9 }
  0x9f   : > { %s4361_s14 = scalar_lea.vmem %s478_s5, 1024  ;;  %p5819_p9 = scmp.ne.s32.totalorder %s5803_s25, 0 }
  0xa0   : > { %p4362_p7 = scmp.ne.s32.totalorder %s478_s5, %s4361_s14  ;;  %p4369_p2 = scmp.lt.s32.totalorder %s478_s5, %s478_s5 }
  0xa1   : > { %p4370_p5 = scmp.lt.s32.totalorder %s4361_s14, %s4361_s14 }
  0xa2   : > { %p4364_p3 = pnand %p4362_p7, %p5819_p9 }
  0xa3   : > { %p4371_p8 = por %p4370_p5, %p4369_p2 }
  0xa4   : > { %p4365_p13 = pneg %p4364_p3 }
  0xa6   : > { %p4372_p11 = pnand %p4371_p8, %p4365_p13 }
  0xa8   : > { %4375 = shalt.err (!%p4372_p11)
}
  0xa9   : > { %p5820_p12 = scmp.ne.s32.totalorder %s5802_s2, 0  ;;  %s5821_s12 = sld [smem:[#allocation39_spill]] }
  0xaa   : > { %s4387_s28 = scalar_lea.vmem %s500_s9, 64  ;;  %p4395_p7 = scmp.lt.s32.totalorder %s500_s9, %s500_s9 }
  0xab   : > { %p4388_p1 = scmp.ne.s32.totalorder %s500_s9, %s4387_s28  ;;  %p4396_p3 = scmp.lt.s32.totalorder %s4387_s28, %s4387_s28 }
  0xad   : > { %p4390_p4 = pnand %p4388_p1, %p5819_p9  ;;  %p4397_p10 = por %p4396_p3, %p4395_p7 }
  0xaf   : > { %3987 = dma.hbm_to_vmem [thread:$0]  (!%p5820_p12), %s5821_s12, 1024, %s478_s5, [#allocation4]  }
  0xb0   : > { %p4391_p6 = pneg %p4390_p4 }
  0xb2   : > { %p4398_p0 = pnand %p4397_p10, %p4391_p6 }
  0xb4   : > { %4401 = shalt.err (!%p4398_p0)
}
  0xb5   : > { %3993 = dma.hbm_to_vmem [thread:$0]  (!%p5820_p12), %s5747_s6, 64, %s500_s9, [#allocation12]  }
  0xb6   : > { %s4639_s11 = smov [#allocation16]   ;;  %s4640_s5 = smov [#allocation19]  }
  0xb7   : > { %s523_s29 = sshll.u32 %s4639_s11, 4  ;;  %s544_s27 = sshll.u32 %s4640_s5, 4  ;;  %s524_s29 = int_to_ptr.vmem [resolvable:$true] %s523_s29  ;;  %s545_s27 = int_to_ptr.vmem [resolvable:$true] %s544_s27 }
  0xb8   : > { %s4413_s14 = scalar_lea.vmem %s524_s29, 32  ;;  %p4421_p8 = scmp.lt.s32.totalorder %s524_s29, %s524_s29 }
  0xb9   : > { %p4414_p13 = scmp.ne.s32.totalorder %s524_s29, %s4413_s14  ;;  %p4422_p10 = scmp.lt.s32.totalorder %s4413_s14, %s4413_s14 }
  0xbb   : > { %p4416_p2 = pnand %p4414_p13, %p5819_p9  ;;  %p4423_p0 = por %p4422_p10, %p4421_p8 }
  0xbd   : > { %p4417_p5 = pneg %p4416_p2 }
  0xbf   : > { %p4424_p11 = pnand %p4423_p0, %p4417_p5 }
  0xc1   : > { %4427 = shalt.err (!%p4424_p11)
}
  0xc2   : > { %3999 = dma.hbm_to_vmem [thread:$0]  (!%p5820_p12), %s5749_s8, 32, %s524_s29, [#allocation15]  }
  0xc3   : > { %s4439_s9 = scalar_lea.vmem %s545_s27, 2048  ;;  %p4447_p7 = scmp.lt.s32.totalorder %s545_s27, %s545_s27 }
  0xc4   : > { %p4440_p1 = scmp.ne.s32.totalorder %s545_s27, %s4439_s9  ;;  %p4448_p3 = scmp.lt.s32.totalorder %s4439_s9, %s4439_s9 }
  0xc6   : > { %p4442_p4 = pnand %p4440_p1, %p5819_p9  ;;  %p4449_p13 = por %p4448_p3, %p4447_p7 }
  0xc8   : > { %p4443_p6 = pneg %p4442_p4 }
  0xca   : > { %p4450_p2 = pnand %p4449_p13, %p4443_p6 }
  0xcc   : > { %4453 = shalt.err (!%p4450_p2)
}
  0xcd   : > { %s4641_s12 = smov 64   ;;  %s4642_s28 = smov 4  }
  0xce   : > { %4005 = dma.hbm_to_vmem [thread:$0]  (!%p5820_p12), %s5751_s10, 2048, %s545_s27, [#allocation18], %s4641_s12, %s4641_s12, %s4642_s28  }
  0xcf   : > { %s4643_s11 = smov [#allocation22]   ;;  %s4644_s5 = smov [#allocation25]  }
  0xd0   : > { %s572_s29 = sshll.u32 %s4643_s11, 4  ;;  %s600_s14 = sshll.u32 %s4644_s5, 4  ;;  %s573_s29 = int_to_ptr.vmem [resolvable:$true] %s572_s29  ;;  %s601_s14 = int_to_ptr.vmem [resolvable:$true] %s600_s14 }
  0xd1   : > { %s4465_s26 = scalar_lea.vmem %s573_s29, 16  ;;  %s4472_s16 = scalar_lea.vmem %s573_s29, 32 }
  0xd2   : > { %p4466_p5 = scmp.ne.s32.totalorder %s573_s29, %s4465_s26  ;;  %p4473_p0 = scmp.lt.s32.totalorder %s573_s29, %s573_s29 }
  0xd3   : > { %p4474_p11 = scmp.lt.s32.totalorder %s4472_s16, %s4465_s26 }
  0xd4   : > { %p4468_p8 = pnand %p4466_p5, %p5819_p9 }
  0xd5   : > { %p4475_p1 = por %p4474_p11, %p4473_p0 }
  0xd6   : > { %p4469_p10 = pneg %p4468_p8 }
  0xd8   : > { %p4476_p4 = pnand %p4475_p1, %p4469_p10 }
  0xda   : > { %4479 = shalt.err (!%p4476_p4)
}
  0xdb   : > { %4011 = dma.hbm_to_vmem [thread:$0]  (!%p5820_p12), %s5754_s13, 16, %s573_s29, [#allocation21]  }
  0xdc   : > { %s5822_s12 = sshll.u32 %s4862_s22, 2  ;;  %s4491_s23 = scalar_lea.vmem %s601_s14, 16 }
  0xdd   : > { %s636_s28 = scalar_lea.vmem [#allocation7], %s5822_s12  ;;  %p4492_p6 = scmp.ne.s32.totalorder %s601_s14, %s4491_s23 }
  0xde   : > { %s644_s19 = sshll.u32 %s636_s28, 4  ;;  %s4498_s11 = scalar_lea.vmem %s601_s14, 32  ;;  %s645_s19 = int_to_ptr.vmem [resolvable:$true] %s644_s19 }
  0xdf   : > { %p4494_p7 = pnand %p4492_p6, %p5819_p9  ;;  %p4499_p13 = scmp.lt.s32.totalorder %s601_s14, %s601_s14 }
  0xe0   : > { %p4500_p2 = scmp.lt.s32.totalorder %s4498_s11, %s4491_s23 }
  0xe1   : > { %p4495_p3 = pneg %p4494_p7 }
  0xe2   : > { %p4501_p5 = por %p4500_p2, %p4499_p13 }
  0xe4   : > { %p4502_p8 = pnand %p4501_p5, %p4495_p3 }
  0xe6   : > { %4505 = shalt.err (!%p4502_p8)
}
  0xe7   : > { %4017 = dma.hbm_to_vmem [thread:$0]  (!%p5820_p12), %s5758_s17, 16, %s601_s14, [#allocation24]  }
  0xe8   : > { %s3765_s25 = sshll.u32 %s4862_s22, 9  ;;  %s4506_s29 = scalar_lea.hbm %s4916_s21, 64 }
  0xe9   : > { %p4507_p9 = scmp.ne.s32.totalorder %s4916_s21, %s4506_s29  ;;  %p5823_p10 = scmp.ne.s32.totalorder %s5816_s7, 0 }
  0xea   : > { %s4511_s2 = scalar_lea.hbm %s5817_s0, 128  ;;  %p4512_p1 = scmp.lt.s32.totalorder %s4916_s21, %s5817_s0 }
  0xeb   : > { %p4509_p0 = pnand %p4507_p9, %p5823_p10  ;;  %p4513_p4 = scmp.lt.s32.totalorder %s4511_s2, %s4506_s29 }
  0xed   : > { %p4510_p11 = pneg %p4509_p0  ;;  %p4514_p6 = por %p4513_p4, %p4512_p1 }
  0xef   : > { %p4515_p7 = pnand %p4514_p6, %p4510_p11 }
  0xf1   : > { %4518 = shalt.err (!%p4515_p7)
}
  0xf2   : > { %s4519_s14 = scalar_lea.vmem %s645_s19, 64  ;;  %s4645_s22 = smov [#allocation7]  }
  0xf3   : > { %p4520_p12 = scmp.ne.s32.totalorder %s645_s19, %s4519_s14  ;;  %s4524_s28 = sshll.u32 %s4645_s22, 4  ;;  %s4525_s28 = int_to_ptr.vmem [resolvable:$false] %s4524_s28 }
  0xf4   : > { %s4526_s23 = scalar_lea.vmem %s4525_s28, 128  ;;  %p4527_p2 = scmp.lt.s32.totalorder %s645_s19, %s4525_s28 }
  0xf5   : > { %p4522_p3 = pnand %p4520_p12, %p5823_p10  ;;  %p4528_p5 = scmp.lt.s32.totalorder %s4526_s23, %s4519_s14 }
  0xf7   : > { %p4523_p13 = pneg %p4522_p3  ;;  %p4529_p8 = por %p4528_p5, %p4527_p2 }
  0xf9   : > { %p4530_p9 = pnand %p4529_p8, %p4523_p13 }
  0xfb   : > { %4533 = shalt.err (!%p4530_p9)
}
  0xfc   : > { %p5824_p0 = scmp.ne.s32.totalorder %s5815_s15, 0  ;;  %s3831_s11 = sshll.u32 %s4624_s30, 13 }
  0xfd   : > { %s5012_s29 = scalar_lea.hbm %s5745_s4, %s3831_s11  ;;  %s674_s16 = scalar_lea.vmem [#allocation10], %s3765_s25 }
  0xfe   : > { %4024 = dma.hbm_to_vmem [thread:$0]  (!%p5824_p0), %s4916_s21, 64, %s645_s19, %s4879_s24  }
  0xff   : > { %s682_s9 = sshll.u32 %s674_s16, 4  ;;  %s4534_s2 = scalar_lea.hbm %s5012_s29, 8192  ;;  %s683_s9 = int_to_ptr.vmem [resolvable:$true] %s682_s9 }
 0x100   : > { %p4535_p11 = scmp.ne.s32.totalorder %s5012_s29, %s4534_s2  ;;  %s4539_s30 = scalar_lea.hbm %s5745_s4, 16384 }
 0x101   : > { %p4540_p6 = scmp.lt.s32.totalorder %s5012_s29, %s5745_s4  ;;  %p4541_p7 = scmp.lt.s32.totalorder %s4539_s30, %s4534_s2 }
 0x102   : > { %p4537_p1 = pnand %p4535_p11, %p5823_p10 }
 0x103   : > { %p4542_p12 = por %p4541_p7, %p4540_p6 }
 0x104   : > { %p4538_p4 = pneg %p4537_p1 }
 0x106   : > { %p4543_p3 = pnand %p4542_p12, %p4538_p4 }
 0x108   : > { %4546 = shalt.err (!%p4543_p3)
}
 0x109   : > { %s4547_s19 = scalar_lea.vmem %s683_s9, 8192  ;;  %s4646_s25 = smov [#allocation10]  }
 0x10a   : > { %p4548_p13 = scmp.ne.s32.totalorder %s683_s9, %s4547_s19  ;;  %s4552_s14 = sshll.u32 %s4646_s25, 4  ;;  %s4553_s14 = int_to_ptr.vmem [resolvable:$false] %s4552_s14 }
 0x10b   : > { %s4554_s22 = scalar_lea.vmem %s4553_s14, 16384  ;;  %p4555_p8 = scmp.lt.s32.totalorder %s683_s9, %s4553_s14 }
 0x10c   : > { %p4550_p2 = pnand %p4548_p13, %p5823_p10  ;;  %p4556_p9 = scmp.lt.s32.totalorder %s4554_s22, %s4547_s19 }
 0x10e   : > { %p4551_p5 = pneg %p4550_p2  ;;  %p4557_p11 = por %p4556_p9, %p4555_p8 }
 0x110   : > { %p4558_p1 = pnand %p4557_p11, %p4551_p5 }
 0x112   : > { %4561 = shalt.err (!%p4558_p1)
}
 0x113   : > { %s5825_s28 = smov 32   ;;  %s5826_s23 = smov 512  }
 0x114   : > { %4030 = dma.hbm_to_vmem [thread:$0]  (!%p5824_p0), %s5012_s29, 8192, %s683_s9, %s4927_s18, %s5826_s23, %s5826_s23, %s5825_s28  }
 0x115   : > { %p5827_p10 = scmp.ne.s32.totalorder %s5801_s20, 0 }
 0x116   : > { %p5828_p4 = scmp.eq.s32.totalorder (!%p5827_p10), %s4766_s1, 0 }
 0x117   : > { %694 = sbr.rel (%p5827_p10) target bundleno = 2465 (0x9a1), region = 92 }
 0x11c   : > { %4579 = dma.done.wait (%p5828_p4), [#allocation4], 1024   ;;  %p5829_p6 = pmov %p5828_p4 }
 0x11d   : > { %s5830_s7 = sld [smem:[#allocation34_spill]]  ;;  %s700_s5 = sand.u32 1, %s4766_s1  }
 0x11e   : > { %4581 = vsyncadd (%p5829_p6), [#allocation4], 4294966272  ;;  %s5831_s11 = sld [smem:[#allocation38_spill]]  ;;  %s701_s16 = scalar_lea.sflag [#allocation6], %s700_s5 }
 0x123   : > { %s702_s15 = sand.u32 1, %s5830_s7  }
 0x124   : > { %s3771_s26 = sshll.u32 %s702_s15, 11  ;;  %p5832_p7 = scmp.ne.s32.totalorder %s5831_s11, 0 }
 0x125   : > { %s5042_s2 = scalar_lea.vmem [#allocation5], %s3771_s26 }
 0x126   : > { %4583 = dma.done.wait (%p5832_p7), %s701_s16, 32832  }
 0x127   : > { %4585 = vsyncadd (%p5832_p7), %s701_s16, 4294934464  ;;  %s3772_s20 = sshll.u32 %s702_s15, 2  ;;  %s719_s29 = scalar_lea.sflag [#allocation9], %s700_s5 }
 0x128   : > { %s5048_s18 = scalar_lea.vmem [#allocation7], %s3772_s20  ;;  %s5050_s9 = scalar_lea.vmem [#allocation8], %s3772_s20 }
 0x129   : > { %4587 = dma.done.wait (%p5832_p7), %s719_s29, 8256  }
 0x12a   : > { %4589 = vsyncadd (%p5832_p7), %s719_s29, 4294959040  ;;  %s3774_s27 = sshll.u32 %s702_s15, 9  ;;  %p5833_p0 = pmov %p5828_p4 }
 0x12b   : > { %s5056_s12 = scalar_lea.vmem [#allocation10], %s3774_s27 }
 0x12c   : > { %4591 = dma.done.wait (%p5833_p0), [#allocation12], 128   ;;  %p5834_p12 = pmov %p5833_p0 }
 0x12d   : > { %p5835_p3 = pmov %p5833_p0 }
 0x12e   : > { %4593 = vsyncadd (%p5834_p12), [#allocation12], 4294967168 }
 0x12f   : > { %4595 = dma.done.wait (%p5835_p3), [#allocation15], 4128   ;;  %p5836_p13 = pmov %p5833_p0 }
 0x130   : > { %p5837_p2 = pmov %p5833_p0 }
 0x131   : > { %4597 = vsyncadd (%p5836_p13), [#allocation15], 4294963168 }
 0x132   : > { %4599 = dma.done.wait (%p5837_p2), [#allocation18], 2080   ;;  %p5838_p5 = pmov %p5833_p0 }
 0x133   : > { %p5839_p8 = pmov %p5833_p0 }
 0x134   : > { %4601 = vsyncadd (%p5838_p5), [#allocation18], 4294965216 }
 0x135   : > { %4603 = dma.done.wait (%p5839_p8), [#allocation21], 32   ;;  %p5840_p9 = pmov %p5833_p0 }
 0x136   : > { %p5841_p11 = pmov %p5833_p0 }
 0x137   : > { %4605 = vsyncadd (%p5840_p9), [#allocation21], 4294967264 }
 0x138   : > { %4607 = dma.done.wait (%p5841_p11), [#allocation24], 32   ;;  %p5842_p1 = pmov %p5833_p0 }
 0x139   : > { %p5843_p10 = scmp.ne.s32.totalorder %s4766_s1, 0 }
 0x13a   : > { %4609 = vsyncadd (%p5842_p1), [#allocation24], 4294967264 }
 0x13b   : > { %841 = sbr.rel (%p5843_p10) target bundleno = 323 (0x143), region = 156 }
 0x140   : > { %v4647_v0 = vmov 0.0  }
 0x141   : > { %842 = vst [vmem:[#allocation2 + $0x10] sm:$0xff] %v4647_v0  ;;  %843 = vst [vmem:[#allocation2] sm:$0xff] %v4647_v0 }
 0x142   : > { %844 = vst [vmem:[#allocation2 + $0x18] sm:$0xff] %v4647_v0  ;;  %845 = vst [vmem:[#allocation2 + $0x8] sm:$0xff] %v4647_v0 }
 0x143 PF: > { %v859_v1 = vld [vmem:[%s5042_s2 + $0x68] sm:$0xff]  ;;  %v858_v3 = vld [vmem:[%s5042_s2 + $0x60] sm:$0xff]  ;;  %p3802_p4 = scmp.ne.s32.totalorder %s4766_s1, 1 }
 0x144   : > { %v891_v2 = vld [vmem:[%s5042_s2 + $0x168] sm:$0xff]  ;;  %v1127_v4 = vunpack.c.l.s8.bf16 %v859_v1  ;;  %v1131_v5 = vunpack.c.h.s8.bf16 %v859_v1  ;;  %v890_v8 = vld [vmem:[%s5042_s2 + $0x160] sm:$0xff]  ;;  %v1130_v9 = vunpack.c.h.s8.bf16 %v858_v3  ;;  %v1126_v13 = vunpack.c.l.s8.bf16 %v858_v3  ;;  %s5844_s24 = sld [smem:[#allocation46_spill]] (!%p3802_p4) }
 0x145   : > { %v1191_v6 = vunpack.c.l.s8.bf16 %v891_v2  ;;  %v1195_v7 = vunpack.c.h.s8.bf16 %v891_v2  ;;  %v1194_v10 = vunpack.c.h.s8.bf16 %v890_v8  ;;  %v855_v11 = vld [vmem:[%s5042_s2 + $0x48] sm:$0xff]  ;;  %v1190_v14 = vunpack.c.l.s8.bf16 %v890_v8  ;;  %v854_v17 = vld [vmem:[%s5042_s2 + $0x40] sm:$0xff]  ;;  %s5845_s15 = sld [smem:[#allocation47_spill]] (!%p3802_p4) }
 0x146   : > { %v887_v12 = vld [vmem:[%s5042_s2 + $0x148] sm:$0xff]  ;;  %1678 = vmatprep.subr.bf16.mxu0 %v1131_v5  ;;  %v1123_v15 = vunpack.c.h.s8.bf16 %v855_v11  ;;  %v886_v18 = vld [vmem:[%s5042_s2 + $0x140] sm:$0xff]  ;;  %v1122_v19 = vunpack.c.h.s8.bf16 %v854_v17  ;;  %v1119_v21 = vunpack.c.l.s8.bf16 %v855_v11  ;;  %v1118_v25 = vunpack.c.l.s8.bf16 %v854_v17  ;;  %s5847_s25 = sld [smem:[#allocation50_spill]] (!%p3802_p4) }
 0x147   : > { %1719 = vmatprep.subr.bf16.mxu1 %v1195_v7  ;;  %1679 = vmatpush1.bf16.msra.mxu0 %v1130_v9  ;;  %v1187_v16 = vunpack.c.h.s8.bf16 %v887_v12  ;;  %v1186_v20 = vunpack.c.h.s8.bf16 %v886_v18  ;;  %v1183_v22 = vunpack.c.l.s8.bf16 %v887_v12  ;;  %v851_v23 = vld [vmem:[%s5042_s2 + $0x28] sm:$0xff]  ;;  %v1182_v26 = vunpack.c.l.s8.bf16 %v886_v18  ;;  %v850_v29 = vld [vmem:[%s5042_s2 + $0x20] sm:$0xff] }
 0x148   : > { %1720 = vmatpush1.bf16.msra.mxu1 %v1194_v10  ;;  %1680 = vmatprep.subr.bf16.mxu0 %v1127_v4  ;;  %v883_v24 = vld [vmem:[%s5042_s2 + $0x128] sm:$0xff]  ;;  %v1115_v27 = vunpack.c.h.s8.bf16 %v851_v23  ;;  %v882_v30 = vld [vmem:[%s5042_s2 + $0x120] sm:$0xff]  ;;  %v1114_v33 = vunpack.c.h.s8.bf16 %v850_v29  ;;  %v1111_v35 = vunpack.c.l.s8.bf16 %v851_v23  ;;  %v1110_v41 = vunpack.c.l.s8.bf16 %v850_v29 }
 0x149   : > { %1721 = vmatprep.subr.bf16.mxu1 %v1191_v6  ;;  %v1179_v28 = vunpack.c.h.s8.bf16 %v883_v24  ;;  %v5092_v31 = vld [vmem:[#allocation3] sm:$0xff]  ;;  %v5094_v32 = vld [vmem:[#allocation3 + $0x8] sm:$0xff]  ;;  %v1178_v34 = vunpack.c.h.s8.bf16 %v882_v30  ;;  %v1175_v36 = vunpack.c.l.s8.bf16 %v883_v24  ;;  %v1174_v42 = vunpack.c.l.s8.bf16 %v882_v30 }
 0x14a   : > { %v5098_v37 = vcombine.high %v5092_v31, %v5092_v31  ;;  %v847_v38 = vld [vmem:[%s5042_s2 + $0x8] sm:$0xff]  ;;  %v5104_v40 = vcombine.high %v5094_v32, %v5094_v32  ;;  %v846_v45 = vld [vmem:[%s5042_s2] sm:$0xff] }
 0x14b   : > { %1681 = vmatpush1.bf16.msra.mxu0 %v1126_v13  ;;  %v879_v39 = vld [vmem:[%s5042_s2 + $0x108] sm:$0xff]  ;;  %v1107_v43 = vunpack.c.h.s8.bf16 %v847_v38  ;;  %v878_v46 = vld [vmem:[%s5042_s2 + $0x100] sm:$0xff]  ;;  %v1106_v47 = vunpack.c.h.s8.bf16 %v846_v45  ;;  %v1103_v49 = vunpack.c.l.s8.bf16 %v847_v38  ;;  %v1102_v53 = vunpack.c.l.s8.bf16 %v846_v45 }
 0x14c   : > { %1722 = vmatpush1.bf16.msra.mxu1 %v1190_v14  ;;  %1682 = vmatprep.subr.bf16.mxu0 %v1123_v15  ;;  %v1171_v44 = vunpack.c.h.s8.bf16 %v879_v39  ;;  %v1170_v48 = vunpack.c.h.s8.bf16 %v878_v46  ;;  %v1167_v50 = vunpack.c.l.s8.bf16 %v879_v39  ;;  %v875_v51 = vld [vmem:[%s5042_s2 + $0xe8] sm:$0xff]  ;;  %v1166_v54 = vunpack.c.l.s8.bf16 %v878_v46  ;;  %v874_v57 = vld [vmem:[%s5042_s2 + $0xe0] sm:$0xff] }
 0x14d   : > { %1723 = vmatprep.subr.bf16.mxu1 %v1187_v16  ;;  %1710 = vmatprep.mubr.bf16.mxu0 %v5098_v37  ;;  %v907_v52 = vld [vmem:[%s5042_s2 + $0x1e8] sm:$0xff]  ;;  %v1163_v55 = vunpack.c.h.s8.bf16 %v875_v51  ;;  %v906_v58 = vld [vmem:[%s5042_s2 + $0x1e0] sm:$0xff]  ;;  %v1162_v59 = vunpack.c.h.s8.bf16 %v874_v57  ;;  %v1159_v61 = vunpack.c.l.s8.bf16 %v875_v51  ;;  %v1158_v1 = vunpack.c.l.s8.bf16 %v874_v57 }
 0x14e   : > { %1751 = vmatprep.mubr.bf16.mxu1 %v5104_v40  ;;  %v1227_v56 = vunpack.c.h.s8.bf16 %v907_v52  ;;  %v1226_v60 = vunpack.c.h.s8.bf16 %v906_v58  ;;  %v1223_v62 = vunpack.c.l.s8.bf16 %v907_v52  ;;  %v871_v63 = vld [vmem:[%s5042_s2 + $0xc8] sm:$0xff]  ;;  %v1222_v2 = vunpack.c.l.s8.bf16 %v906_v58  ;;  %v870_v5 = vld [vmem:[%s5042_s2 + $0xc0] sm:$0xff] }
 0x14f   : > { %1683 = vmatpush1.bf16.msra.mxu0 %v1122_v19  ;;  %v903_v0 = vld [vmem:[%s5042_s2 + $0x1c8] sm:$0xff]  ;;  %v1155_v3 = vunpack.c.h.s8.bf16 %v871_v63  ;;  %v902_v6 = vld [vmem:[%s5042_s2 + $0x1c0] sm:$0xff]  ;;  %v1154_v7 = vunpack.c.h.s8.bf16 %v870_v5  ;;  %v1151_v9 = vunpack.c.l.s8.bf16 %v871_v63  ;;  %v1150_v13 = vunpack.c.l.s8.bf16 %v870_v5 }
 0x150   : > { %1724 = vmatpush1.bf16.msra.mxu1 %v1186_v20  ;;  %1684 = vmatprep.subr.bf16.mxu0 %v1119_v21  ;;  %v1219_v4 = vunpack.c.h.s8.bf16 %v903_v0  ;;  %v1218_v8 = vunpack.c.h.s8.bf16 %v902_v6  ;;  %v1215_v10 = vunpack.c.l.s8.bf16 %v903_v0  ;;  %v867_v11 = vld [vmem:[%s5042_s2 + $0xa8] sm:$0xff]  ;;  %v1214_v14 = vunpack.c.l.s8.bf16 %v902_v6  ;;  %v866_v17 = vld [vmem:[%s5042_s2 + $0xa0] sm:$0xff] }
 0x151   : > { %1725 = vmatprep.subr.bf16.mxu1 %v1183_v22  ;;  %v899_v12 = vld [vmem:[%s5042_s2 + $0x1a8] sm:$0xff]  ;;  %v1147_v15 = vunpack.c.h.s8.bf16 %v867_v11  ;;  %v898_v18 = vld [vmem:[%s5042_s2 + $0x1a0] sm:$0xff]  ;;  %v1146_v19 = vunpack.c.h.s8.bf16 %v866_v17  ;;  %v1143_v21 = vunpack.c.l.s8.bf16 %v867_v11 }
 0x152   : > { %v1211_v16 = vunpack.c.h.s8.bf16 %v899_v12  ;;  %v1210_v20 = vunpack.c.h.s8.bf16 %v898_v18  ;;  %v1207_v22 = vunpack.c.l.s8.bf16 %v899_v12  ;;  %v863_v23 = vld [vmem:[%s5042_s2 + $0x88] sm:$0xff]  ;;  %v862_v29 = vld [vmem:[%s5042_s2 + $0x80] sm:$0xff] }
 0x153   : > { %1685 = vmatpush1.bf16.msra.mxu0 %v1118_v25  ;;  %v895_v24 = vld [vmem:[%s5042_s2 + $0x188] sm:$0xff]  ;;  %v1142_v25 = vunpack.c.l.s8.bf16 %v866_v17  ;;  %v894_v30 = vld [vmem:[%s5042_s2 + $0x180] sm:$0xff] }
 0x154   : > { %1726 = vmatpush1.bf16.msra.mxu1 %v1182_v26  ;;  %1686 = vmatprep.subr.bf16.mxu0 %v1115_v27  ;;  %v1206_v26 = vunpack.c.l.s8.bf16 %v898_v18  ;;  %v1139_v27 = vunpack.c.h.s8.bf16 %v863_v23  ;;  %v923_v38 = vld [vmem:[%s5042_s2 + $0x268] sm:$0xff]  ;;  %v922_v45 = vld [vmem:[%s5042_s2 + $0x260] sm:$0xff] }
 0x155   : > { %1727 = vmatprep.subr.bf16.mxu1 %v1179_v28  ;;  %v1203_v28 = vunpack.c.h.s8.bf16 %v895_v24  ;;  %v955_v39 = vld [vmem:[%s5042_s2 + $0x368] sm:$0xff]  ;;  %v954_v46 = vld [vmem:[%s5042_s2 + $0x360] sm:$0xff]  ;;  %v1258_v51 = vunpack.c.h.s8.bf16 %v922_v45  ;;  %v1254_v57 = vunpack.c.l.s8.bf16 %v922_v45 }
 0x156   : > { %v1322_v52 = vunpack.c.h.s8.bf16 %v954_v46  ;;  %v1318_v58 = vunpack.c.l.s8.bf16 %v954_v46 }
 0x157   : > { %1687 = vmatpush1.bf16.msra.mxu0 %v1114_v33  ;;  %v1138_v33 = vunpack.c.h.s8.bf16 %v862_v29 }
 0x158   : > { %1728 = vmatpush1.bf16.msra.mxu1 %v1178_v34  ;;  %1688 = vmatprep.subr.bf16.mxu0 %v1111_v35  ;;  %v1202_v34 = vunpack.c.h.s8.bf16 %v894_v30  ;;  %v1135_v35 = vunpack.c.l.s8.bf16 %v863_v23 }
 0x159   : > { %1729 = vmatprep.subr.bf16.mxu1 %v1175_v36  ;;  %v1199_v36 = vunpack.c.l.s8.bf16 %v895_v24 }
 0x15b   : > { %1689 = vmatpush1.bf16.msra.mxu0 %v1110_v41  ;;  %v1134_v41 = vunpack.c.l.s8.bf16 %v862_v29 }
 0x15c   : > { %1730 = vmatpush1.bf16.msra.mxu1 %v1174_v42  ;;  %1690 = vmatprep.subr.bf16.mxu0 %v1107_v43  ;;  %v1198_v42 = vunpack.c.l.s8.bf16 %v894_v30  ;;  %v1259_v43 = vunpack.c.h.s8.bf16 %v923_v38 }
 0x15d   : > { %1731 = vmatprep.subr.bf16.mxu1 %v1171_v44  ;;  %v1323_v44 = vunpack.c.h.s8.bf16 %v955_v39 }
 0x15f   : > { %1691 = vmatpush1.bf16.msra.mxu0 %v1106_v47  ;;  %v5132_v47 = vcombine.low %v5092_v31, %v5092_v31  ;;  %v919_v31 = vld [vmem:[%s5042_s2 + $0x248] sm:$0xff] }
 0x160   : > { %1732 = vmatpush1.bf16.msra.mxu1 %v1170_v48  ;;  %1692 = vmatprep.subr.bf16.mxu0 %v1103_v49  ;;  %v5136_v48 = vcombine.low %v5094_v32, %v5094_v32  ;;  %v5138_v49 = vld [vmem:[#allocation3 + $0x10] sm:$0xff] }
 0x161   : > { %1733 = vmatprep.subr.bf16.mxu1 %v1167_v50  ;;  %v5140_v50 = vld [vmem:[#allocation3 + $0x18] sm:$0xff]  ;;  %v5146_v32 = vcombine.high %v5138_v49, %v5138_v49 }
 0x163   : > { %1693 = vmatpush1.bf16.msra.mxu0 %v1102_v53  ;;  %v1255_v53 = vunpack.c.l.s8.bf16 %v923_v38 }
 0x164   : > { %1734 = vmatpush1.bf16.msra.mxu1 %v1166_v54  ;;  %1694 = vmatprep.subr.bf16.mxu0 %v1163_v55  ;;  %v1319_v54 = vunpack.c.l.s8.bf16 %v955_v39  ;;  %v951_v55 = vld [vmem:[%s5042_s2 + $0x348] sm:$0xff] }
 0x165   : > { %1735 = vmatprep.subr.bf16.mxu1 %v1227_v56  ;;  %v5150_v56 = vcombine.high %v5140_v50, %v5140_v50 }
 0x167   : > { %1695 = vmatpush2.bf16.msra.mxu0 %v1162_v59  ;;  %v1251_v59 = vunpack.c.h.s8.bf16 %v919_v31 }
 0x168   : > { %1736 = vmatpush2.bf16.msra.mxu1 %v1226_v60  ;;  %1696 = vmatprep.subr.bf16.mxu0 %v1159_v61  ;;  %v1315_v60 = vunpack.c.h.s8.bf16 %v951_v55  ;;  %v918_v61 = vld [vmem:[%s5042_s2 + $0x240] sm:$0xff] }
 0x169   : > { %1737 = vmatprep.subr.bf16.mxu1 %v1223_v62  ;;  %v950_v62 = vld [vmem:[%s5042_s2 + $0x340] sm:$0xff]  ;;  %v1250_v63 = vunpack.c.h.s8.bf16 %v918_v61  ;;  %v1246_v5 = vunpack.c.l.s8.bf16 %v918_v61 }
 0x16a   : > { %v1314_v0 = vunpack.c.h.s8.bf16 %v950_v62  ;;  %v1310_v6 = vunpack.c.l.s8.bf16 %v950_v62 }
 0x16b   : > { %1697 = vmatpush2.bf16.msra.mxu0 %v1158_v1  ;;  %v1247_v1 = vunpack.c.l.s8.bf16 %v919_v31 }
 0x16c   : > { %1738 = vmatpush2.bf16.msra.mxu1 %v1222_v2  ;;  %1698 = vmatprep.subr.bf16.mxu0 %v1155_v3  ;;  %v1311_v2 = vunpack.c.l.s8.bf16 %v951_v55  ;;  %v915_v3 = vld [vmem:[%s5042_s2 + $0x228] sm:$0xff] }
 0x16d   : > { %1739 = vmatprep.subr.bf16.mxu1 %v1219_v4  ;;  %v947_v4 = vld [vmem:[%s5042_s2 + $0x328] sm:$0xff] }
 0x16f   : > { %1699 = vmatpush2.bf16.msra.mxu0 %v1154_v7  ;;  %v1243_v7 = vunpack.c.h.s8.bf16 %v915_v3 }
 0x170   : > { %1740 = vmatpush2.bf16.msra.mxu1 %v1218_v8  ;;  %1700 = vmatprep.subr.bf16.mxu0 %v1151_v9  ;;  %v1307_v8 = vunpack.c.h.s8.bf16 %v947_v4  ;;  %v914_v9 = vld [vmem:[%s5042_s2 + $0x220] sm:$0xff] }
 0x171   : > { %1741 = vmatprep.subr.bf16.mxu1 %v1215_v10  ;;  %v946_v10 = vld [vmem:[%s5042_s2 + $0x320] sm:$0xff]  ;;  %v1242_v11 = vunpack.c.h.s8.bf16 %v914_v9  ;;  %v1238_v17 = vunpack.c.l.s8.bf16 %v914_v9 }
 0x172   : > { %v1306_v12 = vunpack.c.h.s8.bf16 %v946_v10  ;;  %v1302_v18 = vunpack.c.l.s8.bf16 %v946_v10 }
 0x173   : > { %1701 = vmatpush2.bf16.msra.mxu0 %v1150_v13  ;;  %v1239_v13 = vunpack.c.l.s8.bf16 %v915_v3 }
 0x174   : > { %1742 = vmatpush2.bf16.msra.mxu1 %v1214_v14  ;;  %1702 = vmatprep.subr.bf16.mxu0 %v1147_v15  ;;  %v1303_v14 = vunpack.c.l.s8.bf16 %v947_v4  ;;  %v911_v15 = vld [vmem:[%s5042_s2 + $0x208] sm:$0xff] }
 0x175   : > { %1743 = vmatprep.subr.bf16.mxu1 %v1211_v16  ;;  %v943_v16 = vld [vmem:[%s5042_s2 + $0x308] sm:$0xff] }
 0x177   : > { %1703 = vmatpush2.bf16.msra.mxu0 %v1146_v19  ;;  %v1235_v19 = vunpack.c.h.s8.bf16 %v911_v15 }
 0x178   : > { %1744 = vmatpush2.bf16.msra.mxu1 %v1210_v20  ;;  %1704 = vmatprep.subr.bf16.mxu0 %v1143_v21  ;;  %v1299_v20 = vunpack.c.h.s8.bf16 %v943_v16  ;;  %v910_v21 = vld [vmem:[%s5042_s2 + $0x200] sm:$0xff] }
 0x179   : > { %1745 = vmatprep.subr.bf16.mxu1 %v1207_v22  ;;  %v942_v22 = vld [vmem:[%s5042_s2 + $0x300] sm:$0xff]  ;;  %v1234_v23 = vunpack.c.h.s8.bf16 %v910_v21  ;;  %v1230_v29 = vunpack.c.l.s8.bf16 %v910_v21 }
 0x17a   : > { %v1298_v24 = vunpack.c.h.s8.bf16 %v942_v22  ;;  %v1294_v30 = vunpack.c.l.s8.bf16 %v942_v22 }
 0x17b   : > { %1705 = vmatpush2.bf16.msra.mxu0 %v1142_v25  ;;  %v1231_v25 = vunpack.c.l.s8.bf16 %v911_v15 }
 0x17c   : > { %1746 = vmatpush2.bf16.msra.mxu1 %v1206_v26  ;;  %1706 = vmatprep.subr.bf16.mxu0 %v1139_v27  ;;  %v1295_v26 = vunpack.c.l.s8.bf16 %v943_v16  ;;  %v939_v27 = vld [vmem:[%s5042_s2 + $0x2e8] sm:$0xff] }
 0x17d   : > { %1747 = vmatprep.subr.bf16.mxu1 %v1203_v28  ;;  %v971_v28 = vld [vmem:[%s5042_s2 + $0x3e8] sm:$0xff] }
 0x17f   : > { %1707 = vmatpush2.bf16.msra.mxu0 %v1138_v33  ;;  %v1291_v33 = vunpack.c.h.s8.bf16 %v939_v27 }
 0x180   : > { %1748 = vmatpush2.bf16.msra.mxu1 %v1202_v34  ;;  %1708 = vmatprep.subr.bf16.mxu0 %v1135_v35  ;;  %v1355_v34 = vunpack.c.h.s8.bf16 %v971_v28  ;;  %v938_v35 = vld [vmem:[%s5042_s2 + $0x2e0] sm:$0xff] }
 0x181   : > { %1749 = vmatprep.subr.bf16.mxu1 %v1199_v36  ;;  %v970_v36 = vld [vmem:[%s5042_s2 + $0x3e0] sm:$0xff]  ;;  %v1290_v38 = vunpack.c.h.s8.bf16 %v938_v35  ;;  %v1286_v45 = vunpack.c.l.s8.bf16 %v938_v35 }
 0x182   : > { %v1354_v39 = vunpack.c.h.s8.bf16 %v970_v36  ;;  %v1350_v46 = vunpack.c.l.s8.bf16 %v970_v36 }
 0x183   : > { %1709 = vmatpush2.bf16.msra.mxu0 %v1134_v41  ;;  %v1287_v41 = vunpack.c.l.s8.bf16 %v939_v27  ;;  %v5188_v27 = vcombine.low %v5138_v49, %v5138_v49  ;;  %v983_v49 = vld [vmem:[%s5042_s2 + $0x448] sm:$0xff] }
 0x184   : > { %1750 = vmatpush2.bf16.msra.mxu1 %v1198_v42  ;;  %1760 = vmatprep.subr.bf16.mxu0 %v1259_v43  ;;  %v1351_v42 = vunpack.c.l.s8.bf16 %v971_v28  ;;  %v935_v43 = vld [vmem:[%s5042_s2 + $0x2c8] sm:$0xff]  ;;  %v5192_v28 = vcombine.low %v5140_v50, %v5140_v50 }
 0x185   : > { %1801 = vmatprep.subr.bf16.mxu1 %v1323_v44  ;;  %v967_v44 = vld [vmem:[%s5042_s2 + $0x3c8] sm:$0xff] }
 0x186   : > { %1711 = vmatmul.mubr.bf16.vlgmr.msra.gmra.mxu0 %v5132_v47 }
 0x187   : > { %1752 = vmatmul.mubr.bf16.vlgmr.msra.gmra.mxu1 %v5136_v48  ;;  %1761 = vmatpush1.bf16.msra.mxu0 %v1258_v51  ;;  %v1283_v51 = vunpack.c.h.s8.bf16 %v935_v43 }
 0x188   : > { %1802 = vmatpush1.bf16.msra.mxu1 %v1322_v52  ;;  %1762 = vmatprep.subr.bf16.mxu0 %v1255_v53  ;;  %v1347_v52 = vunpack.c.h.s8.bf16 %v967_v44  ;;  %v934_v53 = vld [vmem:[%s5042_s2 + $0x2c0] sm:$0xff] }
 0x189   : > { %1803 = vmatprep.subr.bf16.mxu1 %v1319_v54  ;;  %1792 = vmatprep.mubr.bf16.mxu0 %v5146_v32  ;;  %v966_v54 = vld [vmem:[%s5042_s2 + $0x3c0] sm:$0xff]  ;;  %v1282_v31 = vunpack.c.h.s8.bf16 %v934_v53  ;;  %v1278_v61 = vunpack.c.l.s8.bf16 %v934_v53  ;;  %v1375_v53 = vunpack.c.l.s8.bf16 %v983_v49 }
 0x18a   : > { %1833 = vmatprep.mubr.bf16.mxu1 %v5150_v56  ;;  %v1346_v55 = vunpack.c.h.s8.bf16 %v966_v54  ;;  %v1342_v62 = vunpack.c.l.s8.bf16 %v966_v54 }
 0x18b   : > { %1763 = vmatpush1.bf16.msra.mxu0 %v1254_v57  ;;  %v1279_v57 = vunpack.c.l.s8.bf16 %v935_v43  ;;  %v1379_v43 = vunpack.c.h.s8.bf16 %v983_v49 }
 0x18c   : > { %1804 = vmatpush1.bf16.msra.mxu1 %v1318_v58  ;;  %1764 = vmatprep.subr.bf16.mxu0 %v1251_v59  ;;  %v1343_v58 = vunpack.c.l.s8.bf16 %v967_v44  ;;  %v931_v59 = vld [vmem:[%s5042_s2 + $0x2a8] sm:$0xff] }
 0x18d   : > { %1805 = vmatprep.subr.bf16.mxu1 %v1315_v60  ;;  %v963_v60 = vld [vmem:[%s5042_s2 + $0x3a8] sm:$0xff] }
 0x18f   : > { %1765 = vmatpush1.bf16.msra.mxu0 %v1250_v63  ;;  %v1275_v63 = vunpack.c.h.s8.bf16 %v931_v59 }
 0x190   : > { %1806 = vmatpush1.bf16.msra.mxu1 %v1314_v0  ;;  %1766 = vmatprep.subr.bf16.mxu0 %v1247_v1  ;;  %v1339_v0 = vunpack.c.h.s8.bf16 %v963_v60  ;;  %v930_v1 = vld [vmem:[%s5042_s2 + $0x2a0] sm:$0xff] }
 0x191   : > { %1807 = vmatprep.subr.bf16.mxu1 %v1311_v2  ;;  %v962_v2 = vld [vmem:[%s5042_s2 + $0x3a0] sm:$0xff]  ;;  %v1274_v3 = vunpack.c.h.s8.bf16 %v930_v1  ;;  %v1270_v9 = vunpack.c.l.s8.bf16 %v930_v1 }
 0x192   : > { %v1338_v4 = vunpack.c.h.s8.bf16 %v962_v2  ;;  %v1334_v10 = vunpack.c.l.s8.bf16 %v962_v2 }
 0x193   : > { %1767 = vmatpush1.bf16.msra.mxu0 %v1246_v5  ;;  %v1271_v5 = vunpack.c.l.s8.bf16 %v931_v59 }
 0x194   : > { %1808 = vmatpush1.bf16.msra.mxu1 %v1310_v6  ;;  %1768 = vmatprep.subr.bf16.mxu0 %v1243_v7  ;;  %v1335_v6 = vunpack.c.l.s8.bf16 %v963_v60  ;;  %v927_v7 = vld [vmem:[%s5042_s2 + $0x288] sm:$0xff] }
 0x195   : > { %1809 = vmatprep.subr.bf16.mxu1 %v1307_v8  ;;  %v959_v8 = vld [vmem:[%s5042_s2 + $0x388] sm:$0xff] }
 0x197   : > { %1769 = vmatpush1.bf16.msra.mxu0 %v1242_v11  ;;  %v1267_v11 = vunpack.c.h.s8.bf16 %v927_v7 }
 0x198   : > { %1810 = vmatpush1.bf16.msra.mxu1 %v1306_v12  ;;  %1770 = vmatprep.subr.bf16.mxu0 %v1239_v13  ;;  %v1331_v12 = vunpack.c.h.s8.bf16 %v959_v8  ;;  %v926_v13 = vld [vmem:[%s5042_s2 + $0x280] sm:$0xff] }
 0x199   : > { %1811 = vmatprep.subr.bf16.mxu1 %v1303_v14  ;;  %v958_v14 = vld [vmem:[%s5042_s2 + $0x380] sm:$0xff]  ;;  %v1266_v15 = vunpack.c.h.s8.bf16 %v926_v13  ;;  %v1262_v21 = vunpack.c.l.s8.bf16 %v926_v13 }
 0x19a   : > { %v1330_v16 = vunpack.c.h.s8.bf16 %v958_v14  ;;  %v1326_v22 = vunpack.c.l.s8.bf16 %v958_v14 }
 0x19b   : > { %1771 = vmatpush1.bf16.msra.mxu0 %v1238_v17  ;;  %v1263_v17 = vunpack.c.l.s8.bf16 %v927_v7 }
 0x19c   : > { %1812 = vmatpush1.bf16.msra.mxu1 %v1302_v18  ;;  %1772 = vmatprep.subr.bf16.mxu0 %v1235_v19  ;;  %v1327_v18 = vunpack.c.l.s8.bf16 %v959_v8  ;;  %v987_v19 = vld [vmem:[%s5042_s2 + $0x468] sm:$0xff] }
 0x19d   : > { %1813 = vmatprep.subr.bf16.mxu1 %v1299_v20  ;;  %v1019_v20 = vld [vmem:[%s5042_s2 + $0x568] sm:$0xff]  ;;  %v1383_v35 = vunpack.c.l.s8.bf16 %v987_v19 }
 0x19e   : > { %v1447_v36 = vunpack.c.l.s8.bf16 %v1019_v20 }
 0x19f   : > { %1773 = vmatpush1.bf16.msra.mxu0 %v1234_v23  ;;  %v1387_v23 = vunpack.c.h.s8.bf16 %v987_v19 }
 0x1a0   : > { %1814 = vmatpush1.bf16.msra.mxu1 %v1298_v24  ;;  %1774 = vmatprep.subr.bf16.mxu0 %v1231_v25  ;;  %v1451_v24 = vunpack.c.h.s8.bf16 %v1019_v20  ;;  %v986_v25 = vld [vmem:[%s5042_s2 + $0x460] sm:$0xff] }
 0x1a1   : > { %1815 = vmatprep.subr.bf16.mxu1 %v1295_v26  ;;  %v1018_v26 = vld [vmem:[%s5042_s2 + $0x560] sm:$0xff] }
 0x1a3   : > { %1775 = vmatpush1.bf16.msra.mxu0 %v1230_v29  ;;  %v5194_v29 = vld [vmem:[#allocation3 + $0x20] sm:$0xff] }
 0x1a4   : > { %1816 = vmatpush1.bf16.msra.mxu1 %v1294_v30  ;;  %1776 = vmatprep.subr.bf16.mxu0 %v1291_v33  ;;  %v5196_v30 = vld [vmem:[#allocation3 + $0x28] sm:$0xff]  ;;  %v1386_v33 = vunpack.c.h.s8.bf16 %v986_v25  ;;  %v5202_v50 = vcombine.high %v5194_v29, %v5194_v29 }
 0x1a5   : > { %1817 = vmatprep.subr.bf16.mxu1 %v1355_v34  ;;  %v1450_v34 = vunpack.c.h.s8.bf16 %v1018_v26 }
 0x1a7   : > { %1777 = vmatpush2.bf16.msra.mxu0 %v1290_v38  ;;  %v1015_v38 = vld [vmem:[%s5042_s2 + $0x548] sm:$0xff] }
 0x1a8   : > { %1818 = vmatpush2.bf16.msra.mxu1 %v1354_v39  ;;  %1778 = vmatprep.subr.bf16.mxu0 %v1287_v41  ;;  %v5206_v39 = vcombine.high %v5196_v30, %v5196_v30  ;;  %v1382_v41 = vunpack.c.l.s8.bf16 %v986_v25  ;;  %v1443_v44 = vunpack.c.h.s8.bf16 %v1015_v38  ;;  %v1439_v54 = vunpack.c.l.s8.bf16 %v1015_v38 }
 0x1a9   : > { %1819 = vmatprep.subr.bf16.mxu1 %v1351_v42  ;;  %v1446_v42 = vunpack.c.l.s8.bf16 %v1018_v26 }
 0x1ab   : > { %1779 = vmatpush2.bf16.msra.mxu0 %v1286_v45  ;;  %v982_v45 = vld [vmem:[%s5042_s2 + $0x440] sm:$0xff] }
 0x1ac   : > { %1820 = vmatpush2.bf16.msra.mxu1 %v1350_v46  ;;  %1780 = vmatprep.subr.bf16.mxu0 %v1283_v51  ;;  %v1014_v46 = vld [vmem:[%s5042_s2 + $0x540] sm:$0xff]  ;;  %v1378_v51 = vunpack.c.h.s8.bf16 %v982_v45 }
 0x1ad   : > { %1821 = vmatprep.subr.bf16.mxu1 %v1347_v52  ;;  %v1442_v52 = vunpack.c.h.s8.bf16 %v1014_v46 }
 0x1af   : > { %1781 = vmatpush2.bf16.msra.mxu0 %v1282_v31  ;;  %v979_v31 = vld [vmem:[%s5042_s2 + $0x428] sm:$0xff] }
 0x1b0   : > { %1822 = vmatpush2.bf16.msra.mxu1 %v1346_v55  ;;  %1782 = vmatprep.subr.bf16.mxu0 %v1279_v57  ;;  %v1011_v55 = vld [vmem:[%s5042_s2 + $0x528] sm:$0xff]  ;;  %v1374_v57 = vunpack.c.l.s8.bf16 %v982_v45  ;;  %v1371_v59 = vunpack.c.h.s8.bf16 %v979_v31  ;;  %v1367_v1 = vunpack.c.l.s8.bf16 %v979_v31 }
 0x1b1   : > { %1823 = vmatprep.subr.bf16.mxu1 %v1343_v58  ;;  %v1438_v58 = vunpack.c.l.s8.bf16 %v1014_v46  ;;  %v1435_v60 = vunpack.c.h.s8.bf16 %v1011_v55  ;;  %v1431_v2 = vunpack.c.l.s8.bf16 %v1011_v55 }
 0x1b3   : > { %1783 = vmatpush2.bf16.msra.mxu0 %v1278_v61  ;;  %v978_v61 = vld [vmem:[%s5042_s2 + $0x420] sm:$0xff] }
 0x1b4   : > { %1824 = vmatpush2.bf16.msra.mxu1 %v1342_v62  ;;  %1784 = vmatprep.subr.bf16.mxu0 %v1275_v63  ;;  %v1010_v62 = vld [vmem:[%s5042_s2 + $0x520] sm:$0xff]  ;;  %v1370_v63 = vunpack.c.h.s8.bf16 %v978_v61 }
 0x1b5   : > { %1825 = vmatprep.subr.bf16.mxu1 %v1339_v0  ;;  %v1434_v0 = vunpack.c.h.s8.bf16 %v1010_v62 }
 0x1b7   : > { %1785 = vmatpush2.bf16.msra.mxu0 %v1274_v3  ;;  %v975_v3 = vld [vmem:[%s5042_s2 + $0x408] sm:$0xff] }
 0x1b8   : > { %1826 = vmatpush2.bf16.msra.mxu1 %v1338_v4  ;;  %1786 = vmatprep.subr.bf16.mxu0 %v1271_v5  ;;  %v1007_v4 = vld [vmem:[%s5042_s2 + $0x508] sm:$0xff]  ;;  %v1366_v5 = vunpack.c.l.s8.bf16 %v978_v61  ;;  %v1363_v7 = vunpack.c.h.s8.bf16 %v975_v3  ;;  %v1359_v13 = vunpack.c.l.s8.bf16 %v975_v3 }
 0x1b9   : > { %1827 = vmatprep.subr.bf16.mxu1 %v1335_v6  ;;  %v1430_v6 = vunpack.c.l.s8.bf16 %v1010_v62  ;;  %v1427_v8 = vunpack.c.h.s8.bf16 %v1007_v4  ;;  %v1423_v14 = vunpack.c.l.s8.bf16 %v1007_v4 }
 0x1bb   : > { %1787 = vmatpush2.bf16.msra.mxu0 %v1270_v9  ;;  %v974_v9 = vld [vmem:[%s5042_s2 + $0x400] sm:$0xff] }
 0x1bc   : > { %1828 = vmatpush2.bf16.msra.mxu1 %v1334_v10  ;;  %1788 = vmatprep.subr.bf16.mxu0 %v1267_v11  ;;  %v1006_v10 = vld [vmem:[%s5042_s2 + $0x500] sm:$0xff]  ;;  %v1362_v11 = vunpack.c.h.s8.bf16 %v974_v9 }
 0x1bd   : > { %1829 = vmatprep.subr.bf16.mxu1 %v1331_v12  ;;  %v1426_v12 = vunpack.c.h.s8.bf16 %v1006_v10 }
 0x1bf   : > { %1789 = vmatpush2.bf16.msra.mxu0 %v1266_v15  ;;  %v1003_v15 = vld [vmem:[%s5042_s2 + $0x4e8] sm:$0xff] }
 0x1c0   : > { %1830 = vmatpush2.bf16.msra.mxu1 %v1330_v16  ;;  %1790 = vmatprep.subr.bf16.mxu0 %v1263_v17  ;;  %v1035_v16 = vld [vmem:[%s5042_s2 + $0x5e8] sm:$0xff]  ;;  %v1358_v17 = vunpack.c.l.s8.bf16 %v974_v9  ;;  %v1419_v19 = vunpack.c.h.s8.bf16 %v1003_v15  ;;  %v1415_v25 = vunpack.c.l.s8.bf16 %v1003_v15 }
 0x1c1   : > { %1831 = vmatprep.subr.bf16.mxu1 %v1327_v18  ;;  %v1422_v18 = vunpack.c.l.s8.bf16 %v1006_v10  ;;  %v1483_v20 = vunpack.c.h.s8.bf16 %v1035_v16  ;;  %v1479_v26 = vunpack.c.l.s8.bf16 %v1035_v16 }
 0x1c3   : > { %1791 = vmatpush2.bf16.msra.mxu0 %v1262_v21  ;;  %v1002_v21 = vld [vmem:[%s5042_s2 + $0x4e0] sm:$0xff] }
 0x1c4   : > { %1832 = vmatpush2.bf16.msra.mxu1 %v1326_v22  ;;  %1842 = vmatprep.subr.bf16.mxu0 %v1387_v23  ;;  %v1034_v22 = vld [vmem:[%s5042_s2 + $0x5e0] sm:$0xff]  ;;  %v1418_v23 = vunpack.c.h.s8.bf16 %v1002_v21 }
 0x1c5   : > { %1883 = vmatprep.subr.bf16.mxu1 %v1451_v24  ;;  %v1482_v24 = vunpack.c.h.s8.bf16 %v1034_v22 }
 0x1c6   : > { %1793 = vmatmul.mubr.bf16.vlgmr.msra.gmra.mxu0 %v5188_v27 }
 0x1c7   : > { %1834 = vmatmul.mubr.bf16.vlgmr.msra.gmra.mxu1 %v5192_v28  ;;  %1843 = vmatpush1.bf16.msra.mxu0 %v1386_v33  ;;  %v999_v33 = vld [vmem:[%s5042_s2 + $0x4c8] sm:$0xff] }
 0x1c8   : > { %1884 = vmatpush1.bf16.msra.mxu1 %v1450_v34  ;;  %1844 = vmatprep.subr.bf16.mxu0 %v1383_v35  ;;  %v1031_v34 = vld [vmem:[%s5042_s2 + $0x5c8] sm:$0xff]  ;;  %v1414_v35 = vunpack.c.l.s8.bf16 %v1002_v21  ;;  %v1411_v49 = vunpack.c.h.s8.bf16 %v999_v33  ;;  %v1407_v45 = vunpack.c.l.s8.bf16 %v999_v33  ;;  %v5250_v21 = vld [vmem:[#allocation3 + $0x30] sm:$0xff] }
 0x1c9   : > { %1885 = vmatprep.subr.bf16.mxu1 %v1447_v36  ;;  %1874 = vmatprep.mubr.bf16.mxu0 %v5202_v50  ;;  %v1478_v36 = vunpack.c.l.s8.bf16 %v1034_v22  ;;  %v1475_v38 = vunpack.c.h.s8.bf16 %v1031_v34  ;;  %v1471_v46 = vunpack.c.l.s8.bf16 %v1031_v34  ;;  %v5252_v22 = vld [vmem:[#allocation3 + $0x38] sm:$0xff]  ;;  %v1079_v33 = vld [vmem:[%s5042_s2 + $0x748] sm:$0xff] }
 0x1ca   : > { %1915 = vmatprep.mubr.bf16.mxu1 %v5206_v39  ;;  %v5262_v34 = vcombine.high %v5252_v22, %v5252_v22 }
 0x1cb   : > { %1845 = vmatpush1.bf16.msra.mxu0 %v1382_v41  ;;  %v998_v41 = vld [vmem:[%s5042_s2 + $0x4c0] sm:$0xff] }
 0x1cc   : > { %1886 = vmatpush1.bf16.msra.mxu1 %v1446_v42  ;;  %1846 = vmatprep.subr.bf16.mxu0 %v1379_v43  ;;  %v1030_v42 = vld [vmem:[%s5042_s2 + $0x5c0] sm:$0xff]  ;;  %v1410_v43 = vunpack.c.h.s8.bf16 %v998_v41 }
 0x1cd   : > { %1887 = vmatprep.subr.bf16.mxu1 %v1443_v44  ;;  %v1474_v44 = vunpack.c.h.s8.bf16 %v1030_v42 }
 0x1cf   : > { %1847 = vmatpush1.bf16.msra.mxu0 %v1378_v51  ;;  %v995_v51 = vld [vmem:[%s5042_s2 + $0x4a8] sm:$0xff] }
 0x1d0   : > { %1888 = vmatpush1.bf16.msra.mxu1 %v1442_v52  ;;  %1848 = vmatprep.subr.bf16.mxu0 %v1375_v53  ;;  %v1027_v52 = vld [vmem:[%s5042_s2 + $0x5a8] sm:$0xff]  ;;  %v1406_v53 = vunpack.c.l.s8.bf16 %v998_v41  ;;  %v1403_v31 = vunpack.c.h.s8.bf16 %v995_v51  ;;  %v1399_v61 = vunpack.c.l.s8.bf16 %v995_v51  ;;  %v1046_v41 = vld [vmem:[%s5042_s2 + $0x640] sm:$0xff] }
 0x1d1   : > { %1889 = vmatprep.subr.bf16.mxu1 %v1439_v54  ;;  %v1470_v54 = vunpack.c.l.s8.bf16 %v1030_v42  ;;  %v1467_v55 = vunpack.c.h.s8.bf16 %v1027_v52  ;;  %v1463_v62 = vunpack.c.l.s8.bf16 %v1027_v52  ;;  %v1078_v42 = vld [vmem:[%s5042_s2 + $0x740] sm:$0xff]  ;;  %v1043_v51 = vld [vmem:[%s5042_s2 + $0x628] sm:$0xff] }
 0x1d2   : > { %v1075_v52 = vld [vmem:[%s5042_s2 + $0x728] sm:$0xff] }
 0x1d3   : > { %1849 = vmatpush1.bf16.msra.mxu0 %v1374_v57  ;;  %v994_v57 = vld [vmem:[%s5042_s2 + $0x4a0] sm:$0xff] }
 0x1d4   : > { %1890 = vmatpush1.bf16.msra.mxu1 %v1438_v58  ;;  %1850 = vmatprep.subr.bf16.mxu0 %v1371_v59  ;;  %v1026_v58 = vld [vmem:[%s5042_s2 + $0x5a0] sm:$0xff]  ;;  %v1402_v59 = vunpack.c.h.s8.bf16 %v994_v57 }
 0x1d5   : > { %1891 = vmatprep.subr.bf16.mxu1 %v1435_v60  ;;  %v1466_v60 = vunpack.c.h.s8.bf16 %v1026_v58 }
 0x1d7   : > { %1851 = vmatpush1.bf16.msra.mxu0 %v1370_v63  ;;  %v991_v63 = vld [vmem:[%s5042_s2 + $0x488] sm:$0xff] }
 0x1d8   : > { %1892 = vmatpush1.bf16.msra.mxu1 %v1434_v0  ;;  %1852 = vmatprep.subr.bf16.mxu0 %v1367_v1  ;;  %v1023_v0 = vld [vmem:[%s5042_s2 + $0x588] sm:$0xff]  ;;  %v1398_v1 = vunpack.c.l.s8.bf16 %v994_v57  ;;  %v1395_v3 = vunpack.c.h.s8.bf16 %v991_v63  ;;  %v1391_v9 = vunpack.c.l.s8.bf16 %v991_v63  ;;  %v1042_v57 = vld [vmem:[%s5042_s2 + $0x620] sm:$0xff] }
 0x1d9   : > { %1893 = vmatprep.subr.bf16.mxu1 %v1431_v2  ;;  %v1462_v2 = vunpack.c.l.s8.bf16 %v1026_v58  ;;  %v1459_v4 = vunpack.c.h.s8.bf16 %v1023_v0  ;;  %v1455_v10 = vunpack.c.l.s8.bf16 %v1023_v0  ;;  %v1074_v58 = vld [vmem:[%s5042_s2 + $0x720] sm:$0xff]  ;;  %v1039_v63 = vld [vmem:[%s5042_s2 + $0x608] sm:$0xff] }
 0x1da   : > { %v1071_v0 = vld [vmem:[%s5042_s2 + $0x708] sm:$0xff] }
 0x1db   : > { %1853 = vmatpush1.bf16.msra.mxu0 %v1366_v5  ;;  %v990_v5 = vld [vmem:[%s5042_s2 + $0x480] sm:$0xff] }
 0x1dc   : > { %1894 = vmatpush1.bf16.msra.mxu1 %v1430_v6  ;;  %1854 = vmatprep.subr.bf16.mxu0 %v1363_v7  ;;  %v1022_v6 = vld [vmem:[%s5042_s2 + $0x580] sm:$0xff]  ;;  %v1394_v7 = vunpack.c.h.s8.bf16 %v990_v5 }
 0x1dd   : > { %1895 = vmatprep.subr.bf16.mxu1 %v1427_v8  ;;  %v1458_v8 = vunpack.c.h.s8.bf16 %v1022_v6 }
 0x1df   : > { %1855 = vmatpush1.bf16.msra.mxu0 %v1362_v11  ;;  %v1051_v11 = vld [vmem:[%s5042_s2 + $0x668] sm:$0xff] }
 0x1e0   : > { %1896 = vmatpush1.bf16.msra.mxu1 %v1426_v12  ;;  %1856 = vmatprep.subr.bf16.mxu0 %v1359_v13  ;;  %v1083_v12 = vld [vmem:[%s5042_s2 + $0x768] sm:$0xff]  ;;  %v1390_v13 = vunpack.c.l.s8.bf16 %v990_v5  ;;  %v1515_v15 = vunpack.c.h.s8.bf16 %v1051_v11  ;;  %v1038_v5 = vld [vmem:[%s5042_s2 + $0x600] sm:$0xff] }
 0x1e1   : > { %1897 = vmatprep.subr.bf16.mxu1 %v1423_v14  ;;  %v1454_v14 = vunpack.c.l.s8.bf16 %v1022_v6  ;;  %v1579_v16 = vunpack.c.h.s8.bf16 %v1083_v12  ;;  %v1070_v6 = vld [vmem:[%s5042_s2 + $0x700] sm:$0xff] }
 0x1e3   : > { %1857 = vmatpush1.bf16.msra.mxu0 %v1358_v17  ;;  %v1050_v17 = vld [vmem:[%s5042_s2 + $0x660] sm:$0xff] }
 0x1e4   : > { %1898 = vmatpush1.bf16.msra.mxu1 %v1422_v18  ;;  %1858 = vmatprep.subr.bf16.mxu0 %v1419_v19  ;;  %v1082_v18 = vld [vmem:[%s5042_s2 + $0x760] sm:$0xff]  ;;  %v5244_v19 = vcombine.low %v5194_v29, %v5194_v29  ;;  %v1047_v29 = vld [vmem:[%s5042_s2 + $0x648] sm:$0xff] }
 0x1e5   : > { %1899 = vmatprep.subr.bf16.mxu1 %v1483_v20  ;;  %v5248_v20 = vcombine.low %v5196_v30, %v5196_v30  ;;  %v5258_v30 = vcombine.high %v5250_v21, %v5250_v21 }
 0x1e7   : > { %1859 = vmatpush2.bf16.msra.mxu0 %v1418_v23  ;;  %v1514_v23 = vunpack.c.h.s8.bf16 %v1050_v17 }
 0x1e8   : > { %1900 = vmatpush2.bf16.msra.mxu1 %v1482_v24  ;;  %1860 = vmatprep.subr.bf16.mxu0 %v1415_v25  ;;  %v1578_v24 = vunpack.c.h.s8.bf16 %v1082_v18  ;;  %v1511_v25 = vunpack.c.l.s8.bf16 %v1051_v11  ;;  %v1067_v11 = vld [vmem:[%s5042_s2 + $0x6e8] sm:$0xff] }
 0x1e9   : > { %1901 = vmatprep.subr.bf16.mxu1 %v1479_v26  ;;  %v1575_v26 = vunpack.c.l.s8.bf16 %v1083_v12  ;;  %v1099_v12 = vld [vmem:[%s5042_s2 + $0x7e8] sm:$0xff] }
 0x1eb   : > { %1861 = vmatpush2.bf16.msra.mxu0 %v1414_v35  ;;  %v1510_v35 = vunpack.c.l.s8.bf16 %v1050_v17  ;;  %v1066_v17 = vld [vmem:[%s5042_s2 + $0x6e0] sm:$0xff] }
 0x1ec   : > { %1902 = vmatpush2.bf16.msra.mxu1 %v1478_v36  ;;  %1862 = vmatprep.subr.bf16.mxu0 %v1411_v49  ;;  %v1574_v36 = vunpack.c.l.s8.bf16 %v1082_v18  ;;  %v1507_v49 = vunpack.c.h.s8.bf16 %v1047_v29  ;;  %v1098_v18 = vld [vmem:[%s5042_s2 + $0x7e0] sm:$0xff] }
 0x1ed   : > { %1903 = vmatprep.subr.bf16.mxu1 %v1475_v38  ;;  %v1571_v38 = vunpack.c.h.s8.bf16 %v1079_v33 }
 0x1ef   : > { %1863 = vmatpush2.bf16.msra.mxu0 %v1410_v43  ;;  %v1506_v43 = vunpack.c.h.s8.bf16 %v1046_v41 }
 0x1f0   : > { %1904 = vmatpush2.bf16.msra.mxu1 %v1474_v44  ;;  %1864 = vmatprep.subr.bf16.mxu0 %v1407_v45  ;;  %v1570_v44 = vunpack.c.h.s8.bf16 %v1078_v42  ;;  %v1503_v45 = vunpack.c.l.s8.bf16 %v1047_v29  ;;  %v1063_v29 = vld [vmem:[%s5042_s2 + $0x6c8] sm:$0xff] }
 0x1f1   : > { %1905 = vmatprep.subr.bf16.mxu1 %v1471_v46  ;;  %v1567_v46 = vunpack.c.l.s8.bf16 %v1079_v33  ;;  %v1095_v33 = vld [vmem:[%s5042_s2 + $0x7c8] sm:$0xff] }
 0x1f3   : > { %1865 = vmatpush2.bf16.msra.mxu0 %v1406_v53  ;;  %v1502_v53 = vunpack.c.l.s8.bf16 %v1046_v41  ;;  %v1062_v41 = vld [vmem:[%s5042_s2 + $0x6c0] sm:$0xff] }
 0x1f4   : > { %1906 = vmatpush2.bf16.msra.mxu1 %v1470_v54  ;;  %1866 = vmatprep.subr.bf16.mxu0 %v1403_v31  ;;  %v1566_v54 = vunpack.c.l.s8.bf16 %v1078_v42  ;;  %v1499_v31 = vunpack.c.h.s8.bf16 %v1043_v51  ;;  %v1094_v42 = vld [vmem:[%s5042_s2 + $0x7c0] sm:$0xff] }
 0x1f5   : > { %1907 = vmatprep.subr.bf16.mxu1 %v1467_v55  ;;  %v1563_v55 = vunpack.c.h.s8.bf16 %v1075_v52 }
 0x1f7   : > { %1867 = vmatpush2.bf16.msra.mxu0 %v1402_v59  ;;  %v1498_v59 = vunpack.c.h.s8.bf16 %v1042_v57 }
 0x1f8   : > { %1908 = vmatpush2.bf16.msra.mxu1 %v1466_v60  ;;  %1868 = vmatprep.subr.bf16.mxu0 %v1399_v61  ;;  %v1562_v60 = vunpack.c.h.s8.bf16 %v1074_v58  ;;  %v1495_v61 = vunpack.c.l.s8.bf16 %v1043_v51  ;;  %v1059_v51 = vld [vmem:[%s5042_s2 + $0x6a8] sm:$0xff] }
 0x1f9   : > { %1909 = vmatprep.subr.bf16.mxu1 %v1463_v62  ;;  %v1559_v62 = vunpack.c.l.s8.bf16 %v1075_v52  ;;  %v1091_v52 = vld [vmem:[%s5042_s2 + $0x7a8] sm:$0xff] }
 0x1fb   : > { %1869 = vmatpush2.bf16.msra.mxu0 %v1398_v1  ;;  %v1494_v1 = vunpack.c.l.s8.bf16 %v1042_v57  ;;  %v1058_v57 = vld [vmem:[%s5042_s2 + $0x6a0] sm:$0xff] }
 0x1fc   : > { %1910 = vmatpush2.bf16.msra.mxu1 %v1462_v2  ;;  %1870 = vmatprep.subr.bf16.mxu0 %v1395_v3  ;;  %v1558_v2 = vunpack.c.l.s8.bf16 %v1074_v58  ;;  %v1491_v3 = vunpack.c.h.s8.bf16 %v1039_v63  ;;  %v1090_v58 = vld [vmem:[%s5042_s2 + $0x7a0] sm:$0xff] }
 0x1fd   : > { %1911 = vmatprep.subr.bf16.mxu1 %v1459_v4  ;;  %v1555_v4 = vunpack.c.h.s8.bf16 %v1071_v0 }
 0x1ff   : > { %1871 = vmatpush2.bf16.msra.mxu0 %v1394_v7  ;;  %v1490_v7 = vunpack.c.h.s8.bf16 %v1038_v5 }
 0x200   : > { %1912 = vmatpush2.bf16.msra.mxu1 %v1458_v8  ;;  %1872 = vmatprep.subr.bf16.mxu0 %v1391_v9  ;;  %v1554_v8 = vunpack.c.h.s8.bf16 %v1070_v6  ;;  %v1487_v9 = vunpack.c.l.s8.bf16 %v1039_v63  ;;  %v1055_v63 = vld [vmem:[%s5042_s2 + $0x688] sm:$0xff] }
 0x201   : > { %1913 = vmatprep.subr.bf16.mxu1 %v1455_v10  ;;  %v1551_v10 = vunpack.c.l.s8.bf16 %v1071_v0  ;;  %v1087_v0 = vld [vmem:[%s5042_s2 + $0x788] sm:$0xff] }
 0x203   : > { %1873 = vmatpush2.bf16.msra.mxu0 %v1390_v13  ;;  %v1486_v13 = vunpack.c.l.s8.bf16 %v1038_v5  ;;  %v1054_v5 = vld [vmem:[%s5042_s2 + $0x680] sm:$0xff] }
 0x204   : > { %1914 = vmatpush2.bf16.msra.mxu1 %v1454_v14  ;;  %1924 = vmatprep.subr.bf16.mxu0 %v1515_v15  ;;  %v1550_v14 = vunpack.c.l.s8.bf16 %v1070_v6  ;;  %v1547_v15 = vunpack.c.h.s8.bf16 %v1067_v11  ;;  %v1086_v6 = vld [vmem:[%s5042_s2 + $0x780] sm:$0xff] }
 0x205   : > { %1965 = vmatprep.subr.bf16.mxu1 %v1579_v16  ;;  %v1611_v16 = vunpack.c.h.s8.bf16 %v1099_v12 }
 0x206   : > { %1875 = vmatmul.mubr.bf16.vlgmr.msra.gmra.mxu0 %v5244_v19 }
 0x207   : > { %1916 = vmatmul.mubr.bf16.vlgmr.msra.gmra.mxu1 %v5248_v20  ;;  %1925 = vmatpush1.bf16.msra.mxu0 %v1514_v23  ;;  %v1546_v23 = vunpack.c.h.s8.bf16 %v1066_v17 }
 0x208   : > { %1966 = vmatpush1.bf16.msra.mxu1 %v1578_v24  ;;  %1926 = vmatprep.subr.bf16.mxu0 %v1511_v25  ;;  %v1610_v24 = vunpack.c.h.s8.bf16 %v1098_v18  ;;  %v1543_v25 = vunpack.c.l.s8.bf16 %v1067_v11  ;;  %v861_v11 = vld [vmem:[%s5042_s2 + $0x78] sm:$0xff] }
 0x209   : > { %1967 = vmatprep.subr.bf16.mxu1 %v1575_v26  ;;  %1956 = vmatprep.mubr.bf16.mxu0 %v5258_v30  ;;  %v1607_v26 = vunpack.c.l.s8.bf16 %v1099_v12  ;;  %v893_v12 = vld [vmem:[%s5042_s2 + $0x178] sm:$0xff] }
 0x20a   : > { %1997 = vmatprep.mubr.bf16.mxu1 %v5262_v34 }
 0x20b   : > { %1927 = vmatpush1.bf16.msra.mxu0 %v1510_v35  ;;  %v1542_v35 = vunpack.c.l.s8.bf16 %v1066_v17  ;;  %v860_v17 = vld [vmem:[%s5042_s2 + $0x70] sm:$0xff] }
 0x20c   : > { %1968 = vmatpush1.bf16.msra.mxu1 %v1574_v36  ;;  %1928 = vmatprep.subr.bf16.mxu0 %v1507_v49  ;;  %v1606_v36 = vunpack.c.l.s8.bf16 %v1098_v18  ;;  %v1539_v49 = vunpack.c.h.s8.bf16 %v1063_v29  ;;  %v892_v18 = vld [vmem:[%s5042_s2 + $0x170] sm:$0xff] }
 0x20d   : > { %1969 = vmatprep.subr.bf16.mxu1 %v1571_v38  ;;  %v1603_v38 = vunpack.c.h.s8.bf16 %v1095_v33 }
 0x20f   : > { %1929 = vmatpush1.bf16.msra.mxu0 %v1506_v43  ;;  %v1538_v43 = vunpack.c.h.s8.bf16 %v1062_v41 }
 0x210   : > { %1970 = vmatpush1.bf16.msra.mxu1 %v1570_v44  ;;  %1930 = vmatprep.subr.bf16.mxu0 %v1503_v45  ;;  %v1602_v44 = vunpack.c.h.s8.bf16 %v1094_v42  ;;  %v1535_v45 = vunpack.c.l.s8.bf16 %v1063_v29  ;;  %v1129_v29 = vunpack.c.l.s8.bf16 %v861_v11 }
 0x211   : > { %1971 = vmatprep.subr.bf16.mxu1 %v1567_v46  ;;  %v1599_v46 = vunpack.c.l.s8.bf16 %v1095_v33  ;;  %v1193_v33 = vunpack.c.l.s8.bf16 %v893_v12 }
 0x213   : > { %1931 = vmatpush1.bf16.msra.mxu0 %v1502_v53  ;;  %v1534_v53 = vunpack.c.l.s8.bf16 %v1062_v41  ;;  %v1192_v41 = vunpack.c.l.s8.bf16 %v892_v18 }
 0x214   : > { %1972 = vmatpush1.bf16.msra.mxu1 %v1566_v54  ;;  %1932 = vmatprep.subr.bf16.mxu0 %v1499_v31  ;;  %v1598_v54 = vunpack.c.l.s8.bf16 %v1094_v42  ;;  %v1531_v31 = vunpack.c.h.s8.bf16 %v1059_v51 }
 0x215   : > { %1973 = vmatprep.subr.bf16.mxu1 %v1563_v55  ;;  %v1595_v55 = vunpack.c.h.s8.bf16 %v1091_v52 }
 0x217   : > { %1933 = vmatpush1.bf16.msra.mxu0 %v1498_v59  ;;  %v1530_v59 = vunpack.c.h.s8.bf16 %v1058_v57 }
 0x218   : > { %1974 = vmatpush1.bf16.msra.mxu1 %v1562_v60  ;;  %1934 = vmatprep.subr.bf16.mxu0 %v1495_v61  ;;  %v1594_v60 = vunpack.c.h.s8.bf16 %v1090_v58  ;;  %v1527_v61 = vunpack.c.l.s8.bf16 %v1059_v51  ;;  %v888_v51 = vld [vmem:[%s5042_s2 + $0x150] sm:$0xff] }
 0x219   : > { %1975 = vmatprep.subr.bf16.mxu1 %v1559_v62  ;;  %v1591_v62 = vunpack.c.l.s8.bf16 %v1091_v52 }
 0x21b   : > { %1935 = vmatpush1.bf16.msra.mxu0 %v1494_v1  ;;  %v1526_v1 = vunpack.c.l.s8.bf16 %v1058_v57 }
 0x21c   : > { %1976 = vmatpush1.bf16.msra.mxu1 %v1558_v2  ;;  %1936 = vmatprep.subr.bf16.mxu0 %v1491_v3  ;;  %v1590_v2 = vunpack.c.l.s8.bf16 %v1090_v58  ;;  %v1523_v3 = vunpack.c.h.s8.bf16 %v1055_v63 }
 0x21d   : > { %1977 = vmatprep.subr.bf16.mxu1 %v1555_v4  ;;  %v1587_v4 = vunpack.c.h.s8.bf16 %v1087_v0 }
 0x21f   : > { %1937 = vmatpush1.bf16.msra.mxu0 %v1490_v7  ;;  %v1522_v7 = vunpack.c.h.s8.bf16 %v1054_v5 }
 0x220   : > { %1978 = vmatpush1.bf16.msra.mxu1 %v1554_v8  ;;  %1938 = vmatprep.subr.bf16.mxu0 %v1487_v9  ;;  %v1586_v8 = vunpack.c.h.s8.bf16 %v1086_v6  ;;  %v1519_v9 = vunpack.c.l.s8.bf16 %v1055_v63 }
 0x221   : > { %1979 = vmatprep.subr.bf16.mxu1 %v1551_v10  ;;  %v1583_v10 = vunpack.c.l.s8.bf16 %v1087_v0 }
 0x223   : > { %1939 = vmatpush1.bf16.msra.mxu0 %v1486_v13  ;;  %v1518_v13 = vunpack.c.l.s8.bf16 %v1054_v5 }
 0x224   : > { %1980 = vmatpush1.bf16.msra.mxu1 %v1550_v14  ;;  %1940 = vmatprep.subr.bf16.mxu0 %v1547_v15  ;;  %v1582_v14 = vunpack.c.l.s8.bf16 %v1086_v6  ;;  %v1133_v15 = vunpack.c.h.s8.bf16 %v861_v11 }
 0x225   : > { %1981 = vmatprep.subr.bf16.mxu1 %v1611_v16  ;;  %v1197_v16 = vunpack.c.h.s8.bf16 %v893_v12 }
 0x227   : > { %1941 = vmatpush2.bf16.msra.mxu0 %v1546_v23  ;;  %v5300_v23 = vcombine.low %v5250_v21, %v5250_v21 }
 0x228   : > { %1982 = vmatpush2.bf16.msra.mxu1 %v1610_v24  ;;  %1942 = vmatprep.subr.bf16.mxu0 %v1543_v25  ;;  %v5304_v24 = vcombine.low %v5252_v22, %v5252_v22  ;;  %v1132_v25 = vunpack.c.h.s8.bf16 %v860_v17  ;;  %v1128_v22 = vunpack.c.l.s8.bf16 %v860_v17 }
 0x229   : > { %1983 = vmatprep.subr.bf16.mxu1 %v1607_v26  ;;  %v1196_v26 = vunpack.c.h.s8.bf16 %v892_v18 }
 0x22b   : > { %1943 = vmatpush2.bf16.msra.mxu0 %v1542_v35  ;;  %v857_v35 = vld [vmem:[%s5042_s2 + $0x58] sm:$0xff] }
 0x22c   : > { %1984 = vmatpush2.bf16.msra.mxu1 %v1606_v36  ;;  %1944 = vmatprep.subr.bf16.mxu0 %v1539_v49  ;;  %v889_v36 = vld [vmem:[%s5042_s2 + $0x158] sm:$0xff] }
 0x22d   : > { %1985 = vmatprep.subr.bf16.mxu1 %v1603_v38 }
 0x22f   : > { %1945 = vmatpush2.bf16.msra.mxu0 %v1538_v43 }
 0x230   : > { %1986 = vmatpush2.bf16.msra.mxu1 %v1602_v44  ;;  %1946 = vmatprep.subr.bf16.mxu0 %v1535_v45  ;;  %v1125_v44 = vunpack.c.h.s8.bf16 %v857_v35  ;;  %v1189_v45 = vunpack.c.h.s8.bf16 %v889_v36 }
 0x231   : > { %1987 = vmatprep.subr.bf16.mxu1 %v1599_v46  ;;  %v856_v46 = vld [vmem:[%s5042_s2 + $0x50] sm:$0xff] }
 0x233   : > { %1947 = vmatpush2.bf16.msra.mxu0 %v1534_v53 }
 0x234   : > { %1988 = vmatpush2.bf16.msra.mxu1 %v1598_v54  ;;  %1948 = vmatprep.subr.bf16.mxu0 %v1531_v31  ;;  %v1124_v31 = vunpack.c.h.s8.bf16 %v856_v46 }
 0x235   : > { %1989 = vmatprep.subr.bf16.mxu1 %v1595_v55  ;;  %v1188_v55 = vunpack.c.h.s8.bf16 %v888_v51 }
 0x237   : > { %1949 = vmatpush2.bf16.msra.mxu0 %v1530_v59  ;;  %v1121_v59 = vunpack.c.l.s8.bf16 %v857_v35 }
 0x238   : > { %1990 = vmatpush2.bf16.msra.mxu1 %v1594_v60  ;;  %1950 = vmatprep.subr.bf16.mxu0 %v1527_v61  ;;  %v1185_v60 = vunpack.c.l.s8.bf16 %v889_v36  ;;  %v853_v61 = vld [vmem:[%s5042_s2 + $0x38] sm:$0xff] }
 0x239   : > { %1991 = vmatprep.subr.bf16.mxu1 %v1591_v62  ;;  %v885_v62 = vld [vmem:[%s5042_s2 + $0x138] sm:$0xff]  ;;  %v1117_v63 = vunpack.c.h.s8.bf16 %v853_v61  ;;  %v1113_v5 = vunpack.c.l.s8.bf16 %v853_v61 }
 0x23a   : > { %v1181_v0 = vunpack.c.h.s8.bf16 %v885_v62  ;;  %v1177_v6 = vunpack.c.l.s8.bf16 %v885_v62  ;;  %v869_v61 = vld [vmem:[%s5042_s2 + $0xb8] sm:$0xff] }
 0x23b   : > { %1951 = vmatpush2.bf16.msra.mxu0 %v1526_v1  ;;  %v852_v1 = vld [vmem:[%s5042_s2 + $0x30] sm:$0xff]  ;;  %v901_v62 = vld [vmem:[%s5042_s2 + $0x1b8] sm:$0xff] }
 0x23c   : > { %1992 = vmatpush2.bf16.msra.mxu1 %v1590_v2  ;;  %1952 = vmatprep.subr.bf16.mxu0 %v1523_v3  ;;  %v884_v2 = vld [vmem:[%s5042_s2 + $0x130] sm:$0xff]  ;;  %v1116_v3 = vunpack.c.h.s8.bf16 %v852_v1 }
 0x23d   : > { %1993 = vmatprep.subr.bf16.mxu1 %v1587_v4  ;;  %v1180_v4 = vunpack.c.h.s8.bf16 %v884_v2 }
 0x23f   : > { %1953 = vmatpush2.bf16.msra.mxu0 %v1522_v7  ;;  %v849_v7 = vld [vmem:[%s5042_s2 + $0x18] sm:$0xff] }
 0x240   : > { %1994 = vmatpush2.bf16.msra.mxu1 %v1586_v8  ;;  %1954 = vmatprep.subr.bf16.mxu0 %v1519_v9  ;;  %v881_v8 = vld [vmem:[%s5042_s2 + $0x118] sm:$0xff]  ;;  %v1112_v9 = vunpack.c.l.s8.bf16 %v852_v1  ;;  %v1109_v11 = vunpack.c.h.s8.bf16 %v849_v7  ;;  %v1105_v17 = vunpack.c.l.s8.bf16 %v849_v7  ;;  %v868_v1 = vld [vmem:[%s5042_s2 + $0xb0] sm:$0xff] }
 0x241   : > { %1995 = vmatprep.subr.bf16.mxu1 %v1583_v10  ;;  %v1176_v10 = vunpack.c.l.s8.bf16 %v884_v2  ;;  %v1173_v12 = vunpack.c.h.s8.bf16 %v881_v8  ;;  %v1169_v18 = vunpack.c.l.s8.bf16 %v881_v8  ;;  %v900_v2 = vld [vmem:[%s5042_s2 + $0x1b0] sm:$0xff]  ;;  %v865_v7 = vld [vmem:[%s5042_s2 + $0x98] sm:$0xff] }
 0x242   : > { %v897_v8 = vld [vmem:[%s5042_s2 + $0x198] sm:$0xff] }
 0x243   : > { %1955 = vmatpush2.bf16.msra.mxu0 %v1518_v13  ;;  %v848_v13 = vld [vmem:[%s5042_s2 + $0x10] sm:$0xff] }
 0x244   : > { %1996 = vmatpush2.bf16.msra.mxu1 %v1582_v14  ;;  %2006 = vmatprep.subr.bf16.mxu0 %v1133_v15  ;;  %v880_v14 = vld [vmem:[%s5042_s2 + $0x110] sm:$0xff]  ;;  %v1108_v15 = vunpack.c.h.s8.bf16 %v848_v13 }
 0x245   : > { %2047 = vmatprep.subr.bf16.mxu1 %v1197_v16  ;;  %v1172_v16 = vunpack.c.h.s8.bf16 %v880_v14 }
 0x246   : > { %v1712_v49 = vpop.f32.mrf.mxu0  ;;  %1957 = vmatmul.mubr.bf16.vlgmr.msra.gmra.mxu0 %v5300_v23 }
 0x247   : > { %v1753_v38 = vpop.f32.mrf.mxu1  ;;  %1998 = vmatmul.mubr.bf16.vlgmr.msra.gmra.mxu1 %v5304_v24  ;;  %2007 = vmatpush1.bf16.msra.mxu0 %v1132_v25  ;;  %v877_v25 = vld [vmem:[%s5042_s2 + $0xf8] sm:$0xff] }
 0x248   : > { %v5310_v21 = vadd.f32 %v1753_v38, %v1712_v49  ;;  %2048 = vmatpush1.bf16.msra.mxu1 %v1196_v26  ;;  %v1714_v42 = vpop.f32.mrf.mxu0  ;;  %2008 = vmatprep.subr.bf16.mxu0 %v1129_v29  ;;  %v909_v26 = vld [vmem:[%s5042_s2 + $0x1f8] sm:$0xff]  ;;  %v1104_v29 = vunpack.c.l.s8.bf16 %v848_v13  ;;  %v1165_v35 = vunpack.c.h.s8.bf16 %v877_v25  ;;  %v876_v49 = vld [vmem:[%s5042_s2 + $0xf0] sm:$0xff] }
 0x249   : > { %v1755_v43 = vpop.f32.mrf.mxu1  ;;  %2049 = vmatprep.subr.bf16.mxu1 %v1193_v33  ;;  %2038 = vmatprep.mubr.bf16.mxu0 %v5098_v37  ;;  %v1120_v37 = vunpack.c.l.s8.bf16 %v856_v46  ;;  %v1168_v33 = vunpack.c.l.s8.bf16 %v880_v14  ;;  %v1229_v36 = vunpack.c.h.s8.bf16 %v909_v26  ;;  %v908_v38 = vld [vmem:[%s5042_s2 + $0x1f0] sm:$0xff]  ;;  %v1160_v46 = vunpack.c.l.s8.bf16 %v876_v49 }
 0x24a   : > { %v5314_v52 = vadd.f32 %v1755_v43, %v1714_v42  ;;  %2079 = vmatprep.mubr.bf16.mxu1 %v5104_v40  ;;  %v1716_v53 = vpop.f32.mrf.mxu0  ;;  %v1184_v40 = vunpack.c.l.s8.bf16 %v888_v51  ;;  %v1161_v42 = vunpack.c.l.s8.bf16 %v877_v25  ;;  %v1225_v43 = vunpack.c.l.s8.bf16 %v909_v26  ;;  %v864_v13 = vld [vmem:[%s5042_s2 + $0x90] sm:$0xff]  ;;  %v925_v25 = vld [vmem:[%s5042_s2 + $0x278] sm:$0xff] }
 0x24b   : > { %v1757_v54 = vpop.f32.mrf.mxu1  ;;  %2009 = vmatpush1.bf16.msra.mxu0 %v1128_v22  ;;  %v1164_v22 = vunpack.c.h.s8.bf16 %v876_v49  ;;  %v1224_v51 = vunpack.c.l.s8.bf16 %v908_v38  ;;  %v896_v14 = vld [vmem:[%s5042_s2 + $0x190] sm:$0xff]  ;;  %v957_v26 = vld [vmem:[%s5042_s2 + $0x378] sm:$0xff] }
 0x24c   : > { %2050 = vmatpush1.bf16.msra.mxu1 %v1192_v41  ;;  %v1717_v57 = vpop.f32.mrf.mxu0  ;;  %2010 = vmatprep.subr.bf16.mxu0 %v1125_v44  ;;  %v1228_v41 = vunpack.c.h.s8.bf16 %v908_v38  ;;  %v873_v44 = vld [vmem:[%s5042_s2 + $0xd8] sm:$0xff]  ;;  %v924_v49 = vld [vmem:[%s5042_s2 + $0x270] sm:$0xff] }
 0x24d   : > { %v1758_v58 = vpop.f32.mrf.mxu1  ;;  %2051 = vmatprep.subr.bf16.mxu1 %v1189_v45  ;;  %v905_v45 = vld [vmem:[%s5042_s2 + $0x1d8] sm:$0xff]  ;;  %v1157_v53 = vunpack.c.h.s8.bf16 %v873_v44  ;;  %v956_v38 = vld [vmem:[%s5042_s2 + $0x370] sm:$0xff] }
 0x24e   : > { %v1221_v54 = vunpack.c.h.s8.bf16 %v905_v45 }
 0x24f   : > { %2011 = vmatpush1.bf16.msra.mxu0 %v1124_v31  ;;  %v872_v31 = vld [vmem:[%s5042_s2 + $0xd0] sm:$0xff] }
 0x250   : > { %2052 = vmatpush1.bf16.msra.mxu1 %v1188_v55  ;;  %2012 = vmatprep.subr.bf16.mxu0 %v1121_v59  ;;  %v904_v55 = vld [vmem:[%s5042_s2 + $0x1d0] sm:$0xff]  ;;  %v1156_v57 = vunpack.c.h.s8.bf16 %v872_v31  ;;  %v1153_v59 = vunpack.c.l.s8.bf16 %v873_v44  ;;  %v921_v44 = vld [vmem:[%s5042_s2 + $0x258] sm:$0xff] }
 0x251   : > { %2053 = vmatprep.subr.bf16.mxu1 %v1185_v60  ;;  %v1220_v58 = vunpack.c.h.s8.bf16 %v904_v55  ;;  %v1217_v60 = vunpack.c.l.s8.bf16 %v905_v45  ;;  %v953_v45 = vld [vmem:[%s5042_s2 + $0x358] sm:$0xff] }
 0x253   : > { %2013 = vmatpush1.bf16.msra.mxu0 %v1120_v37  ;;  %v1152_v37 = vunpack.c.l.s8.bf16 %v872_v31  ;;  %v1320_v31 = vunpack.c.l.s8.bf16 %v956_v38 }
 0x254   : > { %2054 = vmatpush1.bf16.msra.mxu1 %v1184_v40  ;;  %2014 = vmatprep.subr.bf16.mxu0 %v1117_v63  ;;  %v1216_v40 = vunpack.c.l.s8.bf16 %v904_v55  ;;  %v1149_v63 = vunpack.c.h.s8.bf16 %v869_v61 }
 0x255   : > { %2055 = vmatprep.subr.bf16.mxu1 %v1181_v0  ;;  %v1213_v0 = vunpack.c.h.s8.bf16 %v901_v62 }
 0x257   : > { %2015 = vmatpush1.bf16.msra.mxu0 %v1116_v3  ;;  %v1148_v3 = vunpack.c.h.s8.bf16 %v868_v1 }
 0x258   : > { %2056 = vmatpush1.bf16.msra.mxu1 %v1180_v4  ;;  %2016 = vmatprep.subr.bf16.mxu0 %v1113_v5  ;;  %v1212_v4 = vunpack.c.h.s8.bf16 %v900_v2  ;;  %v1145_v5 = vunpack.c.l.s8.bf16 %v869_v61  ;;  %v952_v61 = vld [vmem:[%s5042_s2 + $0x350] sm:$0xff] }
 0x259   : > { %2057 = vmatprep.subr.bf16.mxu1 %v1177_v6  ;;  %v1209_v6 = vunpack.c.l.s8.bf16 %v901_v62 }
 0x25b   : > { %2017 = vmatpush1.bf16.msra.mxu0 %v1112_v9  ;;  %v1144_v9 = vunpack.c.l.s8.bf16 %v868_v1 }
 0x25c   : > { %2058 = vmatpush1.bf16.msra.mxu1 %v1176_v10  ;;  %2018 = vmatprep.subr.bf16.mxu0 %v1109_v11  ;;  %v1208_v10 = vunpack.c.l.s8.bf16 %v900_v2  ;;  %v1141_v11 = vunpack.c.h.s8.bf16 %v865_v7  ;;  %v1313_v2 = vunpack.c.l.s8.bf16 %v953_v45 }
 0x25d   : > { %2059 = vmatprep.subr.bf16.mxu1 %v1173_v12  ;;  %v1205_v12 = vunpack.c.h.s8.bf16 %v897_v8 }
 0x25f   : > { %2019 = vmatpush1.bf16.msra.mxu0 %v1108_v15  ;;  %v1140_v15 = vunpack.c.h.s8.bf16 %v864_v13 }
 0x260   : > { %2060 = vmatpush1.bf16.msra.mxu1 %v1172_v16  ;;  %2020 = vmatprep.subr.bf16.mxu0 %v1105_v17  ;;  %v1204_v16 = vunpack.c.h.s8.bf16 %v896_v14  ;;  %v1137_v17 = vunpack.c.l.s8.bf16 %v865_v7  ;;  %v916_v7 = vld [vmem:[%s5042_s2 + $0x230] sm:$0xff] }
 0x261   : > { %2061 = vmatprep.subr.bf16.mxu1 %v1169_v18  ;;  %v1201_v18 = vunpack.c.l.s8.bf16 %v897_v8  ;;  %v948_v8 = vld [vmem:[%s5042_s2 + $0x330] sm:$0xff] }
 0x263   : > { %2021 = vmatpush1.bf16.msra.mxu0 %v1104_v29  ;;  %v1136_v29 = vunpack.c.l.s8.bf16 %v864_v13  ;;  %v913_v13 = vld [vmem:[%s5042_s2 + $0x218] sm:$0xff] }
 0x264   : > { %2062 = vmatpush1.bf16.msra.mxu1 %v1168_v33  ;;  %2022 = vmatprep.subr.bf16.mxu0 %v1165_v35  ;;  %v1200_v33 = vunpack.c.l.s8.bf16 %v896_v14  ;;  %v1261_v35 = vunpack.c.h.s8.bf16 %v925_v25  ;;  %v945_v14 = vld [vmem:[%s5042_s2 + $0x318] sm:$0xff] }
 0x265   : > { %2063 = vmatprep.subr.bf16.mxu1 %v1229_v36  ;;  %v1325_v36 = vunpack.c.h.s8.bf16 %v957_v26 }
 0x267   : > { %2023 = vmatpush2.bf16.msra.mxu0 %v1164_v22  ;;  %v1260_v22 = vunpack.c.h.s8.bf16 %v924_v49 }
 0x268   : > { %2064 = vmatpush2.bf16.msra.mxu1 %v1228_v41  ;;  %2024 = vmatprep.subr.bf16.mxu0 %v1161_v42  ;;  %v1324_v41 = vunpack.c.h.s8.bf16 %v956_v38  ;;  %v1257_v42 = vunpack.c.l.s8.bf16 %v925_v25  ;;  %v912_v25 = vld [vmem:[%s5042_s2 + $0x210] sm:$0xff]  ;;  %v973_v38 = vld [vmem:[%s5042_s2 + $0x3f8] sm:$0xff] }
 0x269   : > { %2065 = vmatprep.subr.bf16.mxu1 %v1225_v43  ;;  %v1321_v43 = vunpack.c.l.s8.bf16 %v957_v26  ;;  %v944_v26 = vld [vmem:[%s5042_s2 + $0x310] sm:$0xff] }
 0x26b   : > { %2025 = vmatpush2.bf16.msra.mxu0 %v1160_v46 }
 0x26c   : > { %2066 = vmatpush2.bf16.msra.mxu1 %v1224_v51  ;;  %2026 = vmatprep.subr.bf16.mxu0 %v1157_v53 }
 0x26d   : > { %2067 = vmatprep.subr.bf16.mxu1 %v1221_v54  ;;  %v1256_v54 = vunpack.c.l.s8.bf16 %v924_v49  ;;  %v941_v49 = vld [vmem:[%s5042_s2 + $0x2f8] sm:$0xff] }
 0x26f   : > { %2027 = vmatpush2.bf16.msra.mxu0 %v1156_v57 }
 0x270   : > { %2068 = vmatpush2.bf16.msra.mxu1 %v1220_v58  ;;  %2028 = vmatprep.subr.bf16.mxu0 %v1153_v59  ;;  %v1253_v58 = vunpack.c.h.s8.bf16 %v921_v44  ;;  %v1317_v59 = vunpack.c.h.s8.bf16 %v953_v45  ;;  %v972_v45 = vld [vmem:[%s5042_s2 + $0x3f0] sm:$0xff] }
 0x271   : > { %2069 = vmatprep.subr.bf16.mxu1 %v1217_v60  ;;  %v920_v60 = vld [vmem:[%s5042_s2 + $0x250] sm:$0xff] }
 0x273   : > { %2029 = vmatpush2.bf16.msra.mxu0 %v1152_v37 }
 0x274   : > { %2070 = vmatpush2.bf16.msra.mxu1 %v1216_v40  ;;  %2030 = vmatprep.subr.bf16.mxu0 %v1149_v63  ;;  %v1252_v40 = vunpack.c.h.s8.bf16 %v920_v60  ;;  %v1316_v63 = vunpack.c.h.s8.bf16 %v952_v61 }
 0x275   : > { %2071 = vmatprep.subr.bf16.mxu1 %v1213_v0 }
 0x277   : > { %2031 = vmatpush2.bf16.msra.mxu0 %v1148_v3  ;;  %v949_v3 = vld [vmem:[%s5042_s2 + $0x338] sm:$0xff] }
 0x278   : > { %2072 = vmatpush2.bf16.msra.mxu1 %v1212_v4  ;;  %2032 = vmatprep.subr.bf16.mxu0 %v1145_v5  ;;  %v1312_v4 = vunpack.c.l.s8.bf16 %v952_v61  ;;  %v936_v61 = vld [vmem:[%s5042_s2 + $0x2d0] sm:$0xff] }
 0x279   : > { %2073 = vmatprep.subr.bf16.mxu1 %v1209_v6  ;;  %v1309_v6 = vunpack.c.h.s8.bf16 %v949_v3 }
 0x27b   : > { %2033 = vmatpush2.bf16.msra.mxu0 %v1144_v9  ;;  %v1244_v9 = vunpack.c.h.s8.bf16 %v916_v7 }
 0x27c   : > { %2074 = vmatpush2.bf16.msra.mxu1 %v1208_v10  ;;  %2034 = vmatprep.subr.bf16.mxu0 %v1141_v11  ;;  %v1308_v10 = vunpack.c.h.s8.bf16 %v948_v8 }
 0x27d   : > { %2075 = vmatprep.subr.bf16.mxu1 %v1205_v12  ;;  %v1305_v12 = vunpack.c.l.s8.bf16 %v949_v3 }
 0x27f   : > { %2035 = vmatpush2.bf16.msra.mxu0 %v1140_v15  ;;  %v1240_v15 = vunpack.c.l.s8.bf16 %v916_v7 }
 0x280   : > { %2076 = vmatpush2.bf16.msra.mxu1 %v1204_v16  ;;  %2036 = vmatprep.subr.bf16.mxu0 %v1137_v17  ;;  %v1304_v16 = vunpack.c.l.s8.bf16 %v948_v8  ;;  %v1237_v17 = vunpack.c.h.s8.bf16 %v913_v13 }
 0x281   : > { %2077 = vmatprep.subr.bf16.mxu1 %v1201_v18  ;;  %v1301_v18 = vunpack.c.h.s8.bf16 %v945_v14 }
 0x283   : > { %2037 = vmatpush2.bf16.msra.mxu0 %v1136_v29  ;;  %v1236_v29 = vunpack.c.h.s8.bf16 %v912_v25 }
 0x284   : > { %2078 = vmatpush2.bf16.msra.mxu1 %v1200_v33  ;;  %2088 = vmatprep.subr.bf16.mxu0 %v1261_v35  ;;  %v1300_v33 = vunpack.c.h.s8.bf16 %v944_v26  ;;  %v1233_v35 = vunpack.c.l.s8.bf16 %v913_v13 }
 0x285   : > { %2129 = vmatprep.subr.bf16.mxu1 %v1325_v36  ;;  %v1297_v36 = vunpack.c.l.s8.bf16 %v945_v14 }
 0x286   : > { %v1794_v46 = vpop.f32.mrf.mxu0  ;;  %2039 = vmatmul.mubr.bf16.vlgmr.msra.gmra.mxu0 %v5132_v47 }
 0x287   : > { %v1835_v51 = vpop.f32.mrf.mxu1  ;;  %2080 = vmatmul.mubr.bf16.vlgmr.msra.gmra.mxu1 %v5136_v48  ;;  %v1795_v53 = vadd.f32 %v1794_v46, %v5310_v21  ;;  %2089 = vmatpush1.bf16.msra.mxu0 %v1260_v22  ;;  %v1232_v22 = vunpack.c.l.s8.bf16 %v912_v25 }
 0x288   : > { %2130 = vmatpush1.bf16.msra.mxu1 %v1324_v41  ;;  %v1796_v55 = vpop.f32.mrf.mxu0  ;;  %2090 = vmatprep.subr.bf16.mxu0 %v1257_v42  ;;  %v1296_v41 = vunpack.c.l.s8.bf16 %v944_v26  ;;  %v1293_v42 = vunpack.c.h.s8.bf16 %v941_v49 }
 0x289   : > { %v1837_v57 = vpop.f32.mrf.mxu1  ;;  %2131 = vmatprep.subr.bf16.mxu1 %v1321_v43  ;;  %v5353_v62 = vadd.f32 %v1835_v51, %v1795_v53  ;;  %v1797_v47 = vadd.f32 %v1796_v55, %v5314_v52  ;;  %2120 = vmatprep.mubr.bf16.mxu0 %v5146_v32  ;;  %v1249_v52 = vunpack.c.l.s8.bf16 %v921_v44  ;;  %v917_v32 = vld [vmem:[%s5042_s2 + $0x238] sm:$0xff]  ;;  %v1357_v43 = vunpack.c.h.s8.bf16 %v973_v38  ;;  %v940_v44 = vld [vmem:[%s5042_s2 + $0x2f0] sm:$0xff] }
 0x28a   : > { %2161 = vmatprep.mubr.bf16.mxu1 %v5150_v56  ;;  %v1798_v48 = vpop.f32.mrf.mxu0  ;;  %v1248_v56 = vunpack.c.l.s8.bf16 %v920_v60  ;;  %v1245_v5 = vunpack.c.h.s8.bf16 %v917_v32  ;;  %v1241_v11 = vunpack.c.l.s8.bf16 %v917_v32  ;;  %v1292_v46 = vunpack.c.h.s8.bf16 %v940_v44  ;;  %v969_v55 = vld [vmem:[%s5042_s2 + $0x3d8] sm:$0xff] }
 0x28b   : > { %v1839_v21 = vpop.f32.mrf.mxu1  ;;  %v5358_v37 = vadd.f32 %v1837_v57, %v1797_v47  ;;  %2091 = vmatpush1.bf16.msra.mxu0 %v1256_v54  ;;  %v1356_v51 = vunpack.c.h.s8.bf16 %v972_v45  ;;  %v1289_v53 = vunpack.c.l.s8.bf16 %v941_v49  ;;  %v1353_v54 = vunpack.c.l.s8.bf16 %v973_v38  ;;  %v968_v47 = vld [vmem:[%s5042_s2 + $0x3d0] sm:$0xff] }
 0x28c   : > { %2132 = vmatpush1.bf16.msra.mxu1 %v1320_v31  ;;  %v1799_v0 = vpop.f32.mrf.mxu0  ;;  %2092 = vmatprep.subr.bf16.mxu0 %v1253_v58  ;;  %v937_v31 = vld [vmem:[%s5042_s2 + $0x2d8] sm:$0xff]  ;;  %v1288_v57 = vunpack.c.l.s8.bf16 %v940_v44  ;;  %v1352_v58 = vunpack.c.l.s8.bf16 %v972_v45  ;;  %v1349_v60 = vunpack.c.h.s8.bf16 %v969_v55  ;;  %v1284_v48 = vunpack.c.h.s8.bf16 %v936_v61 }
 0x28d   : > { %v1840_v1 = vpop.f32.mrf.mxu1  ;;  %2133 = vmatprep.subr.bf16.mxu1 %v1317_v59  ;;  %v1285_v59 = vunpack.c.h.s8.bf16 %v937_v31  ;;  %v1348_v21 = vunpack.c.h.s8.bf16 %v968_v47  ;;  %v933_v0 = vld [vmem:[%s5042_s2 + $0x2b8] sm:$0xff] }
 0x28e   : > { %v965_v1 = vld [vmem:[%s5042_s2 + $0x3b8] sm:$0xff]  ;;  %v1277_v32 = vunpack.c.h.s8.bf16 %v933_v0  ;;  %v1273_v7 = vunpack.c.l.s8.bf16 %v933_v0 }
 0x28f   : > { %2093 = vmatpush1.bf16.msra.mxu0 %v1252_v40  ;;  %v1281_v40 = vunpack.c.l.s8.bf16 %v937_v31  ;;  %v1341_v3 = vunpack.c.h.s8.bf16 %v965_v1  ;;  %v1337_v8 = vunpack.c.l.s8.bf16 %v965_v1 }
 0x290   : > { %2134 = vmatpush1.bf16.msra.mxu1 %v1316_v63  ;;  %2094 = vmatprep.subr.bf16.mxu0 %v1249_v52  ;;  %v1345_v63 = vunpack.c.l.s8.bf16 %v969_v55  ;;  %v1280_v52 = vunpack.c.l.s8.bf16 %v936_v61 }
 0x291   : > { %2135 = vmatprep.subr.bf16.mxu1 %v1313_v2  ;;  %v1344_v2 = vunpack.c.l.s8.bf16 %v968_v47  ;;  %v984_v47 = vld [vmem:[%s5042_s2 + $0x450] sm:$0xff] }
 0x293   : > { %2095 = vmatpush1.bf16.msra.mxu0 %v1248_v56  ;;  %v932_v56 = vld [vmem:[%s5042_s2 + $0x2b0] sm:$0xff] }
 0x294   : > { %2136 = vmatpush1.bf16.msra.mxu1 %v1312_v4  ;;  %2096 = vmatprep.subr.bf16.mxu0 %v1245_v5  ;;  %v964_v4 = vld [vmem:[%s5042_s2 + $0x3b0] sm:$0xff]  ;;  %v1276_v5 = vunpack.c.h.s8.bf16 %v932_v56 }
 0x295   : > { %2137 = vmatprep.subr.bf16.mxu1 %v1309_v6  ;;  %v1340_v6 = vunpack.c.h.s8.bf16 %v964_v4 }
 0x297   : > { %2097 = vmatpush1.bf16.msra.mxu0 %v1244_v9  ;;  %v929_v9 = vld [vmem:[%s5042_s2 + $0x298] sm:$0xff] }
 0x298   : > { %2138 = vmatpush1.bf16.msra.mxu1 %v1308_v10  ;;  %2098 = vmatprep.subr.bf16.mxu0 %v1241_v11  ;;  %v961_v10 = vld [vmem:[%s5042_s2 + $0x398] sm:$0xff]  ;;  %v1272_v11 = vunpack.c.l.s8.bf16 %v932_v56  ;;  %v1269_v13 = vunpack.c.h.s8.bf16 %v929_v9  ;;  %v1265_v25 = vunpack.c.l.s8.bf16 %v929_v9 }
 0x299   : > { %2139 = vmatprep.subr.bf16.mxu1 %v1305_v12  ;;  %v1336_v12 = vunpack.c.l.s8.bf16 %v964_v4  ;;  %v1333_v14 = vunpack.c.h.s8.bf16 %v961_v10  ;;  %v1329_v26 = vunpack.c.l.s8.bf16 %v961_v10 }
 0x29b   : > { %2099 = vmatpush1.bf16.msra.mxu0 %v1240_v15  ;;  %v928_v15 = vld [vmem:[%s5042_s2 + $0x290] sm:$0xff] }
 0x29c   : > { %2140 = vmatpush1.bf16.msra.mxu1 %v1304_v16  ;;  %2100 = vmatprep.subr.bf16.mxu0 %v1237_v17  ;;  %v960_v16 = vld [vmem:[%s5042_s2 + $0x390] sm:$0xff]  ;;  %v1268_v17 = vunpack.c.h.s8.bf16 %v928_v15 }
 0x29d   : > { %2141 = vmatprep.subr.bf16.mxu1 %v1301_v18  ;;  %v1332_v18 = vunpack.c.h.s8.bf16 %v960_v16 }
 0x29f   : > { %2101 = vmatpush1.bf16.msra.mxu0 %v1236_v29  ;;  %v989_v29 = vld [vmem:[%s5042_s2 + $0x478] sm:$0xff] }
 0x2a0   : > { %2142 = vmatpush1.bf16.msra.mxu1 %v1300_v33  ;;  %2102 = vmatprep.subr.bf16.mxu0 %v1233_v35  ;;  %v1021_v33 = vld [vmem:[%s5042_s2 + $0x578] sm:$0xff]  ;;  %v1264_v35 = vunpack.c.l.s8.bf16 %v928_v15  ;;  %v1389_v49 = vunpack.c.h.s8.bf16 %v989_v29  ;;  %v1385_v44 = vunpack.c.l.s8.bf16 %v989_v29 }
 0x2a1   : > { %2143 = vmatprep.subr.bf16.mxu1 %v1297_v36  ;;  %v1328_v36 = vunpack.c.l.s8.bf16 %v960_v16  ;;  %v1453_v38 = vunpack.c.h.s8.bf16 %v1021_v33  ;;  %v1449_v45 = vunpack.c.l.s8.bf16 %v1021_v33 }
 0x2a3   : > { %2103 = vmatpush1.bf16.msra.mxu0 %v1232_v22  ;;  %v988_v22 = vld [vmem:[%s5042_s2 + $0x470] sm:$0xff] }
 0x2a4   : > { %2144 = vmatpush1.bf16.msra.mxu1 %v1296_v41  ;;  %2104 = vmatprep.subr.bf16.mxu0 %v1293_v42  ;;  %v1020_v41 = vld [vmem:[%s5042_s2 + $0x570] sm:$0xff]  ;;  %v1388_v42 = vunpack.c.h.s8.bf16 %v988_v22  ;;  %v1384_v55 = vunpack.c.l.s8.bf16 %v988_v22 }
 0x2a5   : > { %2145 = vmatprep.subr.bf16.mxu1 %v1357_v43  ;;  %v1452_v43 = vunpack.c.h.s8.bf16 %v1020_v41 }
 0x2a7   : > { %2105 = vmatpush2.bf16.msra.mxu0 %v1292_v46  ;;  %v985_v46 = vld [vmem:[%s5042_s2 + $0x458] sm:$0xff] }
 0x2a8   : > { %2146 = vmatpush2.bf16.msra.mxu1 %v1356_v51  ;;  %2106 = vmatprep.subr.bf16.mxu0 %v1289_v53  ;;  %v1017_v51 = vld [vmem:[%s5042_s2 + $0x558] sm:$0xff] }
 0x2a9   : > { %2147 = vmatprep.subr.bf16.mxu1 %v1353_v54  ;;  %v1445_v61 = vunpack.c.h.s8.bf16 %v1017_v51 }
 0x2ab   : > { %2107 = vmatpush2.bf16.msra.mxu0 %v1288_v57  ;;  %v1448_v57 = vunpack.c.l.s8.bf16 %v1020_v41 }
 0x2ac   : > { %2148 = vmatpush2.bf16.msra.mxu1 %v1352_v58  ;;  %2108 = vmatprep.subr.bf16.mxu0 %v1285_v59 }
 0x2ad   : > { %2149 = vmatprep.subr.bf16.mxu1 %v1349_v60  ;;  %v1381_v60 = vunpack.c.h.s8.bf16 %v985_v46 }
 0x2af   : > { %2109 = vmatpush2.bf16.msra.mxu0 %v1284_v48  ;;  %v1016_v48 = vld [vmem:[%s5042_s2 + $0x550] sm:$0xff] }
 0x2b0   : > { %2150 = vmatpush2.bf16.msra.mxu1 %v1348_v21  ;;  %2110 = vmatprep.subr.bf16.mxu0 %v1281_v40  ;;  %v1444_v0 = vunpack.c.h.s8.bf16 %v1016_v48 }
 0x2b1   : > { %2151 = vmatprep.subr.bf16.mxu1 %v1345_v63  ;;  %v1380_v63 = vunpack.c.h.s8.bf16 %v984_v47 }
 0x2b3   : > { %2111 = vmatpush2.bf16.msra.mxu0 %v1280_v52 }
 0x2b4   : > { %2152 = vmatpush2.bf16.msra.mxu1 %v1344_v2  ;;  %2112 = vmatprep.subr.bf16.mxu0 %v1277_v32  ;;  %v1441_v2 = vunpack.c.l.s8.bf16 %v1017_v51  ;;  %v1013_v32 = vld [vmem:[%s5042_s2 + $0x538] sm:$0xff] }
 0x2b5   : > { %2153 = vmatprep.subr.bf16.mxu1 %v1341_v3  ;;  %v1440_v3 = vunpack.c.l.s8.bf16 %v1016_v48  ;;  %v1437_v4 = vunpack.c.h.s8.bf16 %v1013_v32  ;;  %v1433_v10 = vunpack.c.l.s8.bf16 %v1013_v32 }
 0x2b7   : > { %2113 = vmatpush2.bf16.msra.mxu0 %v1276_v5  ;;  %v980_v5 = vld [vmem:[%s5042_s2 + $0x430] sm:$0xff] }
 0x2b8   : > { %2154 = vmatpush2.bf16.msra.mxu1 %v1340_v6  ;;  %2114 = vmatprep.subr.bf16.mxu0 %v1273_v7  ;;  %v1012_v6 = vld [vmem:[%s5042_s2 + $0x530] sm:$0xff]  ;;  %v1372_v7 = vunpack.c.h.s8.bf16 %v980_v5 }
 0x2b9   : > { %2155 = vmatprep.subr.bf16.mxu1 %v1337_v8  ;;  %v1436_v8 = vunpack.c.h.s8.bf16 %v1012_v6 }
 0x2bb   : > { %2115 = vmatpush2.bf16.msra.mxu0 %v1272_v11  ;;  %v977_v11 = vld [vmem:[%s5042_s2 + $0x418] sm:$0xff] }
 0x2bc   : > { %2156 = vmatpush2.bf16.msra.mxu1 %v1336_v12  ;;  %2116 = vmatprep.subr.bf16.mxu0 %v1269_v13  ;;  %v1009_v12 = vld [vmem:[%s5042_s2 + $0x518] sm:$0xff]  ;;  %v1368_v13 = vunpack.c.l.s8.bf16 %v980_v5  ;;  %v1365_v15 = vunpack.c.h.s8.bf16 %v977_v11  ;;  %v1361_v29 = vunpack.c.l.s8.bf16 %v977_v11 }
 0x2bd   : > { %2157 = vmatprep.subr.bf16.mxu1 %v1333_v14  ;;  %v1432_v14 = vunpack.c.l.s8.bf16 %v1012_v6  ;;  %v1429_v16 = vunpack.c.h.s8.bf16 %v1009_v12  ;;  %v1425_v33 = vunpack.c.l.s8.bf16 %v1009_v12 }
 0x2bf   : > { %2117 = vmatpush2.bf16.msra.mxu0 %v1268_v17  ;;  %v976_v17 = vld [vmem:[%s5042_s2 + $0x410] sm:$0xff] }
 0x2c0   : > { %2158 = vmatpush2.bf16.msra.mxu1 %v1332_v18  ;;  %2118 = vmatprep.subr.bf16.mxu0 %v1265_v25  ;;  %v1008_v18 = vld [vmem:[%s5042_s2 + $0x510] sm:$0xff]  ;;  %v1364_v25 = vunpack.c.h.s8.bf16 %v976_v17 }
 0x2c1   : > { %2159 = vmatprep.subr.bf16.mxu1 %v1329_v26  ;;  %v1428_v26 = vunpack.c.h.s8.bf16 %v1008_v18 }
 0x2c3   : > { %2119 = vmatpush2.bf16.msra.mxu0 %v1264_v35  ;;  %v1005_v35 = vld [vmem:[%s5042_s2 + $0x4f8] sm:$0xff] }
 0x2c4   : > { %2160 = vmatpush2.bf16.msra.mxu1 %v1328_v36  ;;  %2170 = vmatprep.subr.bf16.mxu0 %v1389_v49  ;;  %v1037_v36 = vld [vmem:[%s5042_s2 + $0x5f8] sm:$0xff]  ;;  %v1360_v49 = vunpack.c.l.s8.bf16 %v976_v17  ;;  %v1421_v22 = vunpack.c.h.s8.bf16 %v1005_v35 }
 0x2c5   : > { %2211 = vmatprep.subr.bf16.mxu1 %v1453_v38  ;;  %v1424_v38 = vunpack.c.l.s8.bf16 %v1008_v18  ;;  %v1485_v41 = vunpack.c.h.s8.bf16 %v1037_v36  ;;  %v1481_v51 = vunpack.c.l.s8.bf16 %v1037_v36 }
 0x2c6   : > { %v1876_v53 = vpop.f32.mrf.mxu0  ;;  %2121 = vmatmul.mubr.bf16.vlgmr.msra.gmra.mxu0 %v5188_v27 }
 0x2c7   : > { %v1917_v54 = vpop.f32.mrf.mxu1  ;;  %2162 = vmatmul.mubr.bf16.vlgmr.msra.gmra.mxu1 %v5192_v28  ;;  %v1877_v31 = vadd.f32 %v1876_v53, %v5353_v62  ;;  %2171 = vmatpush1.bf16.msra.mxu0 %v1388_v42  ;;  %v1004_v42 = vld [vmem:[%s5042_s2 + $0x4f0] sm:$0xff]  ;;  %v1001_v53 = vld [vmem:[%s5042_s2 + $0x4d8] sm:$0xff] }
 0x2c8   : > { %2212 = vmatpush1.bf16.msra.mxu1 %v1452_v43  ;;  %v1878_v58 = vpop.f32.mrf.mxu0  ;;  %2172 = vmatprep.subr.bf16.mxu0 %v1385_v44  ;;  %v1036_v43 = vld [vmem:[%s5042_s2 + $0x5f0] sm:$0xff]  ;;  %v1420_v44 = vunpack.c.h.s8.bf16 %v1004_v42  ;;  %v1409_v48 = vunpack.c.l.s8.bf16 %v1001_v53 }
 0x2c9   : > { %v1919_v59 = vpop.f32.mrf.mxu1  ;;  %2213 = vmatprep.subr.bf16.mxu1 %v1449_v45  ;;  %v5395_v21 = vadd.f32 %v1917_v54, %v1877_v31  ;;  %v1879_v27 = vadd.f32 %v1878_v58, %v5358_v37  ;;  %2202 = vmatprep.mubr.bf16.mxu0 %v5202_v50  ;;  %v1377_v37 = vunpack.c.l.s8.bf16 %v985_v46  ;;  %v981_v50 = vld [vmem:[%s5042_s2 + $0x438] sm:$0xff]  ;;  %v1484_v45 = vunpack.c.h.s8.bf16 %v1036_v43 }
 0x2ca   : > { %2243 = vmatprep.mubr.bf16.mxu1 %v5206_v39  ;;  %v1880_v28 = vpop.f32.mrf.mxu0  ;;  %v1376_v39 = vunpack.c.l.s8.bf16 %v984_v47  ;;  %v1373_v56 = vunpack.c.h.s8.bf16 %v981_v50  ;;  %v1369_v9 = vunpack.c.l.s8.bf16 %v981_v50  ;;  %v1417_v46 = vunpack.c.l.s8.bf16 %v1005_v35  ;;  %v1033_v54 = vld [vmem:[%s5042_s2 + $0x5d8] sm:$0xff] }
 0x2cb   : > { %v1921_v62 = vpop.f32.mrf.mxu1  ;;  %v5400_v40 = vadd.f32 %v1919_v59, %v1879_v27  ;;  %2173 = vmatpush1.bf16.msra.mxu0 %v1384_v55  ;;  %v1416_v31 = vunpack.c.l.s8.bf16 %v1004_v42  ;;  %v1480_v55 = vunpack.c.l.s8.bf16 %v1036_v43  ;;  %v1477_v58 = vunpack.c.h.s8.bf16 %v1033_v54  ;;  %v1000_v59 = vld [vmem:[%s5042_s2 + $0x4d0] sm:$0xff]  ;;  %v997_v28 = vld [vmem:[%s5042_s2 + $0x4b8] sm:$0xff] }
 0x2cc   : > { %2214 = vmatpush1.bf16.msra.mxu1 %v1448_v57  ;;  %v1881_v1 = vpop.f32.mrf.mxu0  ;;  %2174 = vmatprep.subr.bf16.mxu0 %v1381_v60  ;;  %v1413_v57 = vunpack.c.h.s8.bf16 %v1001_v53  ;;  %v1032_v60 = vld [vmem:[%s5042_s2 + $0x5d0] sm:$0xff]  ;;  %v1473_v27 = vunpack.c.l.s8.bf16 %v1033_v54  ;;  %v1029_v62 = vld [vmem:[%s5042_s2 + $0x5b8] sm:$0xff] }
 0x2cd   : > { %v1922_v52 = vpop.f32.mrf.mxu1  ;;  %2215 = vmatprep.subr.bf16.mxu1 %v1445_v61  ;;  %v1412_v61 = vunpack.c.h.s8.bf16 %v1000_v59  ;;  %v1476_v47 = vunpack.c.h.s8.bf16 %v1032_v60  ;;  %v1405_v1 = vunpack.c.h.s8.bf16 %v997_v28 }
 0x2ce   : > { %v1469_v52 = vunpack.c.h.s8.bf16 %v1029_v62 }
 0x2cf   : > { %2175 = vmatpush1.bf16.msra.mxu0 %v1380_v63  ;;  %v1408_v63 = vunpack.c.l.s8.bf16 %v1000_v59 }
 0x2d0   : > { %2216 = vmatpush1.bf16.msra.mxu1 %v1444_v0  ;;  %2176 = vmatprep.subr.bf16.mxu0 %v1377_v37  ;;  %v1472_v0 = vunpack.c.l.s8.bf16 %v1032_v60  ;;  %v996_v37 = vld [vmem:[%s5042_s2 + $0x4b0] sm:$0xff] }
 0x2d1   : > { %2217 = vmatprep.subr.bf16.mxu1 %v1441_v2  ;;  %v1028_v2 = vld [vmem:[%s5042_s2 + $0x5b0] sm:$0xff]  ;;  %v1404_v50 = vunpack.c.h.s8.bf16 %v996_v37  ;;  %v1400_v5 = vunpack.c.l.s8.bf16 %v996_v37 }
 0x2d2   : > { %v1468_v32 = vunpack.c.h.s8.bf16 %v1028_v2  ;;  %v1464_v6 = vunpack.c.l.s8.bf16 %v1028_v2 }
 0x2d3   : > { %2177 = vmatpush1.bf16.msra.mxu0 %v1376_v39  ;;  %v1401_v39 = vunpack.c.l.s8.bf16 %v997_v28  ;;  %v1077_v28 = vld [vmem:[%s5042_s2 + $0x738] sm:$0xff] }
 0x2d4   : > { %2218 = vmatpush1.bf16.msra.mxu1 %v1440_v3  ;;  %2178 = vmatprep.subr.bf16.mxu0 %v1373_v56  ;;  %v1465_v3 = vunpack.c.l.s8.bf16 %v1029_v62  ;;  %v993_v56 = vld [vmem:[%s5042_s2 + $0x498] sm:$0xff] }
 0x2d5   : > { %2219 = vmatprep.subr.bf16.mxu1 %v1437_v4  ;;  %v1025_v4 = vld [vmem:[%s5042_s2 + $0x598] sm:$0xff] }
 0x2d7   : > { %2179 = vmatpush1.bf16.msra.mxu0 %v1372_v7  ;;  %v1397_v7 = vunpack.c.h.s8.bf16 %v993_v56 }
 0x2d8   : > { %2220 = vmatpush1.bf16.msra.mxu1 %v1436_v8  ;;  %2180 = vmatprep.subr.bf16.mxu0 %v1369_v9  ;;  %v1461_v8 = vunpack.c.h.s8.bf16 %v1025_v4  ;;  %v992_v9 = vld [vmem:[%s5042_s2 + $0x490] sm:$0xff] }
 0x2d9   : > { %2221 = vmatprep.subr.bf16.mxu1 %v1433_v10  ;;  %v1024_v10 = vld [vmem:[%s5042_s2 + $0x590] sm:$0xff]  ;;  %v1396_v11 = vunpack.c.h.s8.bf16 %v992_v9  ;;  %v1392_v17 = vunpack.c.l.s8.bf16 %v992_v9 }
 0x2da   : > { %v1460_v12 = vunpack.c.h.s8.bf16 %v1024_v10  ;;  %v1456_v18 = vunpack.c.l.s8.bf16 %v1024_v10  ;;  %v1072_v9 = vld [vmem:[%s5042_s2 + $0x710] sm:$0xff] }
 0x2db   : > { %2181 = vmatpush1.bf16.msra.mxu0 %v1368_v13  ;;  %v1393_v13 = vunpack.c.l.s8.bf16 %v993_v56 }
 0x2dc   : > { %2222 = vmatpush1.bf16.msra.mxu1 %v1432_v14  ;;  %2182 = vmatprep.subr.bf16.mxu0 %v1365_v15  ;;  %v1457_v14 = vunpack.c.l.s8.bf16 %v1025_v4  ;;  %v1053_v15 = vld [vmem:[%s5042_s2 + $0x678] sm:$0xff] }
 0x2dd   : > { %2223 = vmatprep.subr.bf16.mxu1 %v1429_v16  ;;  %v1085_v16 = vld [vmem:[%s5042_s2 + $0x778] sm:$0xff] }
 0x2df   : > { %2183 = vmatpush1.bf16.msra.mxu0 %v1364_v25  ;;  %v1517_v25 = vunpack.c.h.s8.bf16 %v1053_v15 }
 0x2e0   : > { %2224 = vmatpush1.bf16.msra.mxu1 %v1428_v26  ;;  %2184 = vmatprep.subr.bf16.mxu0 %v1361_v29  ;;  %v1581_v26 = vunpack.c.h.s8.bf16 %v1085_v16  ;;  %v1052_v29 = vld [vmem:[%s5042_s2 + $0x670] sm:$0xff] }
 0x2e1   : > { %2225 = vmatprep.subr.bf16.mxu1 %v1425_v33  ;;  %v1084_v33 = vld [vmem:[%s5042_s2 + $0x770] sm:$0xff]  ;;  %v1516_v35 = vunpack.c.h.s8.bf16 %v1052_v29 }
 0x2e2   : > { %v1580_v36 = vunpack.c.h.s8.bf16 %v1084_v33 }
 0x2e3   : > { %2185 = vmatpush1.bf16.msra.mxu0 %v1360_v49  ;;  %v1513_v49 = vunpack.c.l.s8.bf16 %v1053_v15 }
 0x2e4   : > { %2226 = vmatpush1.bf16.msra.mxu1 %v1424_v38  ;;  %2186 = vmatprep.subr.bf16.mxu0 %v1421_v22  ;;  %v1577_v38 = vunpack.c.l.s8.bf16 %v1085_v16  ;;  %v1049_v22 = vld [vmem:[%s5042_s2 + $0x658] sm:$0xff] }
 0x2e5   : > { %2227 = vmatprep.subr.bf16.mxu1 %v1485_v41  ;;  %v1081_v41 = vld [vmem:[%s5042_s2 + $0x758] sm:$0xff]  ;;  %v1509_v54 = vunpack.c.h.s8.bf16 %v1049_v22 }
 0x2e7   : > { %2187 = vmatpush2.bf16.msra.mxu0 %v1420_v44 }
 0x2e8   : > { %2228 = vmatpush2.bf16.msra.mxu1 %v1484_v45  ;;  %2188 = vmatprep.subr.bf16.mxu0 %v1417_v46  ;;  %v1512_v45 = vunpack.c.l.s8.bf16 %v1052_v29  ;;  %v1576_v46 = vunpack.c.l.s8.bf16 %v1084_v33  ;;  %v1552_v29 = vunpack.c.l.s8.bf16 %v1072_v9  ;;  %v5466_v33 = vld [vmem:[%s5050_s9] sm:$0xf] }
 0x2e9   : > { %2229 = vmatprep.subr.bf16.mxu1 %v1481_v51 }
 0x2eb   : > { %2189 = vmatpush2.bf16.msra.mxu0 %v1416_v31  ;;  %v1573_v31 = vunpack.c.h.s8.bf16 %v1081_v41 }
 0x2ec   : > { %2230 = vmatpush2.bf16.msra.mxu1 %v1480_v55  ;;  %2190 = vmatprep.subr.bf16.mxu0 %v1413_v57  ;;  %v1048_v55 = vld [vmem:[%s5042_s2 + $0x650] sm:$0xff] }
 0x2ed   : > { %2231 = vmatprep.subr.bf16.mxu1 %v1477_v58  ;;  %v1080_v57 = vld [vmem:[%s5042_s2 + $0x750] sm:$0xff] }
 0x2ee   : > { %v1572_v59 = vunpack.c.h.s8.bf16 %v1080_v57 }
 0x2ef   : > { %2191 = vmatpush2.bf16.msra.mxu0 %v1412_v61 }
 0x2f0   : > { %2232 = vmatpush2.bf16.msra.mxu1 %v1476_v47  ;;  %2192 = vmatprep.subr.bf16.mxu0 %v1409_v48  ;;  %v1505_v47 = vunpack.c.l.s8.bf16 %v1049_v22  ;;  %v1569_v48 = vunpack.c.l.s8.bf16 %v1081_v41 }
 0x2f1   : > { %2233 = vmatprep.subr.bf16.mxu1 %v1473_v27  ;;  %v1045_v27 = vld [vmem:[%s5042_s2 + $0x638] sm:$0xff] }
 0x2f2   : > { %v1501_v62 = vunpack.c.h.s8.bf16 %v1045_v27 }
 0x2f3   : > { %2193 = vmatpush2.bf16.msra.mxu0 %v1408_v63  ;;  %v1565_v63 = vunpack.c.h.s8.bf16 %v1077_v28 }
 0x2f4   : > { %2234 = vmatpush2.bf16.msra.mxu1 %v1472_v0  ;;  %2194 = vmatprep.subr.bf16.mxu0 %v1405_v1  ;;  %v1044_v0 = vld [vmem:[%s5042_s2 + $0x630] sm:$0xff] }
 0x2f5   : > { %2235 = vmatprep.subr.bf16.mxu1 %v1469_v52  ;;  %v1076_v1 = vld [vmem:[%s5042_s2 + $0x730] sm:$0xff]  ;;  %v2336_v52 = vlaneseq  ;;  %v1500_v37 = vunpack.c.h.s8.bf16 %v1044_v0  ;;  %v1496_v4 = vunpack.c.l.s8.bf16 %v1044_v0 }
 0x2f6   : > { %v1564_v2 = vunpack.c.h.s8.bf16 %v1076_v1  ;;  %v1092_v0 = vld [vmem:[%s5042_s2 + $0x7b0] sm:$0xff] }
 0x2f7   : > { %2195 = vmatpush2.bf16.msra.mxu0 %v1404_v50  ;;  %v1497_v50 = vunpack.c.l.s8.bf16 %v1045_v27  ;;  %v5449_v56 = vshrl.u32 %v2336_v52, 7  ;;  %v1093_v27 = vld [vmem:[%s5042_s2 + $0x7b8] sm:$0xff]  ;;  %v1596_v52 = vunpack.c.h.s8.bf16 %v1092_v0 }
 0x2f8   : > { %2236 = vmatpush2.bf16.msra.mxu1 %v1468_v32  ;;  %2196 = vmatprep.subr.bf16.mxu0 %v1401_v39  ;;  %v1561_v32 = vunpack.c.l.s8.bf16 %v1077_v28  ;;  %v1041_v39 = vld [vmem:[%s5042_s2 + $0x618] sm:$0xff] }
 0x2f9   : > { %2237 = vmatprep.subr.bf16.mxu1 %v1465_v3  ;;  %v1073_v3 = vld [vmem:[%s5042_s2 + $0x718] sm:$0xff]  ;;  %v1489_v15 = vunpack.c.l.s8.bf16 %v1041_v39 }
 0x2fa   : > { %v1553_v16 = vunpack.c.l.s8.bf16 %v1073_v3 }
 0x2fb   : > { %2197 = vmatpush2.bf16.msra.mxu0 %v1400_v5  ;;  %v1560_v5 = vunpack.c.l.s8.bf16 %v1076_v1 }
 0x2fc   : > { %2238 = vmatpush2.bf16.msra.mxu1 %v1464_v6  ;;  %2198 = vmatprep.subr.bf16.mxu0 %v1397_v7  ;;  %v1493_v6 = vunpack.c.h.s8.bf16 %v1041_v39  ;;  %v1557_v7 = vunpack.c.h.s8.bf16 %v1073_v3  ;;  %v1592_v3 = vunpack.c.l.s8.bf16 %v1092_v0 }
 0x2fd   : > { %2239 = vmatprep.subr.bf16.mxu1 %v1461_v8  ;;  %v1040_v8 = vld [vmem:[%s5042_s2 + $0x610] sm:$0xff] }
 0x2ff   : > { %2199 = vmatpush2.bf16.msra.mxu0 %v1396_v11  ;;  %v5455_v11 = vsub.s32 1, %v5449_v56 }
 0x300   : > { %2240 = vmatpush2.bf16.msra.mxu1 %v1460_v12  ;;  %2200 = vmatprep.subr.bf16.mxu0 %v1393_v13  ;;  %v1492_v12 = vunpack.c.h.s8.bf16 %v1040_v8  ;;  %v1556_v13 = vunpack.c.h.s8.bf16 %v1072_v9 }
 0x301   : > { %2241 = vmatprep.subr.bf16.mxu1 %v1457_v14  ;;  %v5458_v14 = vld [vmem:[%s5048_s18] sm:$0xf]  ;;  %v2369_v41 = vrot.slane %v5466_v33, %v5455_v11 }
 0x303   : > { %2201 = vmatpush2.bf16.msra.mxu0 %v1392_v17 }
 0x304   : > { %2242 = vmatpush2.bf16.msra.mxu1 %v1456_v18  ;;  %2252 = vmatprep.subr.bf16.mxu0 %v1517_v25  ;;  %v1069_v18 = vld [vmem:[%s5042_s2 + $0x6f8] sm:$0xff] }
 0x305   : > { %2293 = vmatprep.subr.bf16.mxu1 %v1581_v26  ;;  %v1101_v25 = vld [vmem:[%s5042_s2 + $0x7f8] sm:$0xff]  ;;  %v1488_v26 = vunpack.c.l.s8.bf16 %v1040_v8 }
 0x306   : > { %v1958_v42 = vpop.f32.mrf.mxu0  ;;  %2203 = vmatmul.mubr.bf16.vlgmr.msra.gmra.mxu0 %v5244_v19 }
 0x307   : > { %v1999_v43 = vpop.f32.mrf.mxu1  ;;  %2244 = vmatmul.mubr.bf16.vlgmr.msra.gmra.mxu1 %v5248_v20  ;;  %v1959_v44 = vadd.f32 %v1958_v42, %v5395_v21  ;;  %2253 = vmatpush1.bf16.msra.mxu0 %v1516_v35  ;;  %v1508_v21 = vunpack.c.h.s8.bf16 %v1048_v55  ;;  %v1549_v35 = vunpack.c.h.s8.bf16 %v1069_v18 }
 0x308   : > { %2294 = vmatpush1.bf16.msra.mxu1 %v1580_v36  ;;  %v1960_v51 = vpop.f32.mrf.mxu0  ;;  %2254 = vmatprep.subr.bf16.mxu0 %v1513_v49  ;;  %v1613_v36 = vunpack.c.h.s8.bf16 %v1101_v25  ;;  %v1068_v49 = vld [vmem:[%s5042_s2 + $0x6f0] sm:$0xff] }
 0x309   : > { %v5435_v53 = vpop.f32.mrf.mxu1  ;;  %2295 = vmatprep.subr.bf16.mxu1 %v1577_v38  ;;  %v5439_v58 = vadd.f32 %v1999_v43, %v1959_v44  ;;  %2284 = vmatprep.mubr.bf16.mxu0 %v5258_v30  ;;  %v1504_v30 = vunpack.c.l.s8.bf16 %v1048_v55  ;;  %v1961_v10 = vadd.f32 %v1960_v51, %v5400_v40  ;;  %v2343_v40 = vrot.slane %v5458_v14, %v5455_v11  ;;  %v1100_v38 = vld [vmem:[%s5042_s2 + $0x7f0] sm:$0xff]  ;;  %v1065_v51 = vld [vmem:[%s5042_s2 + $0x6d8] sm:$0xff] }
 0x30a   : > { %2325 = vmatprep.mubr.bf16.mxu1 %v5262_v34  ;;  %v1962_v19 = vpop.f32.mrf.mxu0  ;;  %v1568_v34 = vunpack.c.l.s8.bf16 %v1080_v57  ;;  %v1548_v42 = vunpack.c.h.s8.bf16 %v1068_v49  ;;  %v1612_v43 = vunpack.c.h.s8.bf16 %v1100_v38  ;;  %v1545_v44 = vunpack.c.l.s8.bf16 %v1069_v18 }
 0x30b   : > { %v2003_v20 = vpop.f32.mrf.mxu1  ;;  %2255 = vmatpush1.bf16.msra.mxu0 %v1512_v45  ;;  %v2002_v17 = vadd.f32 %v5435_v53, %v1961_v10  ;;  %v1609_v45 = vunpack.c.l.s8.bf16 %v1101_v25  ;;  %v1097_v53 = vld [vmem:[%s5042_s2 + $0x7d8] sm:$0xff]  ;;  %v1541_v55 = vunpack.c.h.s8.bf16 %v1065_v51  ;;  %v1064_v19 = vld [vmem:[%s5042_s2 + $0x6d0] sm:$0xff] }
 0x30c   : > { %2296 = vmatpush1.bf16.msra.mxu1 %v1576_v46  ;;  %v1963_v60 = vpop.f32.mrf.mxu0  ;;  %2256 = vmatprep.subr.bf16.mxu0 %v1509_v54  ;;  %v1544_v54 = vunpack.c.l.s8.bf16 %v1068_v49  ;;  %v1605_v57 = vunpack.c.h.s8.bf16 %v1097_v53  ;;  %v1096_v20 = vld [vmem:[%s5042_s2 + $0x7d0] sm:$0xff]  ;;  %v1536_v28 = vunpack.c.l.s8.bf16 %v1064_v19 }
 0x30d   : > { %v2004_v61 = vpop.f32.mrf.mxu1  ;;  %2297 = vmatprep.subr.bf16.mxu1 %v1573_v31  ;;  %v2357_v22 = vmul.f32 %v2343_v40, %v2002_v17  ;;  %v1608_v31 = vunpack.c.l.s8.bf16 %v1100_v38  ;;  %v1604_v60 = vunpack.c.h.s8.bf16 %v1096_v20  ;;  %v2423_v38 = vld [vmem:[%s5056_s12 + $0x48] sm:$0xff] }
 0x30e   : > { %v1537_v61 = vunpack.c.l.s8.bf16 %v1065_v51  ;;  %v2422_v51 = vld [vmem:[%s5056_s12 + $0x40] sm:$0xff] }
 0x30f   : > { %2257 = vmatpush1.bf16.msra.mxu0 %v1508_v21  ;;  %v5472_v46 = vadd.f32 %v2369_v41, %v2357_v22 }
 0x310   : > { %2298 = vmatpush1.bf16.msra.mxu1 %v1572_v59  ;;  %2258 = vmatprep.subr.bf16.mxu0 %v1505_v47  ;;  %v1540_v59 = vunpack.c.h.s8.bf16 %v1064_v19  ;;  %v1601_v47 = vunpack.c.l.s8.bf16 %v1097_v53  ;;  %v2459_v19 = vld [vmem:[%s5056_s12 + $0x168] sm:$0xff] }
 0x311   : > { %2299 = vmatprep.subr.bf16.mxu1 %v1569_v48  ;;  %v2391_v21 = vmul.f32 0.70710677, %v5472_v46  ;;  %v1061_v48 = vld [vmem:[%s5042_s2 + $0x6b8] sm:$0xff]  ;;  %v2387_v18 = vmul.f32 0.5, %v5472_v46  ;;  %v2499_v46 = vunpack.c.h.s8.bf16 %v2423_v38 }
 0x313   : > { %2259 = vmatpush1.bf16.msra.mxu0 %v1504_v30  ;;  %4122 = verf.f32 %v2391_v21  ;;  %v1600_v30 = vunpack.c.l.s8.bf16 %v1096_v20  ;;  %v2458_v20 = vld [vmem:[%s5056_s12 + $0x160] sm:$0xff]  ;;  %v2419_v21 = vld [vmem:[%s5056_s12 + $0x28] sm:$0xff] }
 0x314   : > { %2300 = vmatpush1.bf16.msra.mxu1 %v1568_v34  ;;  %2260 = vmatprep.subr.bf16.mxu0 %v1501_v62  ;;  %v1533_v34 = vunpack.c.h.s8.bf16 %v1061_v48  ;;  %v1597_v62 = vunpack.c.h.s8.bf16 %v1093_v27  ;;  %v2487_v0 = vunpack.c.l.s8.bf16 %v2419_v21 }
 0x315   : > { %2301 = vmatprep.subr.bf16.mxu1 %v1565_v63  ;;  %v1060_v63 = vld [vmem:[%s5042_s2 + $0x6b0] sm:$0xff] }
 0x316   : > { %v1532_v1 = vunpack.c.h.s8.bf16 %v1060_v63  ;;  %v1528_v39 = vunpack.c.l.s8.bf16 %v1060_v63 }
 0x317   : > { %2261 = vmatpush1.bf16.msra.mxu0 %v1500_v37  ;;  %v1529_v37 = vunpack.c.l.s8.bf16 %v1061_v48  ;;  %v2494_v48 = vunpack.c.l.s8.bf16 %v2422_v51 }
 0x318   : > { %2302 = vmatpush1.bf16.msra.mxu1 %v1564_v2  ;;  %2262 = vmatprep.subr.bf16.mxu0 %v1497_v50  ;;  %v1593_v2 = vunpack.c.l.s8.bf16 %v1093_v27  ;;  %v1057_v50 = vld [vmem:[%s5042_s2 + $0x698] sm:$0xff]  ;;  %v2491_v27 = vunpack.c.h.s8.bf16 %v2419_v21 }
 0x319   : > { %2303 = vmatprep.subr.bf16.mxu1 %v1561_v32  ;;  %v1089_v32 = vld [vmem:[%s5042_s2 + $0x798] sm:$0xff] }
 0x31b   : > { %2263 = vmatpush1.bf16.msra.mxu0 %v1496_v4  ;;  %v1525_v4 = vunpack.c.h.s8.bf16 %v1057_v50 }
 0x31c   : > { %2304 = vmatpush1.bf16.msra.mxu1 %v1560_v5  ;;  %2264 = vmatprep.subr.bf16.mxu0 %v1493_v6  ;;  %v1589_v5 = vunpack.c.h.s8.bf16 %v1089_v32  ;;  %v1056_v6 = vld [vmem:[%s5042_s2 + $0x690] sm:$0xff] }
 0x31d   : > { %2305 = vmatprep.subr.bf16.mxu1 %v1557_v7  ;;  %v1088_v7 = vld [vmem:[%s5042_s2 + $0x790] sm:$0xff]  ;;  %v1524_v9 = vunpack.c.h.s8.bf16 %v1056_v6  ;;  %v1520_v17 = vunpack.c.l.s8.bf16 %v1056_v6 }
 0x31e   : > { %v1588_v10 = vunpack.c.h.s8.bf16 %v1088_v7  ;;  %v1584_v40 = vunpack.c.l.s8.bf16 %v1088_v7  ;;  %v2450_v6 = vld [vmem:[%s5056_s12 + $0x120] sm:$0xff] }
 0x31f   : > { %2265 = vmatpush1.bf16.msra.mxu0 %v1492_v12  ;;  %v1521_v12 = vunpack.c.l.s8.bf16 %v1057_v50 }
 0x320   : > { %2306 = vmatpush1.bf16.msra.mxu1 %v1556_v13  ;;  %2266 = vmatprep.subr.bf16.mxu0 %v1489_v15  ;;  %v4123_v8 = vpop.eup %4122  ;;  %v1585_v13 = vunpack.c.l.s8.bf16 %v1089_v32  ;;  %v2427_v15 = vld [vmem:[%s5056_s12 + $0x68] sm:$0xff]  ;;  %v5510_v32 = vsub.s32 0, %v5449_v56 }
 0x321   : > { %2307 = vmatprep.subr.bf16.mxu1 %v1553_v16  ;;  %v2399_v16 = vadd.f32 1.0, %v4123_v8  ;;  %v2507_v25 = vunpack.c.h.s8.bf16 %v2427_v15 }
 0x322   : > { %v2339_v8 = vrot.slane %v5458_v14, %v5510_v32 }
 0x323   : > { %2267 = vmatpush1.bf16.msra.mxu0 %v1488_v26  ;;  %v2426_v26 = vld [vmem:[%s5056_s12 + $0x60] sm:$0xff] }
 0x324   : > { %2308 = vmatpush1.bf16.msra.mxu1 %v1552_v29  ;;  %2268 = vmatprep.subr.bf16.mxu0 %v1549_v35  ;;  %v2403_v29 = vmul.f32 %v2399_v16, %v2387_v18  ;;  %v2506_v35 = vunpack.c.h.s8.bf16 %v2426_v26 }
 0x325   : > { %2309 = vmatprep.subr.bf16.mxu1 %v1613_v36  ;;  %v2503_v36 = vunpack.c.l.s8.bf16 %v2427_v15  ;;  %v2447_v15 = vld [vmem:[%s5056_s12 + $0x108] sm:$0xff] }
 0x326   : > { %v5490_v49 = vpack.c.bf16 %v2403_v29, %v2403_v29  ;;  %v2547_v29 = vunpack.c.h.s8.bf16 %v2447_v15 }
 0x327   : > { %2269 = vmatpush2.bf16.msra.mxu0 %v1548_v42 }
 0x328   : > { %2310 = vmatpush2.bf16.msra.mxu1 %v1612_v43  ;;  %2270 = vmatprep.subr.bf16.mxu0 %v1545_v44  ;;  %v2502_v43 = vunpack.c.l.s8.bf16 %v2426_v26  ;;  %v2550_v26 = vunpack.c.l.s8.bf16 %v2450_v6 }
 0x329   : > { %2311 = vmatprep.subr.bf16.mxu1 %v1609_v45 }
 0x32b   : > { %2271 = vmatpush2.bf16.msra.mxu0 %v1544_v54 }
 0x32c   : > { %2312 = vmatpush2.bf16.msra.mxu1 %v1608_v31  ;;  %2272 = vmatprep.subr.bf16.mxu0 %v1541_v55 }
 0x32d   : > { %2313 = vmatprep.subr.bf16.mxu1 %v1605_v57  ;;  %v2495_v57 = vunpack.c.l.s8.bf16 %v2423_v38 }
 0x32f   : > { %2273 = vmatpush2.bf16.msra.mxu0 %v1540_v59  ;;  %v2571_v59 = vunpack.c.h.s8.bf16 %v2459_v19 }
 0x330   : > { %2314 = vmatpush2.bf16.msra.mxu1 %v1604_v60  ;;  %2274 = vmatprep.subr.bf16.mxu0 %v1537_v61  ;;  %v2570_v60 = vunpack.c.h.s8.bf16 %v2458_v20  ;;  %v2567_v61 = vunpack.c.l.s8.bf16 %v2459_v19  ;;  %v2434_v19 = vld [vmem:[%s5056_s12 + $0xa0] sm:$0xff] }
 0x331   : > { %2315 = vmatprep.subr.bf16.mxu1 %v1601_v47  ;;  %v2455_v47 = vld [vmem:[%s5056_s12 + $0x148] sm:$0xff] }
 0x333   : > { %2275 = vmatpush2.bf16.msra.mxu0 %v1536_v28  ;;  %v2418_v28 = vld [vmem:[%s5056_s12 + $0x20] sm:$0xff] }
 0x334   : > { %2316 = vmatpush2.bf16.msra.mxu1 %v1600_v30  ;;  %2276 = vmatprep.subr.bf16.mxu0 %v1533_v34  ;;  %v2566_v30 = vunpack.c.l.s8.bf16 %v2458_v20  ;;  %v2563_v34 = vunpack.c.h.s8.bf16 %v2455_v47  ;;  %v2490_v63 = vunpack.c.h.s8.bf16 %v2418_v28  ;;  %v2486_v50 = vunpack.c.l.s8.bf16 %v2418_v28 }
 0x335   : > { %2317 = vmatprep.subr.bf16.mxu1 %v1597_v62  ;;  %v2454_v62 = vld [vmem:[%s5056_s12 + $0x140] sm:$0xff]  ;;  %v2522_v20 = vunpack.c.h.s8.bf16 %v2434_v19 }
 0x337   : > { %2277 = vmatpush2.bf16.msra.mxu0 %v1532_v1  ;;  %v2562_v1 = vunpack.c.h.s8.bf16 %v2454_v62 }
 0x338   : > { %2318 = vmatpush2.bf16.msra.mxu1 %v1596_v52  ;;  %2278 = vmatprep.subr.bf16.mxu0 %v1529_v37  ;;  %v2415_v52 = vld [vmem:[%s5056_s12 + $0x8] sm:$0xff]  ;;  %v2559_v37 = vunpack.c.l.s8.bf16 %v2455_v47  ;;  %v2430_v47 = vld [vmem:[%s5056_s12 + $0x80] sm:$0xff] }
 0x339   : > { %2319 = vmatprep.subr.bf16.mxu1 %v1593_v2  ;;  %v2451_v2 = vld [vmem:[%s5056_s12 + $0x128] sm:$0xff] }
 0x33b   : > { %2279 = vmatpush2.bf16.msra.mxu0 %v1528_v39  ;;  %v2483_v39 = vunpack.c.h.s8.bf16 %v2415_v52 }
 0x33c   : > { %2320 = vmatpush2.bf16.msra.mxu1 %v1592_v3  ;;  %2280 = vmatprep.subr.bf16.mxu0 %v1525_v4  ;;  %v2414_v3 = vld [vmem:[%s5056_s12] sm:$0xff]  ;;  %v2558_v4 = vunpack.c.l.s8.bf16 %v2454_v62 }
 0x33d   : > { %2321 = vmatprep.subr.bf16.mxu1 %v1589_v5  ;;  %v2555_v5 = vunpack.c.h.s8.bf16 %v2451_v2  ;;  %v2482_v7 = vunpack.c.h.s8.bf16 %v2414_v3  ;;  %v2478_v16 = vunpack.c.l.s8.bf16 %v2414_v3  ;;  %v2425_v3 = vld [vmem:[%s5056_s12 + $0x58] sm:$0xff] }
 0x33f   : > { %2281 = vmatpush2.bf16.msra.mxu0 %v1524_v9  ;;  %v2479_v9 = vunpack.c.l.s8.bf16 %v2415_v52  ;;  %v2428_v52 = vld [vmem:[%s5056_s12 + $0x70] sm:$0xff] }
 0x340   : > { %2322 = vmatpush2.bf16.msra.mxu1 %v1588_v10  ;;  %2282 = vmatprep.subr.bf16.mxu0 %v1521_v12  ;;  %v2554_v10 = vunpack.c.h.s8.bf16 %v2450_v6  ;;  %v2443_v12 = vld [vmem:[%s5056_s12 + $0xe8] sm:$0xff] }
 0x341   : > { %2323 = vmatprep.subr.bf16.mxu1 %v1585_v13  ;;  %v2551_v13 = vunpack.c.l.s8.bf16 %v2451_v2  ;;  %v2539_v18 = vunpack.c.h.s8.bf16 %v2443_v12 }
 0x343   : > { %2283 = vmatpush2.bf16.msra.mxu0 %v1520_v17  ;;  %v2356_v17 = vmul.f32 %v2339_v8, %v5439_v58 }
 0x344   : > { %2324 = vmatpush2.bf16.msra.mxu1 %v1584_v40  ;;  %2606 = vmatprep.subr.bf16.mxu0 %v2507_v25  ;;  %v2365_v40 = vrot.slane %v5466_v33, %v5510_v32  ;;  %v2442_v25 = vld [vmem:[%s5056_s12 + $0xe0] sm:$0xff] }
 0x345   : > { %2647 = vmatprep.subr.bf16.mxu1 %v2571_v59  ;;  %v2431_v59 = vld [vmem:[%s5056_s12 + $0x88] sm:$0xff] }
 0x346   : > { %v2040_v22 = vpop.f32.mrf.mxu0  ;;  %2285 = vmatmul.mubr.bf16.vlgmr.msra.gmra.mxu0 %v5300_v23  ;;  %v2382_v38 = vadd.f32 %v2365_v40, %v2356_v17  ;;  %v2511_v28 = vunpack.c.l.s8.bf16 %v2431_v59 }
 0x347   : > { %v2081_v41 = vpop.f32.mrf.mxu1  ;;  %2326 = vmatmul.mubr.bf16.vlgmr.msra.gmra.mxu1 %v5304_v24  ;;  %2607 = vmatpush1.bf16.msra.mxu0 %v2506_v35  ;;  %v2498_v24 = vunpack.c.h.s8.bf16 %v2422_v51  ;;  %v2446_v35 = vld [vmem:[%s5056_s12 + $0x100] sm:$0xff] }
 0x348   : > { %v5495_v42 = vadd.f32 %v2081_v41, %v2040_v22  ;;  %2638 = vmatprep.mubr.bf16.mxu0 %v5490_v49  ;;  %v2042_v44 = vpop.f32.mrf.mxu0  ;;  %2608 = vmatprep.subr.bf16.mxu0 %v2503_v36  ;;  %v2538_v36 = vunpack.c.h.s8.bf16 %v2442_v25  ;;  %v2535_v22 = vunpack.c.l.s8.bf16 %v2443_v12  ;;  %v2546_v58 = vunpack.c.h.s8.bf16 %v2446_v35  ;;  %v2439_v41 = vld [vmem:[%s5056_s12 + $0xc8] sm:$0xff]  ;;  %v2438_v51 = vld [vmem:[%s5056_s12 + $0xc0] sm:$0xff] }
 0x349   : > { %v2083_v45 = vpop.f32.mrf.mxu1  ;;  %2648 = vmatpush1.bf16.msra.mxu1 %v2570_v60  ;;  %v2518_v60 = vunpack.c.l.s8.bf16 %v2434_v19  ;;  %v2386_v62 = vmul.f32 0.5, %v2382_v38  ;;  %v2417_v19 = vld [vmem:[%s5056_s12 + $0x18] sm:$0xff] }
 0x34a   : > { %v5499_v53 = vadd.f32 %v2083_v45, %v2042_v44  ;;  %v2044_v23 = vpop.f32.mrf.mxu0  ;;  %2649 = vmatprep.subr.bf16.mxu1 %v2567_v61  ;;  %v2534_v44 = vunpack.c.l.s8.bf16 %v2442_v25  ;;  %v2390_v45 = vmul.f32 0.70710677, %v2382_v38  ;;  %v2515_v61 = vunpack.c.h.s8.bf16 %v2431_v59 }
 0x34b   : > { %v2085_v54 = vpop.f32.mrf.mxu1  ;;  %2609 = vmatpush1.bf16.msra.mxu0 %v2502_v43  ;;  %v2543_v43 = vunpack.c.l.s8.bf16 %v2447_v15  ;;  %v2542_v23 = vunpack.c.l.s8.bf16 %v2446_v35  ;;  %v2501_v15 = vunpack.c.h.s8.bf16 %v2425_v3  ;;  %v2497_v38 = vunpack.c.l.s8.bf16 %v2425_v3 }
 0x34c   : > { %v2045_v31 = vpop.f32.mrf.mxu0  ;;  %2610 = vmatprep.subr.bf16.mxu0 %v2499_v46  ;;  %v2531_v46 = vunpack.c.h.s8.bf16 %v2439_v41  ;;  %v2530_v54 = vunpack.c.h.s8.bf16 %v2438_v51  ;;  %4124 = verf.f32 %v2390_v45 }
 0x34d   : > { %v2086_v55 = vpop.f32.mrf.mxu1  ;;  %2650 = vmatpush1.bf16.msra.mxu1 %v2566_v30  ;;  %v2435_v31 = vld [vmem:[%s5056_s12 + $0xa8] sm:$0xff] }
 0x34e   : > { %2651 = vmatprep.subr.bf16.mxu1 %v2563_v34  ;;  %v2526_v55 = vunpack.c.l.s8.bf16 %v2438_v51  ;;  %v2519_v21 = vunpack.c.l.s8.bf16 %v2435_v31  ;;  %v2429_v34 = vld [vmem:[%s5056_s12 + $0x78] sm:$0xff] }
 0x34f   : > { %2611 = vmatpush1.bf16.msra.mxu0 %v2498_v24  ;;  %v2527_v24 = vunpack.c.l.s8.bf16 %v2439_v41  ;;  %v2470_v41 = vld [vmem:[%s5056_s12 + $0x1c0] sm:$0xff] }
 0x350   : > { %2612 = vmatprep.subr.bf16.mxu0 %v2495_v57  ;;  %v2523_v57 = vunpack.c.h.s8.bf16 %v2435_v31  ;;  %v2466_v31 = vld [vmem:[%s5056_s12 + $0x1a0] sm:$0xff] }
 0x351   : > { %2652 = vmatpush1.bf16.msra.mxu1 %v2562_v1  ;;  %v2509_v1 = vunpack.c.h.s8.bf16 %v2429_v34 }
 0x352   : > { %2653 = vmatprep.subr.bf16.mxu1 %v2559_v37  ;;  %v2508_v37 = vunpack.c.h.s8.bf16 %v2428_v52 }
 0x353   : > { %2613 = vmatpush1.bf16.msra.mxu0 %v2494_v48 }
 0x354   : > { %2614 = vmatprep.subr.bf16.mxu0 %v2491_v27  ;;  %v2514_v27 = vunpack.c.h.s8.bf16 %v2430_v47 }
 0x355   : > { %2654 = vmatpush1.bf16.msra.mxu1 %v2558_v4 }
 0x356   : > { %2655 = vmatprep.subr.bf16.mxu1 %v2555_v5  ;;  %v2474_v5 = vld [vmem:[%s5056_s12 + $0x1e0] sm:$0xff] }
 0x357   : > { %2615 = vmatpush1.bf16.msra.mxu0 %v2490_v63  ;;  %v2510_v63 = vunpack.c.l.s8.bf16 %v2430_v47  ;;  %v2602_v8 = vunpack.c.h.s8.bf16 %v2474_v5  ;;  %v2416_v47 = vld [vmem:[%s5056_s12 + $0x10] sm:$0xff] }
 0x358   : > { %2616 = vmatprep.subr.bf16.mxu0 %v2487_v0 }
 0x359   : > { %2656 = vmatpush1.bf16.msra.mxu1 %v2554_v10  ;;  %v4125_v48 = vpop.eup %4124  ;;  %v2504_v10 = vunpack.c.l.s8.bf16 %v2428_v52 }
 0x35a   : > { %2657 = vmatprep.subr.bf16.mxu1 %v2551_v13  ;;  %v2398_v30 = vadd.f32 1.0, %v4125_v48  ;;  %v2582_v48 = vunpack.c.l.s8.bf16 %v2466_v31 }
 0x35b   : > { %2617 = vmatpush1.bf16.msra.mxu0 %v2486_v50  ;;  %v2505_v50 = vunpack.c.l.s8.bf16 %v2429_v34  ;;  %v2481_v34 = vunpack.c.l.s8.bf16 %v2417_v19 }
 0x35c   : > { %2618 = vmatprep.subr.bf16.mxu0 %v2483_v39  ;;  %v2402_v0 = vmul.f32 %v2398_v30, %v2386_v62  ;;  %v2475_v39 = vld [vmem:[%s5056_s12 + $0x1e8] sm:$0xff]  ;;  %v2484_v30 = vunpack.c.h.s8.bf16 %v2416_v47  ;;  %v2445_v62 = vld [vmem:[%s5056_s12 + $0xf8] sm:$0xff] }
 0x35d   : > { %2658 = vmatpush1.bf16.msra.mxu1 %v2550_v26  ;;  %v2603_v4 = vunpack.c.h.s8.bf16 %v2475_v39  ;;  %v2599_v25 = vunpack.c.l.s8.bf16 %v2475_v39  ;;  %v2598_v26 = vunpack.c.l.s8.bf16 %v2474_v5  ;;  %v2541_v52 = vunpack.c.h.s8.bf16 %v2445_v62  ;;  %v2441_v5 = vld [vmem:[%s5056_s12 + $0xd8] sm:$0xff] }
 0x35e   : > { %2659 = vmatprep.subr.bf16.mxu1 %v2547_v29  ;;  %v5531_v2 = vpack.c.bf16 %v2402_v0, %v2402_v0  ;;  %v2537_v3 = vunpack.c.l.s8.bf16 %v2445_v62 }
 0x35f   : > { %2619 = vmatpush1.bf16.msra.mxu0 %v2482_v7 }
 0x360   : > { %2620 = vmatprep.subr.bf16.mxu0 %v2479_v9 }
 0x361   : > { %2660 = vmatpush1.bf16.msra.mxu1 %v2546_v58  ;;  %v2421_v58 = vld [vmem:[%s5056_s12 + $0x38] sm:$0xff] }
 0x362   : > { %2661 = vmatprep.subr.bf16.mxu1 %v2543_v43  ;;  %v2594_v43 = vunpack.c.h.s8.bf16 %v2470_v41  ;;  %v2493_v45 = vunpack.c.h.s8.bf16 %v2421_v58 }
 0x363   : > { %2621 = vmatpush1.bf16.msra.mxu0 %v2478_v16  ;;  %v2424_v16 = vld [vmem:[%s5056_s12 + $0x50] sm:$0xff] }
 0x364   : > { %2622 = vmatprep.subr.bf16.mxu0 %v2539_v18  ;;  %v2500_v29 = vunpack.c.h.s8.bf16 %v2424_v16 }
 0x365   : > { %2662 = vmatpush1.bf16.msra.mxu1 %v2542_v23  ;;  %v2590_v23 = vunpack.c.l.s8.bf16 %v2470_v41 }
 0x366   : > { %2663 = vmatprep.subr.bf16.mxu1 %v2603_v4  ;;  %v5558_v4 = vld [vmem:[%s5056_s12 + $0x178] sm:$0xff] }
 0x367   : > { %2623 = vmatpush2.bf16.msra.mxu0 %v2538_v36 }
 0x368   : > { %2624 = vmatprep.subr.bf16.mxu0 %v2535_v22  ;;  %v2471_v22 = vld [vmem:[%s5056_s12 + $0x1c8] sm:$0xff] }
 0x369   : > { %2664 = vmatpush2.bf16.msra.mxu1 %v2602_v8  ;;  %v2591_v51 = vunpack.c.l.s8.bf16 %v2471_v22  ;;  %v2533_v8 = vunpack.c.h.s8.bf16 %v2441_v5 }
 0x36a   : > { %2665 = vmatprep.subr.bf16.mxu1 %v2599_v25  ;;  %v2433_v25 = vld [vmem:[%s5056_s12 + $0x98] sm:$0xff] }
 0x36b   : > { %2625 = vmatpush2.bf16.msra.mxu0 %v2534_v44  ;;  %v2496_v44 = vunpack.c.l.s8.bf16 %v2424_v16 }
 0x36c   : > { %2626 = vmatprep.subr.bf16.mxu0 %v2531_v46  ;;  %v2420_v46 = vld [vmem:[%s5056_s12 + $0x30] sm:$0xff] }
 0x36d   : > { %2666 = vmatpush2.bf16.msra.mxu1 %v2598_v26  ;;  %v2488_v59 = vunpack.c.l.s8.bf16 %v2420_v46 }
 0x36f   : > { %2627 = vmatpush2.bf16.msra.mxu0 %v2530_v54  ;;  %v2492_v54 = vunpack.c.h.s8.bf16 %v2420_v46 }
 0x370   : > { %2628 = vmatprep.subr.bf16.mxu0 %v2527_v24  ;;  %v2467_v24 = vld [vmem:[%s5056_s12 + $0x1a8] sm:$0xff] }
 0x373   : > { %2629 = vmatpush2.bf16.msra.mxu0 %v2526_v55  ;;  %v2489_v55 = vunpack.c.l.s8.bf16 %v2421_v58 }
 0x374   : > { %2630 = vmatprep.subr.bf16.mxu0 %v2523_v57  ;;  %v2587_v57 = vunpack.c.h.s8.bf16 %v2467_v24 }
 0x377   : > { %2631 = vmatpush2.bf16.msra.mxu0 %v2522_v20  ;;  %v2586_v20 = vunpack.c.h.s8.bf16 %v2466_v31  ;;  %v5571_v31 = vsub.s32 2, %v5449_v56 }
 0x378   : > { %2632 = vmatprep.subr.bf16.mxu0 %v2519_v21  ;;  %v2583_v21 = vunpack.c.l.s8.bf16 %v2467_v24 }
 0x37b   : > { %2633 = vmatpush2.bf16.msra.mxu0 %v2518_v60  ;;  %v2463_v60 = vld [vmem:[%s5056_s12 + $0x188] sm:$0xff] }
 0x37c   : > { %2634 = vmatprep.subr.bf16.mxu0 %v2515_v61  ;;  %v2485_v61 = vunpack.c.h.s8.bf16 %v2417_v19  ;;  %v2575_v0 = vunpack.c.l.s8.bf16 %v2463_v60 }
 0x37f   : > { %2635 = vmatpush2.bf16.msra.mxu0 %v2514_v27  ;;  %v2579_v27 = vunpack.c.h.s8.bf16 %v2463_v60 }
 0x380   : > { %2636 = vmatprep.subr.bf16.mxu0 %v2511_v28  ;;  %v2462_v28 = vld [vmem:[%s5056_s12 + $0x180] sm:$0xff] }
 0x383   : > { %2637 = vmatpush2.bf16.msra.mxu0 %v2510_v63  ;;  %v2578_v63 = vunpack.c.h.s8.bf16 %v2462_v28 }
 0x384   : > { %2688 = vmatprep.subr.bf16.mxu0 %v2509_v1  ;;  %v2480_v1 = vunpack.c.l.s8.bf16 %v2416_v47 }
 0x386   : > { %v2122_v6 = vpop.f32.mrf.mxu0  ;;  %2639 = vmatmul.mubr.bf16.vlgmr.msra.gmra.mxu0 %v5531_v2 }
 0x387   : > { %v2163_v7 = vpop.f32.mrf.mxu1  ;;  %v2123_v9 = vadd.f32 %v2122_v6, %v5495_v42  ;;  %2689 = vmatpush1.bf16.msra.mxu0 %v2508_v37  ;;  %2720 = vmatprep.mubr.bf16.mxu0 %v5490_v49  ;;  %v2444_v37 = vld [vmem:[%s5056_s12 + $0xf0] sm:$0xff]  ;;  %v2573_v6 = vunpack.c.h.s8.bf16 %v5558_v4 }
 0x388   : > { %v2124_v12 = vpop.f32.mrf.mxu0  ;;  %2690 = vmatprep.subr.bf16.mxu0 %v2505_v50  ;;  %v2574_v50 = vunpack.c.l.s8.bf16 %v2462_v28  ;;  %v2540_v39 = vunpack.c.h.s8.bf16 %v2444_v37 }
 0x389   : > { %v2165_v13 = vpop.f32.mrf.mxu1  ;;  %v5540_v17 = vadd.f32 %v2163_v7, %v2123_v9  ;;  %v2125_v40 = vadd.f32 %v2124_v12, %v5499_v53  ;;  %v2595_v53 = vunpack.c.h.s8.bf16 %v2471_v22  ;;  %v2536_v7 = vunpack.c.l.s8.bf16 %v2444_v37  ;;  %v2440_v9 = vld [vmem:[%s5056_s12 + $0xd0] sm:$0xff] }
 0x38a   : > { %v2126_v18 = vpop.f32.mrf.mxu0  ;;  %v2529_v12 = vunpack.c.l.s8.bf16 %v2441_v5 }
 0x38b   : > { %v2167_v42 = vpop.f32.mrf.mxu1  ;;  %v5543_v49 = vadd.f32 %v2165_v13, %v2125_v40  ;;  %2691 = vmatpush1.bf16.msra.mxu0 %v2504_v10  ;;  %2667 = vmatprep.subr.bf16.mxu1 %v2595_v53  ;;  %v2532_v10 = vunpack.c.h.s8.bf16 %v2440_v9  ;;  %v2437_v13 = vld [vmem:[%s5056_s12 + $0xb8] sm:$0xff]  ;;  %v2436_v40 = vld [vmem:[%s5056_s12 + $0xb0] sm:$0xff] }
 0x38c   : > { %v2127_v35 = vpop.f32.mrf.mxu0  ;;  %2692 = vmatprep.subr.bf16.mxu0 %v2501_v15  ;;  %2668 = vmatpush2.bf16.msra.mxu1 %v2594_v43  ;;  %v2528_v15 = vunpack.c.l.s8.bf16 %v2440_v9  ;;  %v2525_v16 = vunpack.c.h.s8.bf16 %v2437_v13  ;;  %v2524_v18 = vunpack.c.h.s8.bf16 %v2436_v40  ;;  %v2521_v42 = vunpack.c.l.s8.bf16 %v2437_v13 }
 0x38d   : > { %v2168_v36 = vpop.f32.mrf.mxu1  ;;  %2669 = vmatprep.subr.bf16.mxu1 %v2591_v51  ;;  %v2520_v26 = vunpack.c.l.s8.bf16 %v2436_v40  ;;  %v2432_v35 = vld [vmem:[%s5056_s12 + $0x90] sm:$0xff]  ;;  %v2569_v13 = vunpack.c.l.s8.bf16 %v5558_v4 }
 0x38e   : > { %v2516_v36 = vunpack.c.h.s8.bf16 %v2432_v35  ;;  %v2512_v22 = vunpack.c.l.s8.bf16 %v2432_v35  ;;  %v2452_v35 = vld [vmem:[%s5056_s12 + $0x130] sm:$0xff] }
 0x38f   : > { %2693 = vmatpush1.bf16.msra.mxu0 %v2500_v29  ;;  %v2517_v29 = vunpack.c.h.s8.bf16 %v2433_v25 }
 0x390   : > { %2694 = vmatprep.subr.bf16.mxu0 %v2497_v38  ;;  %2670 = vmatpush2.bf16.msra.mxu1 %v2590_v23  ;;  %v2513_v38 = vunpack.c.l.s8.bf16 %v2433_v25 }
 0x391   : > { %2671 = vmatprep.subr.bf16.mxu1 %v2587_v57 }
 0x393   : > { %2695 = vmatpush1.bf16.msra.mxu0 %v2496_v44 }
 0x394   : > { %2696 = vmatprep.subr.bf16.mxu0 %v2493_v45  ;;  %2672 = vmatpush2.bf16.msra.mxu1 %v2586_v20 }
 0x395   : > { %2673 = vmatprep.subr.bf16.mxu1 %v2583_v21 }
 0x397   : > { %2697 = vmatpush1.bf16.msra.mxu0 %v2492_v54 }
 0x398   : > { %2698 = vmatprep.subr.bf16.mxu0 %v2489_v55  ;;  %2674 = vmatpush2.bf16.msra.mxu1 %v2582_v48  ;;  %v5574_v55 = vsub.s32 3, %v5449_v56 }
 0x399   : > { %2675 = vmatprep.subr.bf16.mxu1 %v2579_v27 }
 0x39a   : > { %v2351_v47 = vrot.slane %v5458_v14, %v5574_v55 }
 0x39b   : > { %2699 = vmatpush1.bf16.msra.mxu0 %v2488_v59 }
 0x39c   : > { %2700 = vmatprep.subr.bf16.mxu0 %v2485_v61  ;;  %2676 = vmatpush2.bf16.msra.mxu1 %v2578_v63  ;;  %v2373_v61 = vrot.slane %v5466_v33, %v5571_v31 }
 0x39d   : > { %2677 = vmatprep.subr.bf16.mxu1 %v2575_v0 }
 0x39f   : > { %2701 = vmatpush1.bf16.msra.mxu0 %v2484_v30  ;;  %v2377_v30 = vrot.slane %v5466_v33, %v5574_v55  ;;  %v2460_v33 = vld [vmem:[%s5056_s12 + $0x170] sm:$0xff] }
 0x3a0   : > { %2702 = vmatprep.subr.bf16.mxu0 %v2481_v34  ;;  %2678 = vmatpush2.bf16.msra.mxu1 %v2574_v50 }
 0x3a1   : > { %2729 = vmatprep.subr.bf16.mxu1 %v2573_v6 }
 0x3a3   : > { %2703 = vmatpush1.bf16.msra.mxu0 %v2480_v1 }
 0x3a4   : > { %2704 = vmatprep.subr.bf16.mxu0 %v2541_v52 }
 0x3a7   : > { %2705 = vmatpush2.bf16.msra.mxu0 %v2540_v39 }
 0x3a8   : > { %2706 = vmatprep.subr.bf16.mxu0 %v2537_v3 }
 0x3ab   : > { %2707 = vmatpush2.bf16.msra.mxu0 %v2536_v7 }
 0x3ac   : > { %2708 = vmatprep.subr.bf16.mxu0 %v2533_v8 }
 0x3af   : > { %2709 = vmatpush2.bf16.msra.mxu0 %v2532_v10  ;;  %v2572_v10 = vunpack.c.h.s8.bf16 %v2460_v33 }
 0x3b0   : > { %2710 = vmatprep.subr.bf16.mxu0 %v2529_v12 }
 0x3b3   : > { %2711 = vmatpush2.bf16.msra.mxu0 %v2528_v15  ;;  %v2457_v15 = vld [vmem:[%s5056_s12 + $0x158] sm:$0xff] }
 0x3b4   : > { %2712 = vmatprep.subr.bf16.mxu0 %v2525_v16  ;;  %v2568_v16 = vunpack.c.l.s8.bf16 %v2460_v33  ;;  %v2565_v40 = vunpack.c.h.s8.bf16 %v2457_v15  ;;  %v2561_v25 = vunpack.c.l.s8.bf16 %v2457_v15  ;;  %v2407_v33 = vld [vmem:[#allocation2] sm:$0xff] }
 0x3b7   : > { %2713 = vmatpush2.bf16.msra.mxu0 %v2524_v18  ;;  %v2456_v18 = vld [vmem:[%s5056_s12 + $0x150] sm:$0xff] }
 0x3b8   : > { %2714 = vmatprep.subr.bf16.mxu0 %v2521_v42  ;;  %v2564_v42 = vunpack.c.h.s8.bf16 %v2456_v18  ;;  %v2560_v4 = vunpack.c.l.s8.bf16 %v2456_v18 }
 0x3bb   : > { %2715 = vmatpush2.bf16.msra.mxu0 %v2520_v26  ;;  %v2453_v26 = vld [vmem:[%s5056_s12 + $0x138] sm:$0xff] }
 0x3bc   : > { %2716 = vmatprep.subr.bf16.mxu0 %v2517_v29  ;;  %v2557_v29 = vunpack.c.h.s8.bf16 %v2453_v26 }
 0x3bf   : > { %2717 = vmatpush2.bf16.msra.mxu0 %v2516_v36  ;;  %v2556_v36 = vunpack.c.h.s8.bf16 %v2452_v35 }
 0x3c0   : > { %2718 = vmatprep.subr.bf16.mxu0 %v2513_v38  ;;  %v2553_v38 = vunpack.c.l.s8.bf16 %v2453_v26 }
 0x3c3   : > { %2719 = vmatpush2.bf16.msra.mxu0 %v2512_v22  ;;  %v2449_v22 = vld [vmem:[%s5056_s12 + $0x118] sm:$0xff] }
 0x3c6   : > { %v2204_v58 = vpop.f32.mrf.mxu0  ;;  %2721 = vmatmul.mubr.bf16.vlgmr.msra.gmra.mxu0 %v5531_v2 }
 0x3c7   : > { %v2245_v53 = vpop.f32.mrf.mxu1  ;;  %v2205_v41 = vadd.f32 %v2204_v58, %v5540_v17  ;;  %v2347_v17 = vrot.slane %v5458_v14, %v5571_v31  ;;  %v2552_v58 = vunpack.c.l.s8.bf16 %v2452_v35 }
 0x3c8   : > { %v2206_v43 = vpop.f32.mrf.mxu0 }
 0x3c9   : > { %v2247_v44 = vpop.f32.mrf.mxu1  ;;  %v2246_v45 = vadd.f32 %v2245_v53, %v2205_v41  ;;  %v2207_v24 = vadd.f32 %v2206_v43, %v5543_v49  ;;  %v2549_v53 = vunpack.c.h.s8.bf16 %v2449_v22  ;;  %v2448_v41 = vld [vmem:[%s5056_s12 + $0x110] sm:$0xff] }
 0x3ca   : > { %v2208_v46 = vpop.f32.mrf.mxu0  ;;  %v2548_v43 = vunpack.c.h.s8.bf16 %v2448_v41 }
 0x3cb   : > { %v2249_v51 = vpop.f32.mrf.mxu1  ;;  %v2248_v2 = vadd.f32 %v2247_v44, %v2207_v24  ;;  %v2545_v44 = vunpack.c.l.s8.bf16 %v2449_v22  ;;  %v2544_v46 = vunpack.c.l.s8.bf16 %v2448_v41 }
 0x3cc   : > { %v2209_v23 = vpop.f32.mrf.mxu0 }
 0x3cd   : > { %v2250_v54 = vpop.f32.mrf.mxu1  ;;  %v2476_v23 = vld [vmem:[%s5056_s12 + $0x1f0] sm:$0xff] }
 0x3ce   : > { %v2604_v54 = vunpack.c.h.s8.bf16 %v2476_v23 }
 0x406   : > { %v2286_v57 = vpop.f32.mrf.mxu0 }
 0x407   : > { %v2327_v19 = vpop.f32.mrf.mxu1  ;;  %v2287_v20 = vadd.f32 %v2286_v57, %v2246_v45  ;;  %v2477_v45 = vld [vmem:[%s5056_s12 + $0x1f8] sm:$0xff] }
 0x408   : > { %v2288_v21 = vpop.f32.mrf.mxu0  ;;  %v2605_v51 = vunpack.c.h.s8.bf16 %v2477_v45  ;;  %v2601_v57 = vunpack.c.l.s8.bf16 %v2477_v45 }
 0x409   : > { %v2329_v59 = vpop.f32.mrf.mxu1  ;;  %v2328_v60 = vadd.f32 %v2327_v19, %v2287_v20  ;;  %v2289_v49 = vadd.f32 %v2288_v21, %v2248_v2  ;;  %v2473_v19 = vld [vmem:[%s5056_s12 + $0x1d8] sm:$0xff]  ;;  %v2600_v20 = vunpack.c.l.s8.bf16 %v2476_v23 }
 0x40a   : > { %v2290_v48 = vpop.f32.mrf.mxu0  ;;  %v2597_v21 = vunpack.c.h.s8.bf16 %v2473_v19 }
 0x40b   : > { %v2331_v56 = vpop.f32.mrf.mxu1  ;;  %v2358_v27 = vmul.f32 %v2347_v17, %v2328_v60  ;;  %v2330_v28 = vadd.f32 %v2329_v59, %v2289_v49  ;;  %v2472_v59 = vld [vmem:[%s5056_s12 + $0x1d0] sm:$0xff]  ;;  %v2593_v49 = vunpack.c.l.s8.bf16 %v2473_v19 }
 0x40c   : > { %v2291_v34 = vpop.f32.mrf.mxu0  ;;  %v2592_v48 = vunpack.c.l.s8.bf16 %v2472_v59 }
 0x40d   : > { %v2332_v62 = vpop.f32.mrf.mxu1  ;;  %v2384_v63 = vadd.f32 %v2373_v61, %v2358_v27  ;;  %v2359_v0 = vmul.f32 %v2351_v47, %v2330_v28  ;;  %v2596_v61 = vunpack.c.h.s8.bf16 %v2472_v59  ;;  %v2469_v47 = vld [vmem:[%s5056_s12 + $0x1b8] sm:$0xff]  ;;  %v2468_v27 = vld [vmem:[%s5056_s12 + $0x1b0] sm:$0xff] }
 0x40e   : > { %v2589_v56 = vunpack.c.h.s8.bf16 %v2469_v47  ;;  %v2588_v28 = vunpack.c.h.s8.bf16 %v2468_v27  ;;  %v2465_v34 = vld [vmem:[%s5056_s12 + $0x198] sm:$0xff]  ;;  %v2584_v62 = vunpack.c.l.s8.bf16 %v2468_v27 }
 0x40f   : > { %v2392_v1 = vmul.f32 0.70710677, %v2384_v63  ;;  %v2385_v52 = vadd.f32 %v2377_v30, %v2359_v0  ;;  %v2388_v3 = vmul.f32 0.5, %v2384_v63  ;;  %v2585_v30 = vunpack.c.l.s8.bf16 %v2469_v47  ;;  %v2464_v0 = vld [vmem:[%s5056_s12 + $0x190] sm:$0xff]  ;;  %s5846_s12 = sld [smem:[#allocation49_spill]] (!%p3802_p4) }
 0x410   : > { %v2581_v63 = vunpack.c.h.s8.bf16 %v2465_v34 }
 0x411   : > { %4126 = verf.f32 %v2392_v1  ;;  %v2393_v37 = vmul.f32 0.70710677, %v2385_v52  ;;  %v2389_v5 = vmul.f32 0.5, %v2385_v52  ;;  %v2580_v1 = vunpack.c.h.s8.bf16 %v2464_v0 }
 0x412   : > { %v2577_v52 = vunpack.c.l.s8.bf16 %v2465_v34 }
 0x413   : > { %4128 = verf.f32 %v2393_v37  ;;  %v2576_v37 = vunpack.c.l.s8.bf16 %v2464_v0 }
 0x41e   : > { %v4127_v50 = vpop.eup %4126 }
 0x41f   : > { %v2400_v14 = vadd.f32 1.0, %v4127_v50 }
 0x420   : > { %v4129_v39 = vpop.eup %4128 }
 0x421   : > { %v2401_v6 = vadd.f32 1.0, %v4129_v39  ;;  %v2404_v7 = vmul.f32 %v2400_v14, %v2388_v3 }
 0x423   : > { %v2405_v8 = vmul.f32 %v2401_v6, %v2389_v5  ;;  %v5585_v12 = vpack.c.bf16 %v2404_v7, %v2404_v7  ;;  %v2406_v5 = vld [vmem:[#allocation2 + $0x10] sm:$0xff] }
 0x425   : > { %v2413_v9 = vpack.c.bf16 %v2405_v8, %v2405_v8 }
 0x427   : > { %2679 = vmatprep.mubr.bf16.mxu1 %v2413_v9 }
 0x428   : > { %2680 = vmatmul.mubr.bf16.vlgmr.msra.gmra.mxu1 %v5585_v12 }
 0x429   : > { %2730 = vmatpush1.bf16.msra.mxu1 %v2572_v10  ;;  %2761 = vmatprep.mubr.bf16.mxu1 %v2413_v9 }
 0x42a   : > { %2731 = vmatprep.subr.bf16.mxu1 %v2569_v13 }
 0x42d   : > { %2732 = vmatpush1.bf16.msra.mxu1 %v2568_v16 }
 0x42e   : > { %2733 = vmatprep.subr.bf16.mxu1 %v2565_v40  ;;  %v2408_v40 = vld [vmem:[#allocation2 + $0x18] sm:$0xff] }
 0x431   : > { %2734 = vmatpush1.bf16.msra.mxu1 %v2564_v42 }
 0x432   : > { %2735 = vmatprep.subr.bf16.mxu1 %v2561_v25 }
 0x435   : > { %2736 = vmatpush1.bf16.msra.mxu1 %v2560_v4 }
 0x436   : > { %2737 = vmatprep.subr.bf16.mxu1 %v2557_v29 }
 0x439   : > { %2738 = vmatpush1.bf16.msra.mxu1 %v2556_v36 }
 0x43a   : > { %2739 = vmatprep.subr.bf16.mxu1 %v2553_v38 }
 0x43d   : > { %2740 = vmatpush1.bf16.msra.mxu1 %v2552_v58 }
 0x43e   : > { %2741 = vmatprep.subr.bf16.mxu1 %v2549_v53 }
 0x441   : > { %2742 = vmatpush1.bf16.msra.mxu1 %v2548_v43 }
 0x442   : > { %2743 = vmatprep.subr.bf16.mxu1 %v2545_v44 }
 0x445   : > { %2744 = vmatpush1.bf16.msra.mxu1 %v2544_v46 }
 0x446   : > { %v2640_v24 = vpop.f32.mrf.mxu0  ;;  %2745 = vmatprep.subr.bf16.mxu1 %v2605_v51 }
 0x448   : > { %v2642_v2 = vpop.f32.mrf.mxu0 }
 0x449   : > { %2746 = vmatpush2.bf16.msra.mxu1 %v2604_v54 }
 0x44a   : > { %v2644_v17 = vpop.f32.mrf.mxu0  ;;  %2747 = vmatprep.subr.bf16.mxu1 %v2601_v57 }
 0x44c   : > { %v2645_v60 = vpop.f32.mrf.mxu0 }
 0x44d   : > { %2748 = vmatpush2.bf16.msra.mxu1 %v2600_v20 }
 0x44e   : > { %2749 = vmatprep.subr.bf16.mxu1 %v2597_v21 }
 0x451   : > { %2750 = vmatpush2.bf16.msra.mxu1 %v2596_v61 }
 0x452   : > { %2751 = vmatprep.subr.bf16.mxu1 %v2593_v49 }
 0x455   : > { %2752 = vmatpush2.bf16.msra.mxu1 %v2592_v48 }
 0x456   : > { %2753 = vmatprep.subr.bf16.mxu1 %v2589_v56 }
 0x459   : > { %2754 = vmatpush2.bf16.msra.mxu1 %v2588_v28 }
 0x45a   : > { %2755 = vmatprep.subr.bf16.mxu1 %v2585_v30 }
 0x45d   : > { %2756 = vmatpush2.bf16.msra.mxu1 %v2584_v62 }
 0x45e   : > { %2757 = vmatprep.subr.bf16.mxu1 %v2581_v63 }
 0x461   : > { %2758 = vmatpush2.bf16.msra.mxu1 %v2580_v1 }
 0x462   : > { %2759 = vmatprep.subr.bf16.mxu1 %v2577_v52 }
 0x465   : > { %2760 = vmatpush2.bf16.msra.mxu1 %v2576_v37 }
 0x468   : > { %2762 = vmatmul.mubr.bf16.vlgmr.msra.gmra.mxu1 %v5585_v12  ;;  %v2409_v12 = vld [vmem:[#allocation2 + $0x8] sm:$0xff] }
 0x486   : > { %v2722_v50 = vpop.f32.mrf.mxu0 }
 0x488   : > { %v2724_v14 = vpop.f32.mrf.mxu0 }
 0x48a   : > { %v2726_v39 = vpop.f32.mrf.mxu0 }
 0x48c   : > { %v2727_v3 = vpop.f32.mrf.mxu0 }
 0x4e8   : > { %v2681_v6 = vpop.f32.mrf.mxu1 }
 0x4e9   : > { %v2682_v7 = vadd.f32 %v2681_v6, %v2640_v24 }
 0x4ea   : > { %v2683_v8 = vpop.f32.mrf.mxu1 }
 0x4eb   : > { %v2770_v9 = vadd.f32 %v2682_v7, %v2406_v5  ;;  %v2684_v10 = vadd.f32 %v2683_v8, %v2642_v2 }
 0x4ec   : > { %v2685_v13 = vpop.f32.mrf.mxu1 }
 0x4ed   : > { %2774 = vst [vmem:[#allocation2 + $0x10] sm:$0xff] %v2770_v9  ;;  %v2771_v15 = vadd.f32 %v2684_v10, %v2407_v33 }
 0x4ee   : > { %v2686_v16 = vpop.f32.mrf.mxu1 }
 0x4ef   : > { %2775 = vst [vmem:[#allocation2] sm:$0xff] %v2771_v15 }
 0x528   : > { %v2763_v18 = vpop.f32.mrf.mxu1 }
 0x529   : > { %v2764_v42 = vadd.f32 %v2763_v18, %v2722_v50 }
 0x52a   : > { %v2765_v25 = vpop.f32.mrf.mxu1 }
 0x52b   : > { %v2772_v26 = vadd.f32 %v2764_v42, %v2408_v40  ;;  %v2766_v4 = vadd.f32 %v2765_v25, %v2724_v14  ;;  %2781 = sbr.rel (%p3802_p4) target bundleno = 2465 (0x9a1), region = 160 }
 0x52c   : > { %v2767_v29 = vpop.f32.mrf.mxu1 }
 0x52d   : > { %2776 = vst [vmem:[#allocation2 + $0x18] sm:$0xff] %v2772_v26  ;;  %v2773_v35 = vadd.f32 %v2766_v4, %v2409_v12 }
 0x52e   : > { %v2768_v36 = vpop.f32.mrf.mxu1 }
 0x52f   : > { %2777 = vst [vmem:[#allocation2 + $0x8] sm:$0xff] %v2773_v35 }
 0x530   : > { %v2869_v38 = vld [vmem:[#allocation14 + $0x38] sm:$0xff]  ;;  %v2868_v58 = vld [vmem:[#allocation14 + $0x30] sm:$0xff]  ;;  %v2867_v23 = vld [vmem:[#allocation14 + $0x28] sm:$0xff]  ;;  %vm4649_vm0 = vmmov 0   ;;  %vm3369_vm1 = vcmask 261120   ;;  %vm3457_vm2 = vcmask 130048  }
 0x531   : > { %v2885_v22 = vld [vmem:[#allocation14 + $0xb8] sm:$0xff]  ;;  %v2907_v53 = vunpack.c.l.s8.bf16 %v2869_v38  ;;  %v2909_v41 = vunpack.c.h.s8.bf16 %v2869_v38  ;;  %v2884_v45 = vld [vmem:[#allocation14 + $0xb0] sm:$0xff]  ;;  %v2908_v46 = vunpack.c.h.s8.bf16 %v2868_v58  ;;  %v2883_v54 = vld [vmem:[#allocation14 + $0xa8] sm:$0xff]  ;;  %v2906_v24 = vunpack.c.l.s8.bf16 %v2868_v58 }
 0x532   : > { %v2939_v43 = vunpack.c.l.s8.bf16 %v2885_v22  ;;  %v2941_v44 = vunpack.c.h.s8.bf16 %v2885_v22  ;;  %v2940_v51 = vunpack.c.h.s8.bf16 %v2884_v45  ;;  %v2938_v57 = vunpack.c.l.s8.bf16 %v2884_v45  ;;  %v2866_v20 = vld [vmem:[#allocation14 + $0x20] sm:$0xff]  ;;  %v2865_v49 = vld [vmem:[#allocation14 + $0x18] sm:$0xff]  ;;  %v2864_v48 = vld [vmem:[#allocation14 + $0x10] sm:$0xff] }
 0x533   : > { %2958 = vmatprep.subr.bf16.mxu0 %v2909_v41  ;;  %v2905_v19 = vunpack.c.h.s8.bf16 %v2867_v23  ;;  %v2937_v2 = vunpack.c.h.s8.bf16 %v2883_v54  ;;  %v2882_v17 = vld [vmem:[#allocation14 + $0xa0] sm:$0xff]  ;;  %v2904_v21 = vunpack.c.h.s8.bf16 %v2866_v20  ;;  %v2903_v60 = vunpack.c.l.s8.bf16 %v2867_v23  ;;  %v2881_v47 = vld [vmem:[#allocation14 + $0x98] sm:$0xff]  ;;  %v2880_v56 = vld [vmem:[#allocation14 + $0x90] sm:$0xff] }
 0x534   : > { %2999 = vmatprep.subr.bf16.mxu1 %v2941_v44  ;;  %2959 = vmatpush1.bf16.msra.mxu0 %v2908_v46  ;;  %v2936_v59 = vunpack.c.h.s8.bf16 %v2882_v17  ;;  %v2935_v61 = vunpack.c.l.s8.bf16 %v2883_v54  ;;  %v2902_v27 = vunpack.c.l.s8.bf16 %v2866_v20  ;;  %v2934_v28 = vunpack.c.l.s8.bf16 %v2882_v17  ;;  %v2786_v30 = vld [vmem:[#allocation11] sm:$0xf]  ;;  %v5605_v34 = vld [vmem:[#allocation13] sm:$0xf]  ;;  %v2783_v0 = vld [vmem:[#allocation2] sm:$0xff] }
 0x535   : > { %3000 = vmatpush1.bf16.msra.mxu1 %v2940_v51  ;;  %2960 = vmatprep.subr.bf16.mxu0 %v2907_v53  ;;  %v2901_v62 = vunpack.c.h.s8.bf16 %v2865_v49  ;;  %v2933_v63 = vunpack.c.h.s8.bf16 %v2881_v47  ;;  %v2900_v52 = vunpack.c.h.s8.bf16 %v2864_v48  ;;  %v2932_v37 = vunpack.c.h.s8.bf16 %v2880_v56  ;;  %v2863_v14 = vld [vmem:[#allocation14 + $0x8] sm:$0xff]  ;;  %v2862_v8 = vld [vmem:[#allocation14] sm:$0xff]  ;;  %v2782_v29 = vld [vmem:[#allocation2 + $0x10] sm:$0xff] }
 0x536   : > { %3001 = vmatprep.subr.bf16.mxu1 %v2939_v43  ;;  %v2785_v1 = vld [vmem:[#allocation2 + $0x8] sm:$0xff]  ;;  %v2899_v50 = vunpack.c.l.s8.bf16 %v2865_v49  ;;  %v2879_v39 = vld [vmem:[#allocation14 + $0x88] sm:$0xff]  ;;  %v2931_v3 = vunpack.c.l.s8.bf16 %v2881_v47  ;;  %v2795_v5 = vrot.slane %v2786_v30, %v5455_v11  ;;  %v2821_v6 = vrot.slane %v5605_v34, %v5455_v11  ;;  %v2878_v9 = vld [vmem:[#allocation14 + $0x80] sm:$0xff] }
 0x537   : > { %v2803_v7 = vrot.slane %v2786_v30, %v5574_v55  ;;  %v2829_v33 = vrot.slane %v5605_v34, %v5574_v55  ;;  %v2898_v15 = vunpack.c.l.s8.bf16 %v2864_v48  ;;  %v2930_v16 = vunpack.c.l.s8.bf16 %v2880_v56  ;;  %v2784_v38 = vld [vmem:[#allocation2 + $0x18] sm:$0xff]  ;;  %v2877_v53 = vld [vmem:[#allocation14 + $0x78] sm:$0xff] }
 0x538   : > { %2961 = vmatpush1.bf16.msra.mxu0 %v2906_v24  ;;  %v2809_v10 = vmul.f32 %v2795_v5, %v2783_v0  ;;  %v2897_v40 = vunpack.c.h.s8.bf16 %v2863_v14  ;;  %v2929_v18 = vunpack.c.h.s8.bf16 %v2879_v39  ;;  %v2791_v25 = vrot.slane %v2786_v30, %v5510_v32  ;;  %v2893_v41 = vld [vmem:[#allocation14 + $0xf8] sm:$0xff] }
 0x539   : > { %3002 = vmatpush1.bf16.msra.mxu1 %v2938_v57  ;;  %2962 = vmatprep.subr.bf16.mxu0 %v2905_v19  ;;  %v2811_v13 = vmul.f32 %v2803_v7, %v2785_v1  ;;  %v2799_v55 = vrot.slane %v2786_v30, %v5571_v31  ;;  %v2896_v35 = vunpack.c.h.s8.bf16 %v2862_v8  ;;  %v2928_v36 = vunpack.c.h.s8.bf16 %v2878_v9  ;;  %v2876_v57 = vld [vmem:[#allocation14 + $0x70] sm:$0xff]  ;;  %v2874_v30 = vld [vmem:[#allocation14 + $0x60] sm:$0xff]  ;;  %v2889_v7 = vld [vmem:[#allocation14 + $0xd8] sm:$0xff] }
 0x53a   : > { %3003 = vmatprep.subr.bf16.mxu1 %v2937_v2  ;;  %v2835_v42 = vadd.f32 %v2821_v6, %v2809_v10  ;;  %v2895_v22 = vunpack.c.l.s8.bf16 %v2863_v14  ;;  %v2927_v58 = vunpack.c.l.s8.bf16 %v2879_v39  ;;  %v2808_v43 = vmul.f32 %v2791_v25, %v2782_v29  ;;  %v2892_v19 = vld [vmem:[#allocation14 + $0xf0] sm:$0xff]  ;;  %v2873_v6 = vld [vmem:[#allocation14 + $0x58] sm:$0xff]  ;;  %v2887_v29 = vld [vmem:[#allocation14 + $0xc8] sm:$0xff] }
 0x53b   : > { %v2837_v12 = vadd.f32 %v2829_v33, %v2811_v13  ;;  %v2817_v44 = vrot.slane %v5605_v34, %v5510_v32  ;;  %v2810_v45 = vmul.f32 %v2799_v55, %v2784_v38  ;;  %v2825_v46 = vrot.slane %v5605_v34, %v5571_v31  ;;  %v2890_v34 = vld [vmem:[#allocation14 + $0xe0] sm:$0xff] }
 0x53c   : > { %2963 = vmatpush1.bf16.msra.mxu0 %v2904_v21  ;;  %v2843_v26 = vmul.f32 0.70710677, %v2835_v42  ;;  %v2894_v51 = vunpack.c.l.s8.bf16 %v2862_v8  ;;  %v2926_v23 = vunpack.c.l.s8.bf16 %v2878_v9  ;;  %v2925_v54 = vunpack.c.h.s8.bf16 %v2877_v53 }
 0x53d   : > { %3004 = vmatpush1.bf16.msra.mxu1 %v2936_v59  ;;  %2964 = vmatprep.subr.bf16.mxu0 %v2903_v60  ;;  %v2845_v4 = vmul.f32 0.70710677, %v2837_v12  ;;  %v2957_v24 = vunpack.c.h.s8.bf16 %v2893_v41  ;;  %v5619_v2 = vadd.f32 %v2817_v44, %v2808_v43  ;;  %v5621_v20 = vadd.f32 %v2825_v46, %v2810_v45  ;;  %v2875_v60 = vld [vmem:[#allocation14 + $0x68] sm:$0xff] }
 0x53e   : > { %3005 = vmatprep.subr.bf16.mxu1 %v2935_v61  ;;  %4146 = verf.f32 %v2843_v26  ;;  %v2924_v17 = vunpack.c.h.s8.bf16 %v2876_v57  ;;  %v2956_v21 = vunpack.c.h.s8.bf16 %v2892_v19  ;;  %v2923_v31 = vunpack.c.l.s8.bf16 %v2877_v53  ;;  %v2891_v61 = vld [vmem:[#allocation14 + $0xe8] sm:$0xff]  ;;  %v2870_v53 = vld [vmem:[#allocation14 + $0x40] sm:$0xff] }
 0x53f   : > { %4148 = verf.f32 %v2845_v4  ;;  %v2955_v59 = vunpack.c.l.s8.bf16 %v2893_v41  ;;  %v2842_v49 = vmul.f32 0.70710677, %v5619_v2  ;;  %v2844_v47 = vmul.f32 0.70710677, %v5621_v20  ;;  %v2871_v4 = vld [vmem:[#allocation14 + $0x48] sm:$0xff]  ;;  %v2886_v41 = vld [vmem:[#allocation14 + $0xc0] sm:$0xff] }
 0x540   : > { %2965 = vmatpush1.bf16.msra.mxu0 %v2902_v27  ;;  %v2922_v48 = vunpack.c.l.s8.bf16 %v2876_v57  ;;  %v2954_v56 = vunpack.c.l.s8.bf16 %v2892_v19  ;;  %v2921_v27 = vunpack.c.h.s8.bf16 %v2875_v60  ;;  %v2841_v0 = vmul.f32 0.5, %v2837_v12 }
 0x541   : > { %3006 = vmatpush1.bf16.msra.mxu1 %v2934_v28  ;;  %2966 = vmatprep.subr.bf16.mxu0 %v2901_v62  ;;  %v2953_v28 = vunpack.c.h.s8.bf16 %v2891_v61  ;;  %v2839_v62 = vmul.f32 0.5, %v2835_v42  ;;  %4150 = verf.f32 %v2842_v49  ;;  %v2919_v39 = vunpack.c.l.s8.bf16 %v2875_v60  ;;  %v4132_v60 = vld [vmem:[#allocation19 + $0x70] sm:$0xff]   ;;  %v4134_v49 = vld [vmem:[#allocation19 + $0x68] sm:$0xff]  }
 0x542   : > { %3007 = vmatprep.subr.bf16.mxu1 %v2933_v63  ;;  %4152 = verf.f32 %v2844_v47  ;;  %v2918_v9 = vunpack.c.l.s8.bf16 %v2874_v30  ;;  %v2950_v10 = vunpack.c.l.s8.bf16 %v2890_v34  ;;  %v2915_v25 = vunpack.c.l.s8.bf16 %v2873_v6  ;;  %v4135_v47 = vld [vmem:[#allocation19 + $0x28] sm:$0xff]  }
 0x543   : > { %v2947_v26 = vunpack.c.l.s8.bf16 %v2889_v7  ;;  %v2838_v43 = vmul.f32 0.5, %v5619_v2  ;;  %v2840_v45 = vmul.f32 0.5, %v5621_v20  ;;  %v4130_v20 = vld [vmem:[#allocation19 + $0x78] sm:$0xff]   ;;  %vm3531_vm3 = vcmask 15360  }
 0x544   : > { %2967 = vmatpush1.bf16.msra.mxu0 %v2900_v52 }
 0x545   : > { %3008 = vmatpush1.bf16.msra.mxu1 %v2932_v37  ;;  %2968 = vmatprep.subr.bf16.mxu0 %v2899_v50  ;;  %v2920_v37 = vunpack.c.h.s8.bf16 %v2874_v30  ;;  %v2952_v50 = vunpack.c.h.s8.bf16 %v2890_v34  ;;  %v4140_v30 = vld [vmem:[#allocation19 + $0x50] sm:$0xff]  }
 0x546   : > { %3009 = vmatprep.subr.bf16.mxu1 %v2931_v3  ;;  %v2951_v3 = vunpack.c.l.s8.bf16 %v2891_v61  ;;  %v4133_v61 = vld [vmem:[#allocation19 + $0x30] sm:$0xff]  }
 0x547   : > { %v4141_v34 = vld [vmem:[#allocation19 + $0x10] sm:$0xff]  }
 0x548   : > { %2969 = vmatpush1.bf16.msra.mxu0 %v2898_v15  ;;  %v2917_v15 = vunpack.c.h.s8.bf16 %v2873_v6 }
 0x549   : > { %3010 = vmatpush1.bf16.msra.mxu1 %v2930_v16  ;;  %2970 = vmatprep.subr.bf16.mxu0 %v2897_v40  ;;  %v2949_v16 = vunpack.c.h.s8.bf16 %v2889_v7  ;;  %v2872_v40 = vld [vmem:[#allocation14 + $0x50] sm:$0xff] }
 0x54a   : > { %3011 = vmatprep.subr.bf16.mxu1 %v2929_v18  ;;  %v2888_v18 = vld [vmem:[#allocation14 + $0xd0] sm:$0xff]  ;;  %v2916_v42 = vunpack.c.h.s8.bf16 %v2872_v40 }
 0x54b   : > { %v4147_v63 = vpop.eup %4146  ;;  %v2948_v12 = vunpack.c.h.s8.bf16 %v2888_v18  ;;  %v2946_v38 = vunpack.c.l.s8.bf16 %v2888_v18 }
 0x54c   : > { %2971 = vmatpush1.bf16.msra.mxu0 %v2896_v35  ;;  %v4149_v1 = vpop.eup %4148  ;;  %v2851_v52 = vadd.f32 1.0, %v4147_v63  ;;  %v4143_v63 = vld [vmem:[#allocation19 + $0x8] sm:$0xff]  }
 0x54d   : > { %3012 = vmatpush1.bf16.msra.mxu1 %v2928_v36  ;;  %2972 = vmatprep.subr.bf16.mxu0 %v2895_v22  ;;  %v2853_v14 = vadd.f32 1.0, %v4149_v1  ;;  %v2914_v36 = vunpack.c.l.s8.bf16 %v2872_v40  ;;  %v2913_v22 = vunpack.c.h.s8.bf16 %v2871_v4  ;;  %v4145_v1 = vld [vmem:[#allocation19] sm:$0xff]  }
 0x54e   : > { %3013 = vmatprep.subr.bf16.mxu1 %v2927_v58  ;;  %v2855_v5 = vmul.f32 %v2851_v52, %v2839_v62  ;;  %v4151_v55 = vpop.eup %4150  ;;  %v2945_v58 = vunpack.c.h.s8.bf16 %v2887_v29  ;;  %v4142_v62 = vld [vmem:[#allocation19 + $0x48] sm:$0xff]   ;;  %v3275_v52 = vld [vmem:[%s5844_s24 + $0x78] sm:$0xff] }
 0x54f   : > { %v2857_v33 = vmul.f32 %v2853_v14, %v2841_v0  ;;  %v4153_v35 = vpop.eup %4152  ;;  %v2850_v44 = vadd.f32 1.0, %v4151_v55  ;;  %v4144_v0 = vld [vmem:[#allocation19 + $0x40] sm:$0xff]   ;;  %v3040_v14 = vld [vmem:[#allocation16] sm:$0x3] }
 0x550   : > { %2973 = vmatpush1.bf16.msra.mxu0 %v2894_v51  ;;  %v2859_v8 = vpack.c.bf16 %v2855_v5, %v2855_v5  ;;  %v2852_v46 = vadd.f32 1.0, %v4153_v35  ;;  %v2912_v51 = vunpack.c.h.s8.bf16 %v2870_v53 }
 0x551   : > { %3014 = vmatpush1.bf16.msra.mxu1 %v2926_v23  ;;  %2974 = vmatprep.subr.bf16.mxu0 %v2925_v54  ;;  %v2861_v13 = vpack.c.bf16 %v2857_v33, %v2857_v33  ;;  %v2944_v23 = vunpack.c.h.s8.bf16 %v2886_v41  ;;  %v2911_v54 = vunpack.c.l.s8.bf16 %v2871_v4  ;;  %v2854_v57 = vmul.f32 %v2850_v44, %v2838_v43  ;;  %v3273_v44 = vld [vmem:[%s5844_s24 + $0x68] sm:$0xff] }
 0x552   : > { %3015 = vmatprep.subr.bf16.mxu1 %v2957_v24  ;;  %2990 = vmatprep.mubr.bf16.mxu0 %v2859_v8  ;;  %v2943_v24 = vunpack.c.l.s8.bf16 %v2887_v29  ;;  %v2856_v19 = vmul.f32 %v2852_v46, %v2840_v45  ;;  %v3049_v8 = vrot.slane %v3040_v14, %v5455_v11  ;;  %v3272_v45 = vld [vmem:[%s5844_s24 + $0x60] sm:$0xff]  ;;  %v3271_v46 = vld [vmem:[%s5844_s24 + $0x58] sm:$0xff] }
 0x553   : > { %3031 = vmatprep.mubr.bf16.mxu1 %v2861_v13  ;;  %v2858_v2 = vpack.c.bf16 %v2854_v57, %v2854_v57  ;;  %v3266_v57 = vld [vmem:[%s5844_s24 + $0x30] sm:$0xff] }
 0x554   : > { %2975 = vmatpush2.bf16.msra.mxu0 %v2924_v17  ;;  %v2910_v17 = vunpack.c.l.s8.bf16 %v2870_v53 }
 0x555   : > { %3016 = vmatpush2.bf16.msra.mxu1 %v2956_v21  ;;  %2976 = vmatprep.subr.bf16.mxu0 %v2923_v31  ;;  %v2942_v21 = vunpack.c.l.s8.bf16 %v2886_v41  ;;  %v2860_v31 = vpack.c.bf16 %v2856_v19, %v2856_v19  ;;  %v3265_v19 = vld [vmem:[%s5844_s24 + $0x28] sm:$0xff] }
 0x556   : > { %3017 = vmatprep.subr.bf16.mxu1 %v2955_v59  ;;  %v4131_v59 = vld [vmem:[#allocation19 + $0x38] sm:$0xff]  }
 0x558   : > { %2977 = vmatpush2.bf16.msra.mxu0 %v2922_v48  ;;  %v4136_v48 = vld [vmem:[#allocation19 + $0x60] sm:$0xff]  }
 0x559   : > { %3018 = vmatpush2.bf16.msra.mxu1 %v2954_v56  ;;  %2978 = vmatprep.subr.bf16.mxu0 %v2921_v27  ;;  %v4137_v56 = vld [vmem:[#allocation19 + $0x20] sm:$0xff]   ;;  %v4138_v27 = vld [vmem:[#allocation19 + $0x58] sm:$0xff]  }
 0x55a   : > { %3019 = vmatprep.subr.bf16.mxu1 %v2953_v28  ;;  %v4139_v28 = vld [vmem:[#allocation19 + $0x18] sm:$0xff]  }
 0x55c   : > { %2979 = vmatpush2.bf16.msra.mxu0 %v2920_v37  ;;  %v4648_v37 = vmov 0.0  }
 0x55d   : > { %3020 = vmatpush2.bf16.msra.mxu1 %v2952_v50  ;;  %2980 = vmatprep.subr.bf16.mxu0 %v2919_v39  ;;  %v3274_v50 = vld [vmem:[%s5844_s24 + $0x70] sm:$0xff]  ;;  %v3054_v39 = vld [vmem:[#allocation17] sm:$0x3] }
 0x55e   : > { %3021 = vmatprep.subr.bf16.mxu1 %v2951_v3  ;;  %v3045_v3 = vrot.slane %v3040_v14, %v5510_v32  ;;  %v3059_v33 = vrot.slane %v3054_v39, %v5510_v32 }
 0x560   : > { %2981 = vmatpush2.bf16.msra.mxu0 %v2918_v9 }
 0x561   : > { %3022 = vmatpush2.bf16.msra.mxu1 %v2950_v10  ;;  %2982 = vmatprep.subr.bf16.mxu0 %v2917_v15 }
 0x562   : > { %3023 = vmatprep.subr.bf16.mxu1 %v2949_v16  ;;  %v3063_v16 = vrot.slane %v3054_v39, %v5455_v11 }
 0x564   : > { %2983 = vmatpush2.bf16.msra.mxu0 %v2916_v42 }
 0x565   : > { %3024 = vmatpush2.bf16.msra.mxu1 %v2948_v12  ;;  %2984 = vmatprep.subr.bf16.mxu0 %v2915_v25 }
 0x566   : > { %3025 = vmatprep.subr.bf16.mxu1 %v2947_v26 }
 0x568   : > { %2985 = vmatpush2.bf16.msra.mxu0 %v2914_v36 }
 0x569   : > { %3026 = vmatpush2.bf16.msra.mxu1 %v2946_v38  ;;  %2986 = vmatprep.subr.bf16.mxu0 %v2913_v22 }
 0x56a   : > { %3027 = vmatprep.subr.bf16.mxu1 %v2945_v58 }
 0x56c   : > { %2987 = vmatpush2.bf16.msra.mxu0 %v2912_v51  ;;  %v3270_v51 = vld [vmem:[%s5844_s24 + $0x50] sm:$0xff] }
 0x56d   : > { %3028 = vmatpush2.bf16.msra.mxu1 %v2944_v23  ;;  %2988 = vmatprep.subr.bf16.mxu0 %v2911_v54  ;;  %v3269_v23 = vld [vmem:[%s5844_s24 + $0x48] sm:$0xff]  ;;  %v3268_v54 = vld [vmem:[%s5844_s24 + $0x40] sm:$0xff] }
 0x56e   : > { %3029 = vmatprep.subr.bf16.mxu1 %v2943_v24  ;;  %v3267_v24 = vld [vmem:[%s5844_s24 + $0x38] sm:$0xff] }
 0x570   : > { %2989 = vmatpush2.bf16.msra.mxu0 %v2910_v17  ;;  %v3264_v17 = vld [vmem:[%s5844_s24 + $0x20] sm:$0xff] }
 0x571   : > { %3030 = vmatpush2.bf16.msra.mxu1 %v2942_v21  ;;  %3832 = vmatprep.subr.bf16.mxu0 %v4130_v20  ;;  %v3263_v21 = vld [vmem:[%s5844_s24 + $0x18] sm:$0xff]  ;;  %v3260_v20 = vld [vmem:[%s5844_s24] sm:$0xff] }
 0x572   : > { %3879 = vmatprep.subr.mxu1 %v4648_v37 }
 0x573   : > { %2991 = vmatmul.mubr.bf16.vlgmr.msra.gmra.mxu0 %v2858_v2  ;;  %v3262_v2 = vld [vmem:[%s5844_s24 + $0x10] sm:$0xff] }
 0x574   : > { %3032 = vmatmul.mubr.bf16.vlgmr.msra.gmra.mxu1 %v2860_v31  ;;  %3833 = vmatpush3.bf16.msra.mxu0 %v4131_v59  ;;  %v3261_v31 = vld [vmem:[%s5844_s24 + $0x8] sm:$0xff] }
 0x575   : > { %3834 = vmatprep.subr.bf16.mxu0 %v4132_v60  ;;  %3880 = vmatpush3.msra.mxu1 %v3275_v52  ;;  %v3803_v60 = vld [vmem:[#allocation20] ss:$0 sm:$0xff]  ;;  %v3358_v52 = vld [vmem:[%s5845_s15] sm:$0xff] }
 0x576   : > { %3881 = vmatprep.subr.mxu1 %v4648_v37  ;;  %3911 = vmatprep.mubr.msk.f32.mxu1 %vm4649_vm0, %v4648_v37 }
 0x577   : > { %3882 = vmatpush3.msra.mxu1 %v3274_v50  ;;  %v3820_v50 = vld [vmem:[#allocation22] ss:$0 sm:$0xff] }
 0x578   : > { %3835 = vmatpush3.bf16.msra.mxu0 %v4133_v61  ;;  %3883 = vmatprep.subr.mxu1 %v4648_v37 }
 0x579   : > { %3836 = vmatprep.subr.bf16.mxu0 %v4134_v49  ;;  %3884 = vmatpush3.msra.mxu1 %v3273_v44 }
 0x57a   : > { %3885 = vmatprep.subr.mxu1 %v4648_v37 }
 0x57b   : > { %3886 = vmatpush3.msra.mxu1 %v3272_v45 }
 0x57c   : > { %3837 = vmatpush3.bf16.msra.mxu0 %v4135_v47  ;;  %3887 = vmatprep.subr.mxu1 %v4648_v37 }
 0x57d   : > { %3838 = vmatprep.subr.bf16.mxu0 %v4136_v48  ;;  %3888 = vmatpush3.msra.mxu1 %v3271_v46 }
 0x57e   : > { %3889 = vmatprep.subr.mxu1 %v4648_v37 }
 0x57f   : > { %3890 = vmatpush3.msra.mxu1 %v3270_v51 }
 0x580   : > { %3839 = vmatpush3.bf16.msra.mxu0 %v4137_v56  ;;  %3891 = vmatprep.subr.mxu1 %v4648_v37 }
 0x581   : > { %3840 = vmatprep.subr.bf16.mxu0 %v4138_v27  ;;  %3892 = vmatpush3.msra.mxu1 %v3269_v23 }
 0x582   : > { %3893 = vmatprep.subr.mxu1 %v4648_v37 }
 0x583   : > { %3894 = vmatpush3.msra.mxu1 %v3268_v54 }
 0x584   : > { %3841 = vmatpush3.bf16.msra.mxu0 %v4139_v28  ;;  %3895 = vmatprep.subr.mxu1 %v4648_v37 }
 0x585   : > { %3842 = vmatprep.subr.bf16.mxu0 %v4140_v30  ;;  %3896 = vmatpush3.msra.mxu1 %v3267_v24 }
 0x586   : > { %3897 = vmatprep.subr.mxu1 %v4648_v37 }
 0x587   : > { %3898 = vmatpush3.msra.mxu1 %v3266_v57 }
 0x588   : > { %3843 = vmatpush3.bf16.msra.mxu0 %v4141_v34  ;;  %3899 = vmatprep.subr.mxu1 %v4648_v37 }
 0x589   : > { %3844 = vmatprep.subr.bf16.mxu0 %v4142_v62  ;;  %3900 = vmatpush3.msra.mxu1 %v3265_v19 }
 0x58a   : > { %3901 = vmatprep.subr.mxu1 %v4648_v37 }
 0x58b   : > { %3902 = vmatpush3.msra.mxu1 %v3264_v17 }
 0x58c   : > { %3845 = vmatpush3.bf16.msra.mxu0 %v4143_v63  ;;  %3903 = vmatprep.subr.mxu1 %v4648_v37  ;;  %v3361_v63 = vld [vmem:[%s5845_s15 + $0x18] sm:$0xff] }
 0x58d   : > { %3846 = vmatprep.subr.bf16.mxu0 %v4144_v0  ;;  %3904 = vmatpush3.msra.mxu1 %v3263_v21  ;;  %v3360_v0 = vld [vmem:[%s5845_s15 + $0x10] sm:$0xff] }
 0x58e   : > { %3905 = vmatprep.subr.mxu1 %v4648_v37 }
 0x58f   : > { %3906 = vmatpush3.msra.mxu1 %v3262_v2 }
 0x590   : > { %3847 = vmatpush3.bf16.msra.mxu0 %v4145_v1  ;;  %3907 = vmatprep.subr.mxu1 %v4648_v37  ;;  %v3359_v1 = vld [vmem:[%s5845_s15 + $0x8] sm:$0xff] }
 0x591   : > { %3914 = vmatprep.subr.mxu0 %v4648_v37  ;;  %3908 = vmatpush3.msra.mxu1 %v3261_v31 }
 0x592   : > { %3909 = vmatprep.subr.mxu1 %v4648_v37 }
 0x593   : > { %3910 = vmatpush3.msra.mxu1 %v3260_v20 }
 0x594   : > { %3925 = vmatprep.subr.mxu1 %v4648_v37 }
 0x633   : > { %v2992_v5 = vpop.f32.mrf.mxu0 }
 0x634   : > { %v3033_v6 = vpop.f32.mrf.mxu1 }
 0x635   : > { %v3034_v7 = vadd.f32 %v3033_v6, %v2992_v5  ;;  %v2994_v9 = vpop.f32.mrf.mxu0 }
 0x636   : > { %v3035_v10 = vpop.f32.mrf.mxu1 }
 0x637   : > { %v3052_v13 = vmul.f32 %v3045_v3, %v3034_v7  ;;  %v3036_v15 = vadd.f32 %v3035_v10, %v2994_v9  ;;  %v2996_v40 = vpop.f32.mrf.mxu0  ;;  %v3449_v9 = vld [vmem:[%s5846_s12 + $0x8] sm:$0xff]  ;;  %v3448_v10 = vld [vmem:[%s5846_s12] sm:$0xff] }
 0x638   : > { %v3037_v18 = vpop.f32.mrf.mxu1 }
 0x639   : > { %v3066_v42 = vadd.f32 %v3059_v33, %v3052_v13  ;;  %v3053_v12 = vmul.f32 %v3049_v8, %v3036_v15  ;;  %v2997_v25 = vpop.f32.mrf.mxu0  ;;  %v3821_v13 = vld [vmem:[#allocation23] ss:$0 sm:$0xff] }
 0x63a   : > { %v3038_v26 = vpop.f32.mrf.mxu1 }
 0x63b   : > { %v3070_v4 = vmul.f32 0.70710677, %v3066_v42  ;;  %v3067_v29 = vadd.f32 %v3063_v16, %v3053_v12  ;;  %v3068_v38 = vmul.f32 0.5, %v3066_v42 }
 0x63d   : > { %4154 = verf.f32 %v3070_v4  ;;  %v3071_v55 = vmul.f32 0.70710677, %v3067_v29  ;;  %v3069_v22 = vmul.f32 0.5, %v3067_v29  ;;  %v3823_v4 = vld [vmem:[#allocation25] ss:$0 sm:$0xff] }
 0x63f   : > { %4156 = verf.f32 %v3071_v55 }
 0x64a   : > { %v4155_v32 = vpop.eup %4154 }
 0x64b   : > { %v3074_v35 = vadd.f32 1.0, %v4155_v32 }
 0x64c   : > { %v4157_v36 = vpop.eup %4156 }
 0x64d   : > { %v3075_v58 = vadd.f32 1.0, %v4157_v36  ;;  %v3076_v53 = vmul.f32 %v3074_v35, %v3068_v38 }
 0x64f   : > { %v3077_v41 = vmul.f32 %v3075_v58, %v3069_v22  ;;  %v3078_v43 = vpack.c.bf16 %v3076_v53, %v3076_v53 }
 0x651   : > { %v3079_v11 = vpack.c.bf16 %v3077_v41, %v3077_v41 }
 0x653   : > { %3247 = vmatprep.mubr.bf16.mxu0 %v3079_v11 }
 0x654   : > { %3248 = vmatmul.mubr.bf16.vlgmr.msra.gmra.mxu0 %v3078_v43 }
 0x655   : > { %3922 = vmatprep.mubr.msk.f32.mxu0 %vm4649_vm0, %v4648_v37  ;;  %3915 = vmatpush3.msra.mxu0 %v3361_v63 }
 0x656   : > { %3916 = vmatprep.subr.mxu0 %v4648_v37 }
 0x657   : > { %3917 = vmatpush3.msra.mxu0 %v3360_v0 }
 0x658   : > { %3918 = vmatprep.subr.mxu0 %v4648_v37 }
 0x659   : > { %3919 = vmatpush3.msra.mxu0 %v3359_v1 }
 0x65a   : > { %3920 = vmatprep.subr.mxu0 %v4648_v37 }
 0x65b   : > { %3921 = vmatpush3.msra.mxu0 %v3358_v52 }
 0x714   : > { %v3848_v59 = vpop.f32.mrf.mxu0 }
 0x716   : > { %v3849_v61 = vpop.f32.mrf.mxu0 }
 0x717   : > { %v3850_v49 = vadd.f32 %v3849_v61, %v3848_v59 }
 0x718   : > { %v3851_v47 = vpop.f32.mrf.mxu0 }
 0x719   : > { %v3250_v48 = vadd.f32 %v3850_v49, %v3803_v60 }
 0x71a   : > { %v3852_v56 = vpop.f32.mrf.mxu0 }
 0x71b   : > { %v3256_v27 = vmul.f32 0.70710677, %v3250_v48  ;;  %v3255_v30 = vmul.f32 0.5, %v3250_v48 }
 0x71d   : > { %4158 = verf.f32 %v3256_v27 }
 0x72a   : > { %v4159_v28 = vpop.eup %4158 }
 0x72b   : > { %v3258_v34 = vadd.f32 1.0, %v4159_v28 }
 0x72d   : > { %v3259_v62 = vmul.f32 %v3258_v34, %v3255_v30 }
 0x72f   : > { %3912 = vmatmul.mubr.f32.vlgmr.msra.gmra.mxu1 %v3259_v62 }
 0x730   : > { %3929 = vmatprep.mubr.msk.f32.mxu1 %vm4649_vm0, %v4648_v37  ;;  %3926 = vmatpush3.msra.mxu1 %v3449_v9 }
 0x731   : > { %3927 = vmatprep.subr.mxu1 %v4648_v37 }
 0x732   : > { %3928 = vmatpush3.msra.mxu1 %v3448_v10 }
 0x7ef   : > { %v3349_v14 = vpop.f32.mrf.mxu1 }
 0x7f0   : > { %v3350_v39 = vadd.f32 %v3820_v50, %v3349_v14 }
 0x7f1   : > { %v3913_v3 = vpop.f32.mrf.mxu1 }
 0x7f2   : > { %v3354_v5 = vmul.f32 0.70710677, %v3350_v39  ;;  %v3353_v7 = vmul.f32 0.5, %v3350_v39 }
 0x7f4   : > { %4160 = verf.f32 %v3354_v5 }
 0x801   : > { %v4161_v6 = vpop.eup %4160 }
 0x802   : > { %v3356_v33 = vadd.f32 1.0, %v4161_v6 }
 0x804   : > { %v3357_v8 = vmul.f32 %v3356_v33, %v3353_v7 }
 0x806   : > { %3923 = vmatmul.mubr.msk.f32.vlgmr.msra.gmra.mxu0 %vm3369_vm1, %v3357_v8 }
 0x8c6   : > { %v3439_v15 = vpop.f32.mrf.mxu0 }
 0x8c7   : > { %v3440_v16 = vadd.f32 %v3821_v13, %v3439_v15 }
 0x8c8   : > { %v3924_v40 = vpop.f32.mrf.mxu0 }
 0x8c9   : > { %v3444_v18 = vmul.f32 0.70710677, %v3440_v16  ;;  %v3443_v12 = vmul.f32 0.5, %v3440_v16 }
 0x8cb   : > { %4162 = verf.f32 %v3444_v18 }
 0x8d8   : > { %v4163_v42 = vpop.eup %4162 }
 0x8d9   : > { %v3446_v25 = vadd.f32 1.0, %v4163_v42 }
 0x8db   : > { %v3447_v26 = vmul.f32 %v3446_v25, %v3443_v12 }
 0x8dd   : > { %3930 = vmatmul.mubr.msk.f32.vlgmr.msra.gmra.mxu1 %vm3457_vm2, %v3447_v26 }
 0x99d   : > { %v3527_v29 = vpop.f32.mrf.mxu1 }
 0x99e   : > { %v3528_v37 = vadd.f32 %v3823_v4, %v3527_v29 }
 0x99f   : > { %v3931_v55 = vpop.f32.mrf.mxu1 }
 0x9a0   : > { %3532 = vst.msk [vmem:[%s5847_s25] sm:$0xff] %vm3531_vm3, %v3528_v37 }
 0x9a1 PF: > { %s5848_s30 = sld [smem:[#allocation36_spill]] }
 0x9a2   : > { %s5849_s27 = sld [smem:[#allocation34_spill]] }
 0x9a3   : > { %s5850_s28 = sld [smem:[#allocation35_spill]] }
 0x9a4   : > { %s5851_s29 = sld [smem:[#allocation37_spill]] }
 0x9a7   : > { %p37_p6 = scmp.ge.s32.totalorder %s5848_s30, 4  }
 0x9a9   :  { %39 = sbr.rel (!%p37_p6) target bundleno = 24 (0x18), region = 216 }
 0x9ae   :  { %3544 = vsyncpa [#allocation4], 1 }
 0x9af   :  { %3546 = vsyncpa [#allocation4 + $0x1], 1 }
 0x9b0   :  { %3547 = vsyncpa [#allocation6], 1 }
 0x9b1   :  { %3549 = vsyncpa [#allocation6 + $0x1], 1 }
 0x9b2   :  { %3550 = vsyncpa [#allocation9], 1 }
 0x9b3   :  { %3552 = vsyncpa [#allocation9 + $0x1], 1 }
 0x9b4   :  { %3553 = vsyncpa [#allocation12], 1 }
 0x9b5   :  { %3554 = vsyncpa [#allocation15], 1 }
 0x9b6   :  { %3555 = vsyncpa [#allocation18], 1 }
 0x9b7   :  { %3556 = vsyncpa [#allocation21], 1 }
 0x9b8   :  { %3557 = vsyncpa [#allocation24], 1 }

</bundles_post_ra>
